<compile_context>
chip_gen: v7x
topology: tpu7x:2x2x1
jax: 0.10.0
libtpu: 0.0.40
codegen_flags: <defaults>
</compile_context>

<pallas_src>
import jax
import jax.numpy as jnp
from jax.experimental import pallas as pl
from jax.experimental.pallas import tpu as pltpu


TAPS_3x3 = tuple((dy, dx) for dy in range(3) for dx in range(3))
TAPS_2x2 = ((0, 0), (0, 1), (1, 0), (1, 1))
GN_EPS = 1e-5


# ---------------------------------------------------------------------------
# In-kernel helpers
# ---------------------------------------------------------------------------

def _group_norm(y, g, gamma, beta):
    """GroupNorm for one sample. y: (HW, C) f32 post-ReLU activations.

    g is a (C, C) group-indicator matrix pre-scaled by 1/(HW * group_size),
    so a single (1,C)@(C,C) matmul broadcasts the per-group statistic back to
    every channel of the group."""
    s1 = jnp.sum(y, axis=0, keepdims=True)                 # (1, C)
    s2 = jnp.sum(y * y, axis=0, keepdims=True)             # (1, C)
    mean = jnp.dot(s1, g, preferred_element_type=jnp.float32)
    ex2 = jnp.dot(s2, g, preferred_element_type=jnp.float32)
    var = jnp.maximum(ex2 - mean * mean, 0.0)              # guard cancellation
    inv = jax.lax.rsqrt(var + GN_EPS)
    return (y - mean) * inv * gamma + beta                 # (HW, C) f32


def _conv_from_padded(load_tap, w_ref, taps, hw, cin, cout):
    """Sum of shifted-slice matmuls: im2col never leaves VMEM."""
    acc = jnp.zeros((hw, cout), jnp.float32)
    for t, (dy, dx) in enumerate(taps):
        xs = load_tap(dy, dx).reshape(hw, cin).astype(jnp.bfloat16)
        acc = acc + jnp.dot(xs, w_ref[t], preferred_element_type=jnp.float32)
    return acc


def _make_group_mat(c, num_groups, hw):
    gs = c // num_groups
    gidx = jnp.arange(c) // gs
    return (gidx[:, None] == gidx[None, :]).astype(jnp.float32) / float(hw * gs)


# ---------------------------------------------------------------------------
# Kernel A: conv1 (3x3, s1, pad 1) + bias + ReLU + GroupNorm(8, 64)
#           -> writes the ZERO-PADDED activation (next layer's input) directly.
# ---------------------------------------------------------------------------

def make_conv1_kernel(h, w, cin, cout):
    hw = h * w

    def kernel(x_ref, w_ref, b_ref, g_ref, gamma_ref, beta_ref, o_ref):
        def load_tap(dy, dx):
            return x_ref[0, dy:dy + h, dx:dx + w, :]        # (h, w, cin)

        acc = _conv_from_padded(load_tap, w_ref, TAPS_3x3, hw, cin, cout)
        y = jnp.maximum(acc + b_ref[...], 0.0)              # bias + ReLU (f32)
        gn = _group_norm(y, g_ref[...], gamma_ref[...], beta_ref[...])

        # Emit the padded activation: zero border + interior store, so the
        # wrapper never does a jnp.pad HBM round-trip.
        o_ref[...] = jnp.zeros(o_ref.shape, o_ref.dtype)
        o_ref[0, 1:h + 1, 1:w + 1, :] = gn.reshape(h, w, cout).astype(o_ref.dtype)

    return kernel


def conv1_gn(xp, w_taps, bias, gamma, beta, *, h, w, num_groups=8):
    """xp: (N, h+2, w+2, Cin) f32, already zero padded.
    Returns (N, h+2, w+2, 64) f32, zero padded (ready for the next conv)."""
    n, hp, wp, cin = xp.shape
    nt, kc, cout = w_taps.shape
    assert kc == cin and nt == 9
    g_mat = _make_group_mat(cout, num_groups, h * w)

    kernel = make_conv1_kernel(h, w, cin, cout)
    return pl.pallas_call(
        kernel,
        out_shape=jax.ShapeDtypeStruct((n, hp, wp, cout), jnp.float32),
        grid_spec=pltpu.PrefetchScalarGridSpec(
            num_scalar_prefetch=0,
            grid=(n,),
            in_specs=[
                pl.BlockSpec((1, hp, wp, cin), lambda i: (i, 0, 0, 0)),
                pl.BlockSpec((nt, cin, cout), lambda i: (0, 0, 0)),
                pl.BlockSpec((1, cout), lambda i: (0, 0)),
                pl.BlockSpec((cout, cout), lambda i: (0, 0)),
                pl.BlockSpec((1, cout), lambda i: (0, 0)),
                pl.BlockSpec((1, cout), lambda i: (0, 0)),
            ],
            out_specs=pl.BlockSpec((1, hp, wp, cout), lambda i: (i, 0, 0, 0)),
        ),
        compiler_params=pltpu.CompilerParams(
            dimension_semantics=("parallel",)),
    )(xp, w_taps.astype(jnp.bfloat16), bias.reshape(1, cout),
      g_mat, gamma.reshape(1, cout), beta.reshape(1, cout))


# ---------------------------------------------------------------------------
# Kernel B: conv2 (3x3 s2 rewritten as 2x2 s1 over space-to-depth input),
#           conv3, conv4 — each + bias + ReLU + GroupNorm(8, 128) — and the
#           final AdaptiveAvgPool2d((1,1)), all fused.  conv3/conv4 inputs are
#           padded inside a single reused VMEM scratch buffer.
# ---------------------------------------------------------------------------

def make_conv234_kernel(ho, wo, cs2d, c):
    hw = ho * wo

    def kernel(x2_ref, w2_ref, b2_ref, ga2_ref, be2_ref,
               w3_ref, b3_ref, ga3_ref, be3_ref,
               w4_ref, b4_ref, ga4_ref, be4_ref,
               g_ref, o_ref, pad_ref):
        g = g_ref[...]                                       # (c, c) f32

        # ---- conv2: 2x2 taps over the space-to-depth input ----
        def load2(dy, dx):
            return x2_ref[0, dy:dy + ho, dx:dx + wo, :]      # (ho, wo, cs2d)

        acc = _conv_from_padded(load2, w2_ref, TAPS_2x2, hw, cs2d, c)
        y = jnp.maximum(acc + b2_ref[...], 0.0)
        gn = _group_norm(y, g, ga2_ref[...], be2_ref[...])

        # Stash the zero-padded activation in VMEM (never goes to HBM).
        pad_ref[...] = jnp.zeros(pad_ref.shape, pad_ref.dtype)
        pad_ref[1:ho + 1, 1:wo + 1, :] = gn.reshape(ho, wo, c).astype(pad_ref.dtype)

        def load_pad(dy, dx):
            return pad_ref[dy:dy + ho, dx:dx + wo, :]        # (ho, wo, c)

        # ---- conv3 ----
        acc = _conv_from_padded(load_pad, w3_ref, TAPS_3x3, hw, c, c)
        y = jnp.maximum(acc + b3_ref[...], 0.0)
        gn = _group_norm(y, g, ga3_ref[...], be3_ref[...])

        # Border of pad_ref is still zero; only refresh the interior.
        pad_ref[1:ho + 1, 1:wo + 1, :] = gn.reshape(ho, wo, c).astype(pad_ref.dtype)

        # ---- conv4 + fused AdaptiveAvgPool2d((1,1)) ----
        acc = _conv_from_padded(load_pad, w4_ref, TAPS_3x3, hw, c, c)
        y = jnp.maximum(acc + b4_ref[...], 0.0)
        gn = _group_norm(y, g, ga4_ref[...], be4_ref[...])
        o_ref[0] = jnp.mean(gn, axis=0, keepdims=True).astype(o_ref.dtype)

    return kernel


def conv234_gn(x2, w2_taps, b2, ga2, be2, w3_taps, b3, ga3, be3,
               w4_taps, b4, ga4, be4, *, ho, wo, num_groups=8):
    """x2: (N, ho+1, wo+1, 4*64) f32 space-to-depth of the padded conv1 output.
    Returns (N, 1, 128) f32 pooled features."""
    n, hs, ws, cs2d = x2.shape
    c = w2_taps.shape[-1]
    assert hs == ho + 1 and ws == wo + 1
    g_mat = _make_group_mat(c, num_groups, ho * wo)
    bf = jnp.bfloat16
    vec = pl.BlockSpec((1, c), lambda i: (0, 0))

    kernel = make_conv234_kernel(ho, wo, cs2d, c)
    return pl.pallas_call(
        kernel,
        out_shape=jax.ShapeDtypeStruct((n, 1, c), jnp.float32),
        grid_spec=pltpu.PrefetchScalarGridSpec(
            num_scalar_prefetch=0,
            grid=(n,),
            in_specs=[
                pl.BlockSpec((1, hs, ws, cs2d), lambda i: (i, 0, 0, 0)),
                pl.BlockSpec((4, cs2d, c), lambda i: (0, 0, 0)),
                vec, vec, vec,
                pl.BlockSpec((9, c, c), lambda i: (0, 0, 0)),
                vec, vec, vec,
                pl.BlockSpec((9, c, c), lambda i: (0, 0, 0)),
                vec, vec, vec,
                pl.BlockSpec((c, c), lambda i: (0, 0)),
            ],
            out_specs=pl.BlockSpec((1, 1, c), lambda i: (i, 0, 0)),
            scratch_shapes=[pltpu.VMEM((ho + 2, wo + 2, c), jnp.float32)],
        ),
        compiler_params=pltpu.CompilerParams(
            dimension_semantics=("parallel",)),
    )(x2,
      w2_taps.astype(bf), b2.reshape(1, c), ga2.reshape(1, c), be2.reshape(1, c),
      w3_taps.astype(bf), b3.reshape(1, c), ga3.reshape(1, c), be3.reshape(1, c),
      w4_taps.astype(bf), b4.reshape(1, c), ga4.reshape(1, c), be4.reshape(1, c),
      g_mat)


# ---------------------------------------------------------------------------
# Plain-JAX layout glue (cheap: pad of the raw input / space-to-depth only)
# ---------------------------------------------------------------------------

def pad_hw1(x_nhwc):
    return jnp.pad(x_nhwc, ((0, 0), (1, 1), (1, 1), (0, 0)))


def space_to_depth2(xp):
    """(N, Hp, Wp, C) with Hp, Wp even -> (N, Hp//2, Wp//2, 4*C)."""
    n, hp, wp, c = xp.shape
    x = xp.reshape(n, hp // 2, 2, wp // 2, 2, c)
    x = jnp.transpose(x, (0, 1, 3, 2, 4, 5))
    return x.reshape(n, hp // 2, wp // 2, 4 * c)


def stride2_eff_weight(w_hwio):
    """Rewrite 3x3/stride-2 conv weights as 2x2/stride-1 weights over the
    space-to-depth input. Returns (4, 4*Cin, Cout), tap order (qy, qx)."""
    cin, cout = w_hwio.shape[2], w_hwio.shape[3]
    w_eff = jnp.zeros((2, 2, 2, 2, cin, cout), w_hwio.dtype)
    for qy in range(2):
        for qx in range(2):
            for ry in range(2):
                for rx in range(2):
                    dy, dx = 2 * qy + ry, 2 * qx + rx
                    if dy < 3 and dx < 3:
                        w_eff = w_eff.at[qy, qx, ry, rx].set(w_hwio[dy, dx])
    return w_eff.reshape(4, 4 * cin, cout)


# ---------------------------------------------------------------------------
# Parameter init (deterministic, PyTorch-style uniform for convs)
# ---------------------------------------------------------------------------

def init_conv(key, cin, cout):
    k1, k2 = jax.random.split(key)
    bound = 1.0 / jnp.sqrt(float(cin * 9))
    w = jax.random.uniform(k1, (3, 3, cin, cout), jnp.float32, -bound, bound)
    b = jax.random.uniform(k2, (cout,), jnp.float32, -bound, bound)
    return w, b


def init_params(key, cin):
    keys = jax.random.split(key, 4)
    w1, b1 = init_conv(keys[0], cin, 64)
    w2, b2 = init_conv(keys[1], 64, 128)
    w3, b3 = init_conv(keys[2], 128, 128)
    w4, b4 = init_conv(keys[3], 128, 128)
    return {
        "conv1": (w1, b1), "conv2": (w2, b2), "conv3": (w3, b3), "conv4": (w4, b4),
        "bn0": (jnp.ones((64,), jnp.float32), jnp.zeros((64,), jnp.float32)),
        "bn1": (jnp.ones((128,), jnp.float32), jnp.zeros((128,), jnp.float32)),
        "bn2": (jnp.ones((128,), jnp.float32), jnp.zeros((128,), jnp.float32)),
        "bn3": (jnp.ones((128,), jnp.float32), jnp.zeros((128,), jnp.float32)),
    }


# ---------------------------------------------------------------------------
# Forward pass (matches MNIST_CNN.forward semantics)
# ---------------------------------------------------------------------------

def mnist_cnn_forward(x_nchw, params):
    # layout: NCHW (PyTorch) -> NHWC internally; output is (N, 128) features.
    x = jnp.transpose(x_nchw, (0, 2, 3, 1)).astype(jnp.float32)
    n, h, w, cin = x.shape
    assert h % 2 == 0 and w % 2 == 0, "even spatial dims expected"

    # conv1 (3x3, s1, pad 1) + ReLU + GroupNorm(8, 64); kernel emits padded out
    w1, b1 = params["conv1"]
    ga1, be1 = params["bn0"]
    y1p = conv1_gn(pad_hw1(x), w1.reshape(9, cin, 64), b1, ga1, be1, h=h, w=w)
    # y1p: (n, h+2, w+2, 64), border already zero

    # conv2 (3x3, s2) as 2x2 s1 over space-to-depth, then conv3, conv4 and the
    # global average pool, all fused in one kernel (per-sample grid step).
    x2 = space_to_depth2(y1p)                       # (n, (h+2)//2, (w+2)//2, 256)
    w2, b2 = params["conv2"]
    w3, b3 = params["conv3"]
    w4, b4 = params["conv4"]
    ga2, be2 = params["bn1"]
    ga3, be3 = params["bn2"]
    ga4, be4 = params["bn3"]
    ho2, wo2 = h // 2, w // 2
    feats = conv234_gn(x2, stride2_eff_weight(w2), b2, ga2, be2,
                       w3.reshape(9, 128, 128), b3, ga3, be3,
                       w4.reshape(9, 128, 128), b4, ga4, be4,
                       ho=ho2, wo=wo2)
    return feats.reshape(n, 128)


if __name__ == "__main__":
    key = jax.random.PRNGKey(0)
    k_x, k_p = jax.random.split(key)

    N, CIN, H, W = 2, 3, 16, 16
    x = jax.random.normal(k_x, (N, CIN, H, W), jnp.float32)
    params = init_params(k_p, CIN)

    fwd = jax.jit(mnist_cnn_forward)
    feats = fwd(x, params)
    feats = jax.block_until_ready(feats)

    assert feats.shape == (N, 128), feats.shape
    assert bool(jnp.all(jnp.isfinite(feats)))
    print("KERNEL_OK")
</pallas_src>

<mosaic_0001>
module attributes {stable_mosaic.version = 11 : i64} {
  func.func @kernel(%arg0: i32, %arg1: memref<1x18x18x3xf32, #tpu.memory_space<vmem>>, %arg2: memref<9x3x64xbf16, #tpu.memory_space<vmem>>, %arg3: memref<1x64xf32, #tpu.memory_space<vmem>>, %arg4: memref<64x64xf32, #tpu.memory_space<vmem>>, %arg5: memref<1x64xf32, #tpu.memory_space<vmem>>, %arg6: memref<1x64xf32, #tpu.memory_space<vmem>>, %arg7: memref<1x18x18x64xf32, #tpu.memory_space<vmem>>) attributes {dimension_semantics = [#tpu.dimension_semantics<parallel>], iteration_bounds = array<i64: 2>, scalar_prefetch = 0 : i64, scratch_operands = 0 : i64, tpu.core_type = #tpu.core_type<tc>, window_params = [{transform_indices = @transform_0, window_bounds = array<i64: 1, 18, 18, 3>}, {pipeline_mode = #tpu.pipeline_mode<synchronous>, transform_indices = @transform_1, window_bounds = array<i64: 9, 3, 64>}, {pipeline_mode = #tpu.pipeline_mode<synchronous>, transform_indices = @transform_2, window_bounds = array<i64: 1, 64>}, {pipeline_mode = #tpu.pipeline_mode<synchronous>, transform_indices = @transform_3, window_bounds = array<i64: 64, 64>}, {pipeline_mode = #tpu.pipeline_mode<synchronous>, transform_indices = @transform_4, window_bounds = array<i64: 1, 64>}, {pipeline_mode = #tpu.pipeline_mode<synchronous>, transform_indices = @transform_5, window_bounds = array<i64: 1, 64>}, {transform_indices = @transform_6, window_bounds = array<i64: 1, 18, 18, 64>}]} {
    %cst = arith.constant 0.000000e+00 : f32
    %0 = vector.broadcast %cst : f32 to vector<256x64xf32>
    %c0 = arith.constant 0 : index
    %c0_0 = arith.constant 0 : index
    %c0_1 = arith.constant 0 : index
    %c0_2 = arith.constant 0 : index
    %1 = vector.load %arg1[%c0, %c0_0, %c0_1, %c0_2] : memref<1x18x18x3xf32, #tpu.memory_space<vmem>>, vector<1x16x16x3xf32>
    %2 = vector.shape_cast %1 : vector<1x16x16x3xf32> to vector<16x16x3xf32>
    %3 = vector.shape_cast %2 : vector<16x16x3xf32> to vector<256x3xf32>
    %4 = arith.truncf %3 : vector<256x3xf32> to vector<256x3xbf16>
    %c0_3 = arith.constant 0 : index
    %c0_4 = arith.constant 0 : index
    %c0_5 = arith.constant 0 : index
    %5 = vector.load %arg2[%c0_3, %c0_4, %c0_5] : memref<9x3x64xbf16, #tpu.memory_space<vmem>>, vector<1x3x64xbf16>
    %6 = vector.shape_cast %5 : vector<1x3x64xbf16> to vector<3x64xbf16>
    %cst_6 = arith.constant dense<0.000000e+00> : vector<256x64xf32>
    %7 = tpu.matmul %4, %6, %cst_6 {dimension_numbers = #tpu.dot_dimension_numbers<[1], [0], [0], [1], [0, 0, 1, 1], [], []>} : vector<256x3xbf16>, vector<3x64xbf16>, vector<256x64xf32> -> vector<256x64xf32>
    %8 = arith.addf %0, %7 : vector<256x64xf32>
    %c0_7 = arith.constant 0 : index
    %c0_8 = arith.constant 0 : index
    %c1 = arith.constant 1 : index
    %c0_9 = arith.constant 0 : index
    %9 = vector.load %arg1[%c0_7, %c0_8, %c1, %c0_9] : memref<1x18x18x3xf32, #tpu.memory_space<vmem>>, vector<1x16x16x3xf32>
    %10 = vector.shape_cast %9 : vector<1x16x16x3xf32> to vector<16x16x3xf32>
    %11 = vector.shape_cast %10 : vector<16x16x3xf32> to vector<256x3xf32>
    %12 = arith.truncf %11 : vector<256x3xf32> to vector<256x3xbf16>
    %c1_10 = arith.constant 1 : index
    %c0_11 = arith.constant 0 : index
    %c0_12 = arith.constant 0 : index
    %13 = vector.load %arg2[%c1_10, %c0_11, %c0_12] : memref<9x3x64xbf16, #tpu.memory_space<vmem>>, vector<1x3x64xbf16>
    %14 = vector.shape_cast %13 : vector<1x3x64xbf16> to vector<3x64xbf16>
    %cst_13 = arith.constant dense<0.000000e+00> : vector<256x64xf32>
    %15 = tpu.matmul %12, %14, %cst_13 {dimension_numbers = #tpu.dot_dimension_numbers<[1], [0], [0], [1], [0, 0, 1, 1], [], []>} : vector<256x3xbf16>, vector<3x64xbf16>, vector<256x64xf32> -> vector<256x64xf32>
    %16 = arith.addf %8, %15 : vector<256x64xf32>
    %c0_14 = arith.constant 0 : index
    %c0_15 = arith.constant 0 : index
    %c2 = arith.constant 2 : index
    %c0_16 = arith.constant 0 : index
    %17 = vector.load %arg1[%c0_14, %c0_15, %c2, %c0_16] : memref<1x18x18x3xf32, #tpu.memory_space<vmem>>, vector<1x16x16x3xf32>
    %18 = vector.shape_cast %17 : vector<1x16x16x3xf32> to vector<16x16x3xf32>
    %19 = vector.shape_cast %18 : vector<16x16x3xf32> to vector<256x3xf32>
    %20 = arith.truncf %19 : vector<256x3xf32> to vector<256x3xbf16>
    %c2_17 = arith.constant 2 : index
    %c0_18 = arith.constant 0 : index
    %c0_19 = arith.constant 0 : index
    %21 = vector.load %arg2[%c2_17, %c0_18, %c0_19] : memref<9x3x64xbf16, #tpu.memory_space<vmem>>, vector<1x3x64xbf16>
    %22 = vector.shape_cast %21 : vector<1x3x64xbf16> to vector<3x64xbf16>
    %cst_20 = arith.constant dense<0.000000e+00> : vector<256x64xf32>
    %23 = tpu.matmul %20, %22, %cst_20 {dimension_numbers = #tpu.dot_dimension_numbers<[1], [0], [0], [1], [0, 0, 1, 1], [], []>} : vector<256x3xbf16>, vector<3x64xbf16>, vector<256x64xf32> -> vector<256x64xf32>
    %24 = arith.addf %16, %23 : vector<256x64xf32>
    %c0_21 = arith.constant 0 : index
    %c1_22 = arith.constant 1 : index
    %c0_23 = arith.constant 0 : index
    %c0_24 = arith.constant 0 : index
    %25 = vector.load %arg1[%c0_21, %c1_22, %c0_23, %c0_24] : memref<1x18x18x3xf32, #tpu.memory_space<vmem>>, vector<1x16x16x3xf32>
    %26 = vector.shape_cast %25 : vector<1x16x16x3xf32> to vector<16x16x3xf32>
    %27 = vector.shape_cast %26 : vector<16x16x3xf32> to vector<256x3xf32>
    %28 = arith.truncf %27 : vector<256x3xf32> to vector<256x3xbf16>
    %c3 = arith.constant 3 : index
    %c0_25 = arith.constant 0 : index
    %c0_26 = arith.constant 0 : index
    %29 = vector.load %arg2[%c3, %c0_25, %c0_26] : memref<9x3x64xbf16, #tpu.memory_space<vmem>>, vector<1x3x64xbf16>
    %30 = vector.shape_cast %29 : vector<1x3x64xbf16> to vector<3x64xbf16>
    %cst_27 = arith.constant dense<0.000000e+00> : vector<256x64xf32>
    %31 = tpu.matmul %28, %30, %cst_27 {dimension_numbers = #tpu.dot_dimension_numbers<[1], [0], [0], [1], [0, 0, 1, 1], [], []>} : vector<256x3xbf16>, vector<3x64xbf16>, vector<256x64xf32> -> vector<256x64xf32>
    %32 = arith.addf %24, %31 : vector<256x64xf32>
    %c0_28 = arith.constant 0 : index
    %c1_29 = arith.constant 1 : index
    %c1_30 = arith.constant 1 : index
    %c0_31 = arith.constant 0 : index
    %33 = vector.load %arg1[%c0_28, %c1_29, %c1_30, %c0_31] : memref<1x18x18x3xf32, #tpu.memory_space<vmem>>, vector<1x16x16x3xf32>
    %34 = vector.shape_cast %33 : vector<1x16x16x3xf32> to vector<16x16x3xf32>
    %35 = vector.shape_cast %34 : vector<16x16x3xf32> to vector<256x3xf32>
    %36 = arith.truncf %35 : vector<256x3xf32> to vector<256x3xbf16>
    %c4 = arith.constant 4 : index
    %c0_32 = arith.constant 0 : index
    %c0_33 = arith.constant 0 : index
    %37 = vector.load %arg2[%c4, %c0_32, %c0_33] : memref<9x3x64xbf16, #tpu.memory_space<vmem>>, vector<1x3x64xbf16>
    %38 = vector.shape_cast %37 : vector<1x3x64xbf16> to vector<3x64xbf16>
    %cst_34 = arith.constant dense<0.000000e+00> : vector<256x64xf32>
    %39 = tpu.matmul %36, %38, %cst_34 {dimension_numbers = #tpu.dot_dimension_numbers<[1], [0], [0], [1], [0, 0, 1, 1], [], []>} : vector<256x3xbf16>, vector<3x64xbf16>, vector<256x64xf32> -> vector<256x64xf32>
    %40 = arith.addf %32, %39 : vector<256x64xf32>
    %c0_35 = arith.constant 0 : index
    %c1_36 = arith.constant 1 : index
    %c2_37 = arith.constant 2 : index
    %c0_38 = arith.constant 0 : index
    %41 = vector.load %arg1[%c0_35, %c1_36, %c2_37, %c0_38] : memref<1x18x18x3xf32, #tpu.memory_space<vmem>>, vector<1x16x16x3xf32>
    %42 = vector.shape_cast %41 : vector<1x16x16x3xf32> to vector<16x16x3xf32>
    %43 = vector.shape_cast %42 : vector<16x16x3xf32> to vector<256x3xf32>
    %44 = arith.truncf %43 : vector<256x3xf32> to vector<256x3xbf16>
    %c5 = arith.constant 5 : index
    %c0_39 = arith.constant 0 : index
    %c0_40 = arith.constant 0 : index
    %45 = vector.load %arg2[%c5, %c0_39, %c0_40] : memref<9x3x64xbf16, #tpu.memory_space<vmem>>, vector<1x3x64xbf16>
    %46 = vector.shape_cast %45 : vector<1x3x64xbf16> to vector<3x64xbf16>
    %cst_41 = arith.constant dense<0.000000e+00> : vector<256x64xf32>
    %47 = tpu.matmul %44, %46, %cst_41 {dimension_numbers = #tpu.dot_dimension_numbers<[1], [0], [0], [1], [0, 0, 1, 1], [], []>} : vector<256x3xbf16>, vector<3x64xbf16>, vector<256x64xf32> -> vector<256x64xf32>
    %48 = arith.addf %40, %47 : vector<256x64xf32>
    %c0_42 = arith.constant 0 : index
    %c2_43 = arith.constant 2 : index
    %c0_44 = arith.constant 0 : index
    %c0_45 = arith.constant 0 : index
    %49 = vector.load %arg1[%c0_42, %c2_43, %c0_44, %c0_45] : memref<1x18x18x3xf32, #tpu.memory_space<vmem>>, vector<1x16x16x3xf32>
    %50 = vector.shape_cast %49 : vector<1x16x16x3xf32> to vector<16x16x3xf32>
    %51 = vector.shape_cast %50 : vector<16x16x3xf32> to vector<256x3xf32>
    %52 = arith.truncf %51 : vector<256x3xf32> to vector<256x3xbf16>
    %c6 = arith.constant 6 : index
    %c0_46 = arith.constant 0 : index
    %c0_47 = arith.constant 0 : index
    %53 = vector.load %arg2[%c6, %c0_46, %c0_47] : memref<9x3x64xbf16, #tpu.memory_space<vmem>>, vector<1x3x64xbf16>
    %54 = vector.shape_cast %53 : vector<1x3x64xbf16> to vector<3x64xbf16>
    %cst_48 = arith.constant dense<0.000000e+00> : vector<256x64xf32>
    %55 = tpu.matmul %52, %54, %cst_48 {dimension_numbers = #tpu.dot_dimension_numbers<[1], [0], [0], [1], [0, 0, 1, 1], [], []>} : vector<256x3xbf16>, vector<3x64xbf16>, vector<256x64xf32> -> vector<256x64xf32>
    %56 = arith.addf %48, %55 : vector<256x64xf32>
    %c0_49 = arith.constant 0 : index
    %c2_50 = arith.constant 2 : index
    %c1_51 = arith.constant 1 : index
    %c0_52 = arith.constant 0 : index
    %57 = vector.load %arg1[%c0_49, %c2_50, %c1_51, %c0_52] : memref<1x18x18x3xf32, #tpu.memory_space<vmem>>, vector<1x16x16x3xf32>
    %58 = vector.shape_cast %57 : vector<1x16x16x3xf32> to vector<16x16x3xf32>
    %59 = vector.shape_cast %58 : vector<16x16x3xf32> to vector<256x3xf32>
    %60 = arith.truncf %59 : vector<256x3xf32> to vector<256x3xbf16>
    %c7 = arith.constant 7 : index
    %c0_53 = arith.constant 0 : index
    %c0_54 = arith.constant 0 : index
    %61 = vector.load %arg2[%c7, %c0_53, %c0_54] : memref<9x3x64xbf16, #tpu.memory_space<vmem>>, vector<1x3x64xbf16>
    %62 = vector.shape_cast %61 : vector<1x3x64xbf16> to vector<3x64xbf16>
    %cst_55 = arith.constant dense<0.000000e+00> : vector<256x64xf32>
    %63 = tpu.matmul %60, %62, %cst_55 {dimension_numbers = #tpu.dot_dimension_numbers<[1], [0], [0], [1], [0, 0, 1, 1], [], []>} : vector<256x3xbf16>, vector<3x64xbf16>, vector<256x64xf32> -> vector<256x64xf32>
    %64 = arith.addf %56, %63 : vector<256x64xf32>
    %c0_56 = arith.constant 0 : index
    %c2_57 = arith.constant 2 : index
    %c2_58 = arith.constant 2 : index
    %c0_59 = arith.constant 0 : index
    %65 = vector.load %arg1[%c0_56, %c2_57, %c2_58, %c0_59] : memref<1x18x18x3xf32, #tpu.memory_space<vmem>>, vector<1x16x16x3xf32>
    %66 = vector.shape_cast %65 : vector<1x16x16x3xf32> to vector<16x16x3xf32>
    %67 = vector.shape_cast %66 : vector<16x16x3xf32> to vector<256x3xf32>
    %68 = arith.truncf %67 : vector<256x3xf32> to vector<256x3xbf16>
    %c8 = arith.constant 8 : index
    %c0_60 = arith.constant 0 : index
    %c0_61 = arith.constant 0 : index
    %69 = vector.load %arg2[%c8, %c0_60, %c0_61] : memref<9x3x64xbf16, #tpu.memory_space<vmem>>, vector<1x3x64xbf16>
    %70 = vector.shape_cast %69 : vector<1x3x64xbf16> to vector<3x64xbf16>
    %cst_62 = arith.constant dense<0.000000e+00> : vector<256x64xf32>
    %71 = tpu.matmul %68, %70, %cst_62 {dimension_numbers = #tpu.dot_dimension_numbers<[1], [0], [0], [1], [0, 0, 1, 1], [], []>} : vector<256x3xbf16>, vector<3x64xbf16>, vector<256x64xf32> -> vector<256x64xf32>
    %72 = arith.addf %64, %71 : vector<256x64xf32>
    %c0_63 = arith.constant 0 : index
    %c0_64 = arith.constant 0 : index
    %73 = vector.load %arg3[%c0_63, %c0_64] : memref<1x64xf32, #tpu.memory_space<vmem>>, vector<1x64xf32>
    %74 = vector.broadcast %73 : vector<1x64xf32> to vector<256x64xf32>
    %75 = arith.addf %72, %74 : vector<256x64xf32>
    %cst_65 = arith.constant 0.000000e+00 : f32
    %76 = vector.broadcast %cst_65 : f32 to vector<256x64xf32>
    %77 = arith.maximumf %75, %76 : vector<256x64xf32>
    %c0_66 = arith.constant 0 : index
    %c0_67 = arith.constant 0 : index
    %78 = vector.load %arg4[%c0_66, %c0_67] : memref<64x64xf32, #tpu.memory_space<vmem>>, vector<64x64xf32>
    %c0_68 = arith.constant 0 : index
    %c0_69 = arith.constant 0 : index
    %79 = vector.load %arg5[%c0_68, %c0_69] : memref<1x64xf32, #tpu.memory_space<vmem>>, vector<1x64xf32>
    %c0_70 = arith.constant 0 : index
    %c0_71 = arith.constant 0 : index
    %80 = vector.load %arg6[%c0_70, %c0_71] : memref<1x64xf32, #tpu.memory_space<vmem>>, vector<1x64xf32>
    %cst_72 = arith.constant dense<0.000000e+00> : vector<64xf32>
    %81 = vector.multi_reduction <add>, %77, %cst_72 [0] : vector<256x64xf32> to vector<64xf32>
    %82 = vector.shape_cast %81 : vector<64xf32> to vector<1x64xf32>
    %83 = arith.mulf %77, %77 : vector<256x64xf32>
    %cst_73 = arith.constant dense<0.000000e+00> : vector<64xf32>
    %84 = vector.multi_reduction <add>, %83, %cst_73 [0] : vector<256x64xf32> to vector<64xf32>
    %85 = vector.shape_cast %84 : vector<64xf32> to vector<1x64xf32>
    %cst_74 = arith.constant dense<0.000000e+00> : vector<1x64xf32>
    %86 = tpu.matmul %82, %78, %cst_74 {dimension_numbers = #tpu.dot_dimension_numbers<[1], [0], [0], [1], [0, 0, 1, 1], [], []>} : vector<1x64xf32>, vector<64x64xf32>, vector<1x64xf32> -> vector<1x64xf32>
    %cst_75 = arith.constant dense<0.000000e+00> : vector<1x64xf32>
    %87 = tpu.matmul %85, %78, %cst_75 {dimension_numbers = #tpu.dot_dimension_numbers<[1], [0], [0], [1], [0, 0, 1, 1], [], []>} : vector<1x64xf32>, vector<64x64xf32>, vector<1x64xf32> -> vector<1x64xf32>
    %88 = arith.mulf %86, %86 : vector<1x64xf32>
    %89 = arith.subf %87, %88 : vector<1x64xf32>
    %cst_76 = arith.constant 0.000000e+00 : f32
    %90 = vector.broadcast %cst_76 : f32 to vector<1x64xf32>
    %91 = arith.maximumf %89, %90 : vector<1x64xf32>
    %cst_77 = arith.constant 9.99999974E-6 : f32
    %92 = vector.broadcast %cst_77 : f32 to vector<1x64xf32>
    %93 = arith.addf %91, %92 : vector<1x64xf32>
    %94 = math.rsqrt %93 : vector<1x64xf32>
    %95 = vector.broadcast %86 : vector<1x64xf32> to vector<256x64xf32>
    %96 = arith.subf %77, %95 : vector<256x64xf32>
    %97 = vector.broadcast %94 : vector<1x64xf32> to vector<256x64xf32>
    %98 = arith.mulf %96, %97 : vector<256x64xf32>
    %99 = vector.broadcast %79 : vector<1x64xf32> to vector<256x64xf32>
    %100 = arith.mulf %98, %99 : vector<256x64xf32>
    %101 = vector.broadcast %80 : vector<1x64xf32> to vector<256x64xf32>
    %102 = arith.addf %100, %101 : vector<256x64xf32>
    %cst_78 = arith.constant 0.000000e+00 : f32
    %103 = vector.broadcast %cst_78 : f32 to vector<1x18x18x64xf32>
    %c0_79 = arith.constant 0 : index
    %c0_80 = arith.constant 0 : index
    %c0_81 = arith.constant 0 : index
    %c0_82 = arith.constant 0 : index
    %104 = vector.load %arg7[%c0_79, %c0_80, %c0_81, %c0_82] : memref<1x18x18x64xf32, #tpu.memory_space<vmem>>, vector<1x18x18x64xf32>
    tpu.vector_store %arg7[%c0_79, %c0_80, %c0_81, %c0_82], %103 {strides = array<i32>} : memref<1x18x18x64xf32, #tpu.memory_space<vmem>>, vector<1x18x18x64xf32>,
    %105 = vector.shape_cast %102 : vector<256x64xf32> to vector<16x16x64xf32>
    %c0_83 = arith.constant 0 : index
    %c1_84 = arith.constant 1 : index
    %c1_85 = arith.constant 1 : index
    %c0_86 = arith.constant 0 : index
    %106 = vector.load %arg7[%c0_83, %c1_84, %c1_85, %c0_86] : memref<1x18x18x64xf32, #tpu.memory_space<vmem>>, vector<1x16x16x64xf32>
    %107 = vector.shape_cast %106 : vector<1x16x16x64xf32> to vector<16x16x64xf32>
    %108 = vector.shape_cast %105 : vector<16x16x64xf32> to vector<1x16x16x64xf32>
    tpu.vector_store %arg7[%c0_83, %c1_84, %c1_85, %c0_86], %108 {strides = array<i32>} : memref<1x18x18x64xf32, #tpu.memory_space<vmem>>, vector<1x16x16x64xf32>,
    return
  }
  func.func @transform_0(%arg0: i32) -> (i32, i32, i32, i32) {
    %c0_i32 = arith.constant 0 : i32
    %c0_i32_0 = arith.constant 0 : i32
    %c0_i32_1 = arith.constant 0 : i32
    %c0_i32_2 = arith.constant 0 : i32
    return %arg0, %c0_i32, %c0_i32_0, %c0_i32_1 : i32, i32, i32, i32
  }
  func.func @transform_1(%arg0: i32) -> (i32, i32, i32) {
    %c0_i32 = arith.constant 0 : i32
    %c0_i32_0 = arith.constant 0 : i32
    %c0_i32_1 = arith.constant 0 : i32
    %c0_i32_2 = arith.constant 0 : i32
    return %c0_i32, %c0_i32_0, %c0_i32_1 : i32, i32, i32
  }
  func.func @transform_2(%arg0: i32) -> (i32, i32) {
    %c0_i32 = arith.constant 0 : i32
    %c0_i32_0 = arith.constant 0 : i32
    %c0_i32_1 = arith.constant 0 : i32
    return %c0_i32, %c0_i32_0 : i32, i32
  }
  func.func @transform_3(%arg0: i32) -> (i32, i32) {
    %c0_i32 = arith.constant 0 : i32
    %c0_i32_0 = arith.constant 0 : i32
    %c0_i32_1 = arith.constant 0 : i32
    return %c0_i32, %c0_i32_0 : i32, i32
  }
  func.func @transform_4(%arg0: i32) -> (i32, i32) {
    %c0_i32 = arith.constant 0 : i32
    %c0_i32_0 = arith.constant 0 : i32
    %c0_i32_1 = arith.constant 0 : i32
    return %c0_i32, %c0_i32_0 : i32, i32
  }
  func.func @transform_5(%arg0: i32) -> (i32, i32) {
    %c0_i32 = arith.constant 0 : i32
    %c0_i32_0 = arith.constant 0 : i32
    %c0_i32_1 = arith.constant 0 : i32
    return %c0_i32, %c0_i32_0 : i32, i32
  }
  func.func @transform_6(%arg0: i32) -> (i32, i32, i32, i32) {
    %c0_i32 = arith.constant 0 : i32
    %c0_i32_0 = arith.constant 0 : i32
    %c0_i32_1 = arith.constant 0 : i32
    %c0_i32_2 = arith.constant 0 : i32
    return %arg0, %c0_i32, %c0_i32_0, %c0_i32_1 : i32, i32, i32, i32
  }
}

module attributes {stable_mosaic.version = 11 : i64} {
  func.func @kernel(%arg0: i32, %arg1: memref<1x9x9x256xf32, #tpu.memory_space<vmem>>, %arg2: memref<4x256x128xbf16, #tpu.memory_space<vmem>>, %arg3: memref<1x128xf32, #tpu.memory_space<vmem>>, %arg4: memref<1x128xf32, #tpu.memory_space<vmem>>, %arg5: memref<1x128xf32, #tpu.memory_space<vmem>>, %arg6: memref<9x128x128xbf16, #tpu.memory_space<vmem>>, %arg7: memref<1x128xf32, #tpu.memory_space<vmem>>, %arg8: memref<1x128xf32, #tpu.memory_space<vmem>>, %arg9: memref<1x128xf32, #tpu.memory_space<vmem>>, %arg10: memref<9x128x128xbf16, #tpu.memory_space<vmem>>, %arg11: memref<1x128xf32, #tpu.memory_space<vmem>>, %arg12: memref<1x128xf32, #tpu.memory_space<vmem>>, %arg13: memref<1x128xf32, #tpu.memory_space<vmem>>, %arg14: memref<128x128xf32, #tpu.memory_space<vmem>>, %arg15: memref<1x1x128xf32, #tpu.memory_space<vmem>>, %arg16: memref<10x10x128xf32, #tpu.memory_space<vmem>>) attributes {dimension_semantics = [#tpu.dimension_semantics<parallel>], iteration_bounds = array<i64: 2>, scalar_prefetch = 0 : i64, scratch_operands = 1 : i64, tpu.core_type = #tpu.core_type<tc>, window_params = [{transform_indices = @transform_0, window_bounds = array<i64: 1, 9, 9, 256>}, {pipeline_mode = #tpu.pipeline_mode<synchronous>, transform_indices = @transform_1, window_bounds = array<i64: 4, 256, 128>}, {pipeline_mode = #tpu.pipeline_mode<synchronous>, transform_indices = @transform_2, window_bounds = array<i64: 1, 128>}, {pipeline_mode = #tpu.pipeline_mode<synchronous>, transform_indices = @transform_3, window_bounds = array<i64: 1, 128>}, {pipeline_mode = #tpu.pipeline_mode<synchronous>, transform_indices = @transform_4, window_bounds = array<i64: 1, 128>}, {pipeline_mode = #tpu.pipeline_mode<synchronous>, transform_indices = @transform_5, window_bounds = array<i64: 9, 128, 128>}, {pipeline_mode = #tpu.pipeline_mode<synchronous>, transform_indices = @transform_6, window_bounds = array<i64: 1, 128>}, {pipeline_mode = #tpu.pipeline_mode<synchronous>, transform_indices = @transform_7, window_bounds = array<i64: 1, 128>}, {pipeline_mode = #tpu.pipeline_mode<synchronous>, transform_indices = @transform_8, window_bounds = array<i64: 1, 128>}, {pipeline_mode = #tpu.pipeline_mode<synchronous>, transform_indices = @transform_9, window_bounds = array<i64: 9, 128, 128>}, {pipeline_mode = #tpu.pipeline_mode<synchronous>, transform_indices = @transform_10, window_bounds = array<i64: 1, 128>}, {pipeline_mode = #tpu.pipeline_mode<synchronous>, transform_indices = @transform_11, window_bounds = array<i64: 1, 128>}, {pipeline_mode = #tpu.pipeline_mode<synchronous>, transform_indices = @transform_12, window_bounds = array<i64: 1, 128>}, {pipeline_mode = #tpu.pipeline_mode<synchronous>, transform_indices = @transform_13, window_bounds = array<i64: 128, 128>}, {transform_indices = @transform_14, window_bounds = array<i64: 1, 1, 128>}]} {
    %c0 = arith.constant 0 : index
    %c0_0 = arith.constant 0 : index
    %0 = vector.load %arg14[%c0, %c0_0] : memref<128x128xf32, #tpu.memory_space<vmem>>, vector<128x128xf32>
    %cst = arith.constant 0.000000e+00 : f32
    %1 = vector.broadcast %cst : f32 to vector<64x128xf32>
    %c0_1 = arith.constant 0 : index
    %c0_2 = arith.constant 0 : index
    %c0_3 = arith.constant 0 : index
    %c0_4 = arith.constant 0 : index
    %2 = vector.load %arg1[%c0_1, %c0_2, %c0_3, %c0_4] : memref<1x9x9x256xf32, #tpu.memory_space<vmem>>, vector<1x8x8x256xf32>
    %3 = vector.shape_cast %2 : vector<1x8x8x256xf32> to vector<8x8x256xf32>
    %4 = vector.shape_cast %3 : vector<8x8x256xf32> to vector<64x256xf32>
    %5 = arith.truncf %4 : vector<64x256xf32> to vector<64x256xbf16>
    %c0_5 = arith.constant 0 : index
    %c0_6 = arith.constant 0 : index
    %c0_7 = arith.constant 0 : index
    %6 = vector.load %arg2[%c0_5, %c0_6, %c0_7] : memref<4x256x128xbf16, #tpu.memory_space<vmem>>, vector<1x256x128xbf16>
    %7 = vector.shape_cast %6 : vector<1x256x128xbf16> to vector<256x128xbf16>
    %cst_8 = arith.constant dense<0.000000e+00> : vector<64x128xf32>
    %8 = tpu.matmul %5, %7, %cst_8 {dimension_numbers = #tpu.dot_dimension_numbers<[1], [0], [0], [1], [0, 0, 1, 1], [], []>} : vector<64x256xbf16>, vector<256x128xbf16>, vector<64x128xf32> -> vector<64x128xf32>
    %9 = arith.addf %1, %8 : vector<64x128xf32>
    %c0_9 = arith.constant 0 : index
    %c0_10 = arith.constant 0 : index
    %c1 = arith.constant 1 : index
    %c0_11 = arith.constant 0 : index
    %10 = vector.load %arg1[%c0_9, %c0_10, %c1, %c0_11] : memref<1x9x9x256xf32, #tpu.memory_space<vmem>>, vector<1x8x8x256xf32>
    %11 = vector.shape_cast %10 : vector<1x8x8x256xf32> to vector<8x8x256xf32>
    %12 = vector.shape_cast %11 : vector<8x8x256xf32> to vector<64x256xf32>
    %13 = arith.truncf %12 : vector<64x256xf32> to vector<64x256xbf16>
    %c1_12 = arith.constant 1 : index
    %c0_13 = arith.constant 0 : index
    %c0_14 = arith.constant 0 : index
    %14 = vector.load %arg2[%c1_12, %c0_13, %c0_14] : memref<4x256x128xbf16, #tpu.memory_space<vmem>>, vector<1x256x128xbf16>
    %15 = vector.shape_cast %14 : vector<1x256x128xbf16> to vector<256x128xbf16>
    %cst_15 = arith.constant dense<0.000000e+00> : vector<64x128xf32>
    %16 = tpu.matmul %13, %15, %cst_15 {dimension_numbers = #tpu.dot_dimension_numbers<[1], [0], [0], [1], [0, 0, 1, 1], [], []>} : vector<64x256xbf16>, vector<256x128xbf16>, vector<64x128xf32> -> vector<64x128xf32>
    %17 = arith.addf %9, %16 : vector<64x128xf32>
    %c0_16 = arith.constant 0 : index
    %c1_17 = arith.constant 1 : index
    %c0_18 = arith.constant 0 : index
    %c0_19 = arith.constant 0 : index
    %18 = vector.load %arg1[%c0_16, %c1_17, %c0_18, %c0_19] : memref<1x9x9x256xf32, #tpu.memory_space<vmem>>, vector<1x8x8x256xf32>
    %19 = vector.shape_cast %18 : vector<1x8x8x256xf32> to vector<8x8x256xf32>
    %20 = vector.shape_cast %19 : vector<8x8x256xf32> to vector<64x256xf32>
    %21 = arith.truncf %20 : vector<64x256xf32> to vector<64x256xbf16>
    %c2 = arith.constant 2 : index
    %c0_20 = arith.constant 0 : index
    %c0_21 = arith.constant 0 : index
    %22 = vector.load %arg2[%c2, %c0_20, %c0_21] : memref<4x256x128xbf16, #tpu.memory_space<vmem>>, vector<1x256x128xbf16>
    %23 = vector.shape_cast %22 : vector<1x256x128xbf16> to vector<256x128xbf16>
    %cst_22 = arith.constant dense<0.000000e+00> : vector<64x128xf32>
    %24 = tpu.matmul %21, %23, %cst_22 {dimension_numbers = #tpu.dot_dimension_numbers<[1], [0], [0], [1], [0, 0, 1, 1], [], []>} : vector<64x256xbf16>, vector<256x128xbf16>, vector<64x128xf32> -> vector<64x128xf32>
    %25 = arith.addf %17, %24 : vector<64x128xf32>
    %c0_23 = arith.constant 0 : index
    %c1_24 = arith.constant 1 : index
    %c1_25 = arith.constant 1 : index
    %c0_26 = arith.constant 0 : index
    %26 = vector.load %arg1[%c0_23, %c1_24, %c1_25, %c0_26] : memref<1x9x9x256xf32, #tpu.memory_space<vmem>>, vector<1x8x8x256xf32>
    %27 = vector.shape_cast %26 : vector<1x8x8x256xf32> to vector<8x8x256xf32>
    %28 = vector.shape_cast %27 : vector<8x8x256xf32> to vector<64x256xf32>
    %29 = arith.truncf %28 : vector<64x256xf32> to vector<64x256xbf16>
    %c3 = arith.constant 3 : index
    %c0_27 = arith.constant 0 : index
    %c0_28 = arith.constant 0 : index
    %30 = vector.load %arg2[%c3, %c0_27, %c0_28] : memref<4x256x128xbf16, #tpu.memory_space<vmem>>, vector<1x256x128xbf16>
    %31 = vector.shape_cast %30 : vector<1x256x128xbf16> to vector<256x128xbf16>
    %cst_29 = arith.constant dense<0.000000e+00> : vector<64x128xf32>
    %32 = tpu.matmul %29, %31, %cst_29 {dimension_numbers = #tpu.dot_dimension_numbers<[1], [0], [0], [1], [0, 0, 1, 1], [], []>} : vector<64x256xbf16>, vector<256x128xbf16>, vector<64x128xf32> -> vector<64x128xf32>
    %33 = arith.addf %25, %32 : vector<64x128xf32>
    %c0_30 = arith.constant 0 : index
    %c0_31 = arith.constant 0 : index
    %34 = vector.load %arg3[%c0_30, %c0_31] : memref<1x128xf32, #tpu.memory_space<vmem>>, vector<1x128xf32>
    %35 = vector.broadcast %34 : vector<1x128xf32> to vector<64x128xf32>
    %36 = arith.addf %33, %35 : vector<64x128xf32>
    %cst_32 = arith.constant 0.000000e+00 : f32
    %37 = vector.broadcast %cst_32 : f32 to vector<64x128xf32>
    %38 = arith.maximumf %36, %37 : vector<64x128xf32>
    %c0_33 = arith.constant 0 : index
    %c0_34 = arith.constant 0 : index
    %39 = vector.load %arg4[%c0_33, %c0_34] : memref<1x128xf32, #tpu.memory_space<vmem>>, vector<1x128xf32>
    %c0_35 = arith.constant 0 : index
    %c0_36 = arith.constant 0 : index
    %40 = vector.load %arg5[%c0_35, %c0_36] : memref<1x128xf32, #tpu.memory_space<vmem>>, vector<1x128xf32>
    %cst_37 = arith.constant dense<0.000000e+00> : vector<128xf32>
    %41 = vector.multi_reduction <add>, %38, %cst_37 [0] : vector<64x128xf32> to vector<128xf32>
    %42 = vector.shape_cast %41 : vector<128xf32> to vector<1x128xf32>
    %43 = arith.mulf %38, %38 : vector<64x128xf32>
    %cst_38 = arith.constant dense<0.000000e+00> : vector<128xf32>
    %44 = vector.multi_reduction <add>, %43, %cst_38 [0] : vector<64x128xf32> to vector<128xf32>
    %45 = vector.shape_cast %44 : vector<128xf32> to vector<1x128xf32>
    %cst_39 = arith.constant dense<0.000000e+00> : vector<1x128xf32>
    %46 = tpu.matmul %42, %0, %cst_39 {dimension_numbers = #tpu.dot_dimension_numbers<[1], [0], [0], [1], [0, 0, 1, 1], [], []>} : vector<1x128xf32>, vector<128x128xf32>, vector<1x128xf32> -> vector<1x128xf32>
    %cst_40 = arith.constant dense<0.000000e+00> : vector<1x128xf32>
    %47 = tpu.matmul %45, %0, %cst_40 {dimension_numbers = #tpu.dot_dimension_numbers<[1], [0], [0], [1], [0, 0, 1, 1], [], []>} : vector<1x128xf32>, vector<128x128xf32>, vector<1x128xf32> -> vector<1x128xf32>
    %48 = arith.mulf %46, %46 : vector<1x128xf32>
    %49 = arith.subf %47, %48 : vector<1x128xf32>
    %cst_41 = arith.constant 0.000000e+00 : f32
    %50 = vector.broadcast %cst_41 : f32 to vector<1x128xf32>
    %51 = arith.maximumf %49, %50 : vector<1x128xf32>
    %cst_42 = arith.constant 9.99999974E-6 : f32
    %52 = vector.broadcast %cst_42 : f32 to vector<1x128xf32>
    %53 = arith.addf %51, %52 : vector<1x128xf32>
    %54 = math.rsqrt %53 : vector<1x128xf32>
    %55 = vector.broadcast %46 : vector<1x128xf32> to vector<64x128xf32>
    %56 = arith.subf %38, %55 : vector<64x128xf32>
    %57 = vector.broadcast %54 : vector<1x128xf32> to vector<64x128xf32>
    %58 = arith.mulf %56, %57 : vector<64x128xf32>
    %59 = vector.broadcast %39 : vector<1x128xf32> to vector<64x128xf32>
    %60 = arith.mulf %58, %59 : vector<64x128xf32>
    %61 = vector.broadcast %40 : vector<1x128xf32> to vector<64x128xf32>
    %62 = arith.addf %60, %61 : vector<64x128xf32>
    %cst_43 = arith.constant 0.000000e+00 : f32
    %63 = vector.broadcast %cst_43 : f32 to vector<10x10x128xf32>
    %c0_44 = arith.constant 0 : index
    %c0_45 = arith.constant 0 : index
    %c0_46 = arith.constant 0 : index
    %64 = vector.load %arg16[%c0_44, %c0_45, %c0_46] : memref<10x10x128xf32, #tpu.memory_space<vmem>>, vector<10x10x128xf32>
    tpu.vector_store %arg16[%c0_44, %c0_45, %c0_46], %63 {strides = array<i32>} : memref<10x10x128xf32, #tpu.memory_space<vmem>>, vector<10x10x128xf32>,
    %65 = vector.shape_cast %62 : vector<64x128xf32> to vector<8x8x128xf32>
    %c1_47 = arith.constant 1 : index
    %c1_48 = arith.constant 1 : index
    %c0_49 = arith.constant 0 : index
    %66 = vector.load %arg16[%c1_47, %c1_48, %c0_49] : memref<10x10x128xf32, #tpu.memory_space<vmem>>, vector<8x8x128xf32>
    tpu.vector_store %arg16[%c1_47, %c1_48, %c0_49], %65 {strides = array<i32>} : memref<10x10x128xf32, #tpu.memory_space<vmem>>, vector<8x8x128xf32>,
    %cst_50 = arith.constant 0.000000e+00 : f32
    %67 = vector.broadcast %cst_50 : f32 to vector<64x128xf32>
    %c0_51 = arith.constant 0 : index
    %c0_52 = arith.constant 0 : index
    %c0_53 = arith.constant 0 : index
    %68 = vector.load %arg16[%c0_51, %c0_52, %c0_53] : memref<10x10x128xf32, #tpu.memory_space<vmem>>, vector<8x8x128xf32>
    %69 = vector.shape_cast %68 : vector<8x8x128xf32> to vector<64x128xf32>
    %70 = arith.truncf %69 : vector<64x128xf32> to vector<64x128xbf16>
    %c0_54 = arith.constant 0 : index
    %c0_55 = arith.constant 0 : index
    %c0_56 = arith.constant 0 : index
    %71 = vector.load %arg6[%c0_54, %c0_55, %c0_56] : memref<9x128x128xbf16, #tpu.memory_space<vmem>>, vector<1x128x128xbf16>
    %72 = vector.shape_cast %71 : vector<1x128x128xbf16> to vector<128x128xbf16>
    %cst_57 = arith.constant dense<0.000000e+00> : vector<64x128xf32>
    %73 = tpu.matmul %70, %72, %cst_57 {dimension_numbers = #tpu.dot_dimension_numbers<[1], [0], [0], [1], [0, 0, 1, 1], [], []>} : vector<64x128xbf16>, vector<128x128xbf16>, vector<64x128xf32> -> vector<64x128xf32>
    %74 = arith.addf %67, %73 : vector<64x128xf32>
    %c0_58 = arith.constant 0 : index
    %c1_59 = arith.constant 1 : index
    %c0_60 = arith.constant 0 : index
    %75 = vector.load %arg16[%c0_58, %c1_59, %c0_60] : memref<10x10x128xf32, #tpu.memory_space<vmem>>, vector<8x8x128xf32>
    %76 = vector.shape_cast %75 : vector<8x8x128xf32> to vector<64x128xf32>
    %77 = arith.truncf %76 : vector<64x128xf32> to vector<64x128xbf16>
    %c1_61 = arith.constant 1 : index
    %c0_62 = arith.constant 0 : index
    %c0_63 = arith.constant 0 : index
    %78 = vector.load %arg6[%c1_61, %c0_62, %c0_63] : memref<9x128x128xbf16, #tpu.memory_space<vmem>>, vector<1x128x128xbf16>
    %79 = vector.shape_cast %78 : vector<1x128x128xbf16> to vector<128x128xbf16>
    %cst_64 = arith.constant dense<0.000000e+00> : vector<64x128xf32>
    %80 = tpu.matmul %77, %79, %cst_64 {dimension_numbers = #tpu.dot_dimension_numbers<[1], [0], [0], [1], [0, 0, 1, 1], [], []>} : vector<64x128xbf16>, vector<128x128xbf16>, vector<64x128xf32> -> vector<64x128xf32>
    %81 = arith.addf %74, %80 : vector<64x128xf32>
    %c0_65 = arith.constant 0 : index
    %c2_66 = arith.constant 2 : index
    %c0_67 = arith.constant 0 : index
    %82 = vector.load %arg16[%c0_65, %c2_66, %c0_67] : memref<10x10x128xf32, #tpu.memory_space<vmem>>, vector<8x8x128xf32>
    %83 = vector.shape_cast %82 : vector<8x8x128xf32> to vector<64x128xf32>
    %84 = arith.truncf %83 : vector<64x128xf32> to vector<64x128xbf16>
    %c2_68 = arith.constant 2 : index
    %c0_69 = arith.constant 0 : index
    %c0_70 = arith.constant 0 : index
    %85 = vector.load %arg6[%c2_68, %c0_69, %c0_70] : memref<9x128x128xbf16, #tpu.memory_space<vmem>>, vector<1x128x128xbf16>
    %86 = vector.shape_cast %85 : vector<1x128x128xbf16> to vector<128x128xbf16>
    %cst_71 = arith.constant dense<0.000000e+00> : vector<64x128xf32>
    %87 = tpu.matmul %84, %86, %cst_71 {dimension_numbers = #tpu.dot_dimension_numbers<[1], [0], [0], [1], [0, 0, 1, 1], [], []>} : vector<64x128xbf16>, vector<128x128xbf16>, vector<64x128xf32> -> vector<64x128xf32>
    %88 = arith.addf %81, %87 : vector<64x128xf32>
    %c1_72 = arith.constant 1 : index
    %c0_73 = arith.constant 0 : index
    %c0_74 = arith.constant 0 : index
    %89 = vector.load %arg16[%c1_72, %c0_73, %c0_74] : memref<10x10x128xf32, #tpu.memory_space<vmem>>, vector<8x8x128xf32>
    %90 = vector.shape_cast %89 : vector<8x8x128xf32> to vector<64x128xf32>
    %91 = arith.truncf %90 : vector<64x128xf32> to vector<64x128xbf16>
    %c3_75 = arith.constant 3 : index
    %c0_76 = arith.constant 0 : index
    %c0_77 = arith.constant 0 : index
    %92 = vector.load %arg6[%c3_75, %c0_76, %c0_77] : memref<9x128x128xbf16, #tpu.memory_space<vmem>>, vector<1x128x128xbf16>
    %93 = vector.shape_cast %92 : vector<1x128x128xbf16> to vector<128x128xbf16>
    %cst_78 = arith.constant dense<0.000000e+00> : vector<64x128xf32>
    %94 = tpu.matmul %91, %93, %cst_78 {dimension_numbers = #tpu.dot_dimension_numbers<[1], [0], [0], [1], [0, 0, 1, 1], [], []>} : vector<64x128xbf16>, vector<128x128xbf16>, vector<64x128xf32> -> vector<64x128xf32>
    %95 = arith.addf %88, %94 : vector<64x128xf32>
    %c1_79 = arith.constant 1 : index
    %c1_80 = arith.constant 1 : index
    %c0_81 = arith.constant 0 : index
    %96 = vector.load %arg16[%c1_79, %c1_80, %c0_81] : memref<10x10x128xf32, #tpu.memory_space<vmem>>, vector<8x8x128xf32>
    %97 = vector.shape_cast %96 : vector<8x8x128xf32> to vector<64x128xf32>
    %98 = arith.truncf %97 : vector<64x128xf32> to vector<64x128xbf16>
    %c4 = arith.constant 4 : index
    %c0_82 = arith.constant 0 : index
    %c0_83 = arith.constant 0 : index
    %99 = vector.load %arg6[%c4, %c0_82, %c0_83] : memref<9x128x128xbf16, #tpu.memory_space<vmem>>, vector<1x128x128xbf16>
    %100 = vector.shape_cast %99 : vector<1x128x128xbf16> to vector<128x128xbf16>
    %cst_84 = arith.constant dense<0.000000e+00> : vector<64x128xf32>
    %101 = tpu.matmul %98, %100, %cst_84 {dimension_numbers = #tpu.dot_dimension_numbers<[1], [0], [0], [1], [0, 0, 1, 1], [], []>} : vector<64x128xbf16>, vector<128x128xbf16>, vector<64x128xf32> -> vector<64x128xf32>
    %102 = arith.addf %95, %101 : vector<64x128xf32>
    %c1_85 = arith.constant 1 : index
    %c2_86 = arith.constant 2 : index
    %c0_87 = arith.constant 0 : index
    %103 = vector.load %arg16[%c1_85, %c2_86, %c0_87] : memref<10x10x128xf32, #tpu.memory_space<vmem>>, vector<8x8x128xf32>
    %104 = vector.shape_cast %103 : vector<8x8x128xf32> to vector<64x128xf32>
    %105 = arith.truncf %104 : vector<64x128xf32> to vector<64x128xbf16>
    %c5 = arith.constant 5 : index
    %c0_88 = arith.constant 0 : index
    %c0_89 = arith.constant 0 : index
    %106 = vector.load %arg6[%c5, %c0_88, %c0_89] : memref<9x128x128xbf16, #tpu.memory_space<vmem>>, vector<1x128x128xbf16>
    %107 = vector.shape_cast %106 : vector<1x128x128xbf16> to vector<128x128xbf16>
    %cst_90 = arith.constant dense<0.000000e+00> : vector<64x128xf32>
    %108 = tpu.matmul %105, %107, %cst_90 {dimension_numbers = #tpu.dot_dimension_numbers<[1], [0], [0], [1], [0, 0, 1, 1], [], []>} : vector<64x128xbf16>, vector<128x128xbf16>, vector<64x128xf32> -> vector<64x128xf32>
    %109 = arith.addf %102, %108 : vector<64x128xf32>
    %c2_91 = arith.constant 2 : index
    %c0_92 = arith.constant 0 : index
    %c0_93 = arith.constant 0 : index
    %110 = vector.load %arg16[%c2_91, %c0_92, %c0_93] : memref<10x10x128xf32, #tpu.memory_space<vmem>>, vector<8x8x128xf32>
    %111 = vector.shape_cast %110 : vector<8x8x128xf32> to vector<64x128xf32>
    %112 = arith.truncf %111 : vector<64x128xf32> to vector<64x128xbf16>
    %c6 = arith.constant 6 : index
    %c0_94 = arith.constant 0 : index
    %c0_95 = arith.constant 0 : index
    %113 = vector.load %arg6[%c6, %c0_94, %c0_95] : memref<9x128x128xbf16, #tpu.memory_space<vmem>>, vector<1x128x128xbf16>
    %114 = vector.shape_cast %113 : vector<1x128x128xbf16> to vector<128x128xbf16>
    %cst_96 = arith.constant dense<0.000000e+00> : vector<64x128xf32>
    %115 = tpu.matmul %112, %114, %cst_96 {dimension_numbers = #tpu.dot_dimension_numbers<[1], [0], [0], [1], [0, 0, 1, 1], [], []>} : vector<64x128xbf16>, vector<128x128xbf16>, vector<64x128xf32> -> vector<64x128xf32>
    %116 = arith.addf %109, %115 : vector<64x128xf32>
    %c2_97 = arith.constant 2 : index
    %c1_98 = arith.constant 1 : index
    %c0_99 = arith.constant 0 : index
    %117 = vector.load %arg16[%c2_97, %c1_98, %c0_99] : memref<10x10x128xf32, #tpu.memory_space<vmem>>, vector<8x8x128xf32>
    %118 = vector.shape_cast %117 : vector<8x8x128xf32> to vector<64x128xf32>
    %119 = arith.truncf %118 : vector<64x128xf32> to vector<64x128xbf16>
    %c7 = arith.constant 7 : index
    %c0_100 = arith.constant 0 : index
    %c0_101 = arith.constant 0 : index
    %120 = vector.load %arg6[%c7, %c0_100, %c0_101] : memref<9x128x128xbf16, #tpu.memory_space<vmem>>, vector<1x128x128xbf16>
    %121 = vector.shape_cast %120 : vector<1x128x128xbf16> to vector<128x128xbf16>
    %cst_102 = arith.constant dense<0.000000e+00> : vector<64x128xf32>
    %122 = tpu.matmul %119, %121, %cst_102 {dimension_numbers = #tpu.dot_dimension_numbers<[1], [0], [0], [1], [0, 0, 1, 1], [], []>} : vector<64x128xbf16>, vector<128x128xbf16>, vector<64x128xf32> -> vector<64x128xf32>
    %123 = arith.addf %116, %122 : vector<64x128xf32>
    %c2_103 = arith.constant 2 : index
    %c2_104 = arith.constant 2 : index
    %c0_105 = arith.constant 0 : index
    %124 = vector.load %arg16[%c2_103, %c2_104, %c0_105] : memref<10x10x128xf32, #tpu.memory_space<vmem>>, vector<8x8x128xf32>
    %125 = vector.shape_cast %124 : vector<8x8x128xf32> to vector<64x128xf32>
    %126 = arith.truncf %125 : vector<64x128xf32> to vector<64x128xbf16>
    %c8 = arith.constant 8 : index
    %c0_106 = arith.constant 0 : index
    %c0_107 = arith.constant 0 : index
    %127 = vector.load %arg6[%c8, %c0_106, %c0_107] : memref<9x128x128xbf16, #tpu.memory_space<vmem>>, vector<1x128x128xbf16>
    %128 = vector.shape_cast %127 : vector<1x128x128xbf16> to vector<128x128xbf16>
    %cst_108 = arith.constant dense<0.000000e+00> : vector<64x128xf32>
    %129 = tpu.matmul %126, %128, %cst_108 {dimension_numbers = #tpu.dot_dimension_numbers<[1], [0], [0], [1], [0, 0, 1, 1], [], []>} : vector<64x128xbf16>, vector<128x128xbf16>, vector<64x128xf32> -> vector<64x128xf32>
    %130 = arith.addf %123, %129 : vector<64x128xf32>
    %c0_109 = arith.constant 0 : index
    %c0_110 = arith.constant 0 : index
    %131 = vector.load %arg7[%c0_109, %c0_110] : memref<1x128xf32, #tpu.memory_space<vmem>>, vector<1x128xf32>
    %132 = vector.broadcast %131 : vector<1x128xf32> to vector<64x128xf32>
    %133 = arith.addf %130, %132 : vector<64x128xf32>
    %cst_111 = arith.constant 0.000000e+00 : f32
    %134 = vector.broadcast %cst_111 : f32 to vector<64x128xf32>
    %135 = arith.maximumf %133, %134 : vector<64x128xf32>
    %c0_112 = arith.constant 0 : index
    %c0_113 = arith.constant 0 : index
    %136 = vector.load %arg8[%c0_112, %c0_113] : memref<1x128xf32, #tpu.memory_space<vmem>>, vector<1x128xf32>
    %c0_114 = arith.constant 0 : index
    %c0_115 = arith.constant 0 : index
    %137 = vector.load %arg9[%c0_114, %c0_115] : memref<1x128xf32, #tpu.memory_space<vmem>>, vector<1x128xf32>
    %cst_116 = arith.constant dense<0.000000e+00> : vector<128xf32>
    %138 = vector.multi_reduction <add>, %135, %cst_116 [0] : vector<64x128xf32> to vector<128xf32>
    %139 = vector.shape_cast %138 : vector<128xf32> to vector<1x128xf32>
    %140 = arith.mulf %135, %135 : vector<64x128xf32>
    %cst_117 = arith.constant dense<0.000000e+00> : vector<128xf32>
    %141 = vector.multi_reduction <add>, %140, %cst_117 [0] : vector<64x128xf32> to vector<128xf32>
    %142 = vector.shape_cast %141 : vector<128xf32> to vector<1x128xf32>
    %cst_118 = arith.constant dense<0.000000e+00> : vector<1x128xf32>
    %143 = tpu.matmul %139, %0, %cst_118 {dimension_numbers = #tpu.dot_dimension_numbers<[1], [0], [0], [1], [0, 0, 1, 1], [], []>} : vector<1x128xf32>, vector<128x128xf32>, vector<1x128xf32> -> vector<1x128xf32>
    %cst_119 = arith.constant dense<0.000000e+00> : vector<1x128xf32>
    %144 = tpu.matmul %142, %0, %cst_119 {dimension_numbers = #tpu.dot_dimension_numbers<[1], [0], [0], [1], [0, 0, 1, 1], [], []>} : vector<1x128xf32>, vector<128x128xf32>, vector<1x128xf32> -> vector<1x128xf32>
    %145 = arith.mulf %143, %143 : vector<1x128xf32>
    %146 = arith.subf %144, %145 : vector<1x128xf32>
    %cst_120 = arith.constant 0.000000e+00 : f32
    %147 = vector.broadcast %cst_120 : f32 to vector<1x128xf32>
    %148 = arith.maximumf %146, %147 : vector<1x128xf32>
    %cst_121 = arith.constant 9.99999974E-6 : f32
    %149 = vector.broadcast %cst_121 : f32 to vector<1x128xf32>
    %150 = arith.addf %148, %149 : vector<1x128xf32>
    %151 = math.rsqrt %150 : vector<1x128xf32>
    %152 = vector.broadcast %143 : vector<1x128xf32> to vector<64x128xf32>
    %153 = arith.subf %135, %152 : vector<64x128xf32>
    %154 = vector.broadcast %151 : vector<1x128xf32> to vector<64x128xf32>
    %155 = arith.mulf %153, %154 : vector<64x128xf32>
    %156 = vector.broadcast %136 : vector<1x128xf32> to vector<64x128xf32>
    %157 = arith.mulf %155, %156 : vector<64x128xf32>
    %158 = vector.broadcast %137 : vector<1x128xf32> to vector<64x128xf32>
    %159 = arith.addf %157, %158 : vector<64x128xf32>
    %160 = vector.shape_cast %159 : vector<64x128xf32> to vector<8x8x128xf32>
    %c1_122 = arith.constant 1 : index
    %c1_123 = arith.constant 1 : index
    %c0_124 = arith.constant 0 : index
    %161 = vector.load %arg16[%c1_122, %c1_123, %c0_124] : memref<10x10x128xf32, #tpu.memory_space<vmem>>, vector<8x8x128xf32>
    tpu.vector_store %arg16[%c1_122, %c1_123, %c0_124], %160 {strides = array<i32>} : memref<10x10x128xf32, #tpu.memory_space<vmem>>, vector<8x8x128xf32>,
    %cst_125 = arith.constant 0.000000e+00 : f32
    %162 = vector.broadcast %cst_125 : f32 to vector<64x128xf32>
    %c0_126 = arith.constant 0 : index
    %c0_127 = arith.constant 0 : index
    %c0_128 = arith.constant 0 : index
    %163 = vector.load %arg16[%c0_126, %c0_127, %c0_128] : memref<10x10x128xf32, #tpu.memory_space<vmem>>, vector<8x8x128xf32>
    %164 = vector.shape_cast %163 : vector<8x8x128xf32> to vector<64x128xf32>
    %165 = arith.truncf %164 : vector<64x128xf32> to vector<64x128xbf16>
    %c0_129 = arith.constant 0 : index
    %c0_130 = arith.constant 0 : index
    %c0_131 = arith.constant 0 : index
    %166 = vector.load %arg10[%c0_129, %c0_130, %c0_131] : memref<9x128x128xbf16, #tpu.memory_space<vmem>>, vector<1x128x128xbf16>
    %167 = vector.shape_cast %166 : vector<1x128x128xbf16> to vector<128x128xbf16>
    %cst_132 = arith.constant dense<0.000000e+00> : vector<64x128xf32>
    %168 = tpu.matmul %165, %167, %cst_132 {dimension_numbers = #tpu.dot_dimension_numbers<[1], [0], [0], [1], [0, 0, 1, 1], [], []>} : vector<64x128xbf16>, vector<128x128xbf16>, vector<64x128xf32> -> vector<64x128xf32>
    %169 = arith.addf %162, %168 : vector<64x128xf32>
    %c0_133 = arith.constant 0 : index
    %c1_134 = arith.constant 1 : index
    %c0_135 = arith.constant 0 : index
    %170 = vector.load %arg16[%c0_133, %c1_134, %c0_135] : memref<10x10x128xf32, #tpu.memory_space<vmem>>, vector<8x8x128xf32>
    %171 = vector.shape_cast %170 : vector<8x8x128xf32> to vector<64x128xf32>
    %172 = arith.truncf %171 : vector<64x128xf32> to vector<64x128xbf16>
    %c1_136 = arith.constant 1 : index
    %c0_137 = arith.constant 0 : index
    %c0_138 = arith.constant 0 : index
    %173 = vector.load %arg10[%c1_136, %c0_137, %c0_138] : memref<9x128x128xbf16, #tpu.memory_space<vmem>>, vector<1x128x128xbf16>
    %174 = vector.shape_cast %173 : vector<1x128x128xbf16> to vector<128x128xbf16>
    %cst_139 = arith.constant dense<0.000000e+00> : vector<64x128xf32>
    %175 = tpu.matmul %172, %174, %cst_139 {dimension_numbers = #tpu.dot_dimension_numbers<[1], [0], [0], [1], [0, 0, 1, 1], [], []>} : vector<64x128xbf16>, vector<128x128xbf16>, vector<64x128xf32> -> vector<64x128xf32>
    %176 = arith.addf %169, %175 : vector<64x128xf32>
    %c0_140 = arith.constant 0 : index
    %c2_141 = arith.constant 2 : index
    %c0_142 = arith.constant 0 : index
    %177 = vector.load %arg16[%c0_140, %c2_141, %c0_142] : memref<10x10x128xf32, #tpu.memory_space<vmem>>, vector<8x8x128xf32>
    %178 = vector.shape_cast %177 : vector<8x8x128xf32> to vector<64x128xf32>
    %179 = arith.truncf %178 : vector<64x128xf32> to vector<64x128xbf16>
    %c2_143 = arith.constant 2 : index
    %c0_144 = arith.constant 0 : index
    %c0_145 = arith.constant 0 : index
    %180 = vector.load %arg10[%c2_143, %c0_144, %c0_145] : memref<9x128x128xbf16, #tpu.memory_space<vmem>>, vector<1x128x128xbf16>
    %181 = vector.shape_cast %180 : vector<1x128x128xbf16> to vector<128x128xbf16>
    %cst_146 = arith.constant dense<0.000000e+00> : vector<64x128xf32>
    %182 = tpu.matmul %179, %181, %cst_146 {dimension_numbers = #tpu.dot_dimension_numbers<[1], [0], [0], [1], [0, 0, 1, 1], [], []>} : vector<64x128xbf16>, vector<128x128xbf16>, vector<64x128xf32> -> vector<64x128xf32>
    %183 = arith.addf %176, %182 : vector<64x128xf32>
    %c1_147 = arith.constant 1 : index
    %c0_148 = arith.constant 0 : index
    %c0_149 = arith.constant 0 : index
    %184 = vector.load %arg16[%c1_147, %c0_148, %c0_149] : memref<10x10x128xf32, #tpu.memory_space<vmem>>, vector<8x8x128xf32>
    %185 = vector.shape_cast %184 : vector<8x8x128xf32> to vector<64x128xf32>
    %186 = arith.truncf %185 : vector<64x128xf32> to vector<64x128xbf16>
    %c3_150 = arith.constant 3 : index
    %c0_151 = arith.constant 0 : index
    %c0_152 = arith.constant 0 : index
    %187 = vector.load %arg10[%c3_150, %c0_151, %c0_152] : memref<9x128x128xbf16, #tpu.memory_space<vmem>>, vector<1x128x128xbf16>
    %188 = vector.shape_cast %187 : vector<1x128x128xbf16> to vector<128x128xbf16>
    %cst_153 = arith.constant dense<0.000000e+00> : vector<64x128xf32>
    %189 = tpu.matmul %186, %188, %cst_153 {dimension_numbers = #tpu.dot_dimension_numbers<[1], [0], [0], [1], [0, 0, 1, 1], [], []>} : vector<64x128xbf16>, vector<128x128xbf16>, vector<64x128xf32> -> vector<64x128xf32>
    %190 = arith.addf %183, %189 : vector<64x128xf32>
    %c1_154 = arith.constant 1 : index
    %c1_155 = arith.constant 1 : index
    %c0_156 = arith.constant 0 : index
    %191 = vector.load %arg16[%c1_154, %c1_155, %c0_156] : memref<10x10x128xf32, #tpu.memory_space<vmem>>, vector<8x8x128xf32>
    %192 = vector.shape_cast %191 : vector<8x8x128xf32> to vector<64x128xf32>
    %193 = arith.truncf %192 : vector<64x128xf32> to vector<64x128xbf16>
    %c4_157 = arith.constant 4 : index
    %c0_158 = arith.constant 0 : index
    %c0_159 = arith.constant 0 : index
    %194 = vector.load %arg10[%c4_157, %c0_158, %c0_159] : memref<9x128x128xbf16, #tpu.memory_space<vmem>>, vector<1x128x128xbf16>
    %195 = vector.shape_cast %194 : vector<1x128x128xbf16> to vector<128x128xbf16>
    %cst_160 = arith.constant dense<0.000000e+00> : vector<64x128xf32>
    %196 = tpu.matmul %193, %195, %cst_160 {dimension_numbers = #tpu.dot_dimension_numbers<[1], [0], [0], [1], [0, 0, 1, 1], [], []>} : vector<64x128xbf16>, vector<128x128xbf16>, vector<64x128xf32> -> vector<64x128xf32>
    %197 = arith.addf %190, %196 : vector<64x128xf32>
    %c1_161 = arith.constant 1 : index
    %c2_162 = arith.constant 2 : index
    %c0_163 = arith.constant 0 : index
    %198 = vector.load %arg16[%c1_161, %c2_162, %c0_163] : memref<10x10x128xf32, #tpu.memory_space<vmem>>, vector<8x8x128xf32>
    %199 = vector.shape_cast %198 : vector<8x8x128xf32> to vector<64x128xf32>
    %200 = arith.truncf %199 : vector<64x128xf32> to vector<64x128xbf16>
    %c5_164 = arith.constant 5 : index
    %c0_165 = arith.constant 0 : index
    %c0_166 = arith.constant 0 : index
    %201 = vector.load %arg10[%c5_164, %c0_165, %c0_166] : memref<9x128x128xbf16, #tpu.memory_space<vmem>>, vector<1x128x128xbf16>
    %202 = vector.shape_cast %201 : vector<1x128x128xbf16> to vector<128x128xbf16>
    %cst_167 = arith.constant dense<0.000000e+00> : vector<64x128xf32>
    %203 = tpu.matmul %200, %202, %cst_167 {dimension_numbers = #tpu.dot_dimension_numbers<[1], [0], [0], [1], [0, 0, 1, 1], [], []>} : vector<64x128xbf16>, vector<128x128xbf16>, vector<64x128xf32> -> vector<64x128xf32>
    %204 = arith.addf %197, %203 : vector<64x128xf32>
    %c2_168 = arith.constant 2 : index
    %c0_169 = arith.constant 0 : index
    %c0_170 = arith.constant 0 : index
    %205 = vector.load %arg16[%c2_168, %c0_169, %c0_170] : memref<10x10x128xf32, #tpu.memory_space<vmem>>, vector<8x8x128xf32>
    %206 = vector.shape_cast %205 : vector<8x8x128xf32> to vector<64x128xf32>
    %207 = arith.truncf %206 : vector<64x128xf32> to vector<64x128xbf16>
    %c6_171 = arith.constant 6 : index
    %c0_172 = arith.constant 0 : index
    %c0_173 = arith.constant 0 : index
    %208 = vector.load %arg10[%c6_171, %c0_172, %c0_173] : memref<9x128x128xbf16, #tpu.memory_space<vmem>>, vector<1x128x128xbf16>
    %209 = vector.shape_cast %208 : vector<1x128x128xbf16> to vector<128x128xbf16>
    %cst_174 = arith.constant dense<0.000000e+00> : vector<64x128xf32>
    %210 = tpu.matmul %207, %209, %cst_174 {dimension_numbers = #tpu.dot_dimension_numbers<[1], [0], [0], [1], [0, 0, 1, 1], [], []>} : vector<64x128xbf16>, vector<128x128xbf16>, vector<64x128xf32> -> vector<64x128xf32>
    %211 = arith.addf %204, %210 : vector<64x128xf32>
    %c2_175 = arith.constant 2 : index
    %c1_176 = arith.constant 1 : index
    %c0_177 = arith.constant 0 : index
    %212 = vector.load %arg16[%c2_175, %c1_176, %c0_177] : memref<10x10x128xf32, #tpu.memory_space<vmem>>, vector<8x8x128xf32>
    %213 = vector.shape_cast %212 : vector<8x8x128xf32> to vector<64x128xf32>
    %214 = arith.truncf %213 : vector<64x128xf32> to vector<64x128xbf16>
    %c7_178 = arith.constant 7 : index
    %c0_179 = arith.constant 0 : index
    %c0_180 = arith.constant 0 : index
    %215 = vector.load %arg10[%c7_178, %c0_179, %c0_180] : memref<9x128x128xbf16, #tpu.memory_space<vmem>>, vector<1x128x128xbf16>
    %216 = vector.shape_cast %215 : vector<1x128x128xbf16> to vector<128x128xbf16>
    %cst_181 = arith.constant dense<0.000000e+00> : vector<64x128xf32>
    %217 = tpu.matmul %214, %216, %cst_181 {dimension_numbers = #tpu.dot_dimension_numbers<[1], [0], [0], [1], [0, 0, 1, 1], [], []>} : vector<64x128xbf16>, vector<128x128xbf16>, vector<64x128xf32> -> vector<64x128xf32>
    %218 = arith.addf %211, %217 : vector<64x128xf32>
    %c2_182 = arith.constant 2 : index
    %c2_183 = arith.constant 2 : index
    %c0_184 = arith.constant 0 : index
    %219 = vector.load %arg16[%c2_182, %c2_183, %c0_184] : memref<10x10x128xf32, #tpu.memory_space<vmem>>, vector<8x8x128xf32>
    %220 = vector.shape_cast %219 : vector<8x8x128xf32> to vector<64x128xf32>
    %221 = arith.truncf %220 : vector<64x128xf32> to vector<64x128xbf16>
    %c8_185 = arith.constant 8 : index
    %c0_186 = arith.constant 0 : index
    %c0_187 = arith.constant 0 : index
    %222 = vector.load %arg10[%c8_185, %c0_186, %c0_187] : memref<9x128x128xbf16, #tpu.memory_space<vmem>>, vector<1x128x128xbf16>
    %223 = vector.shape_cast %222 : vector<1x128x128xbf16> to vector<128x128xbf16>
    %cst_188 = arith.constant dense<0.000000e+00> : vector<64x128xf32>
    %224 = tpu.matmul %221, %223, %cst_188 {dimension_numbers = #tpu.dot_dimension_numbers<[1], [0], [0], [1], [0, 0, 1, 1], [], []>} : vector<64x128xbf16>, vector<128x128xbf16>, vector<64x128xf32> -> vector<64x128xf32>
    %225 = arith.addf %218, %224 : vector<64x128xf32>
    %c0_189 = arith.constant 0 : index
    %c0_190 = arith.constant 0 : index
    %226 = vector.load %arg11[%c0_189, %c0_190] : memref<1x128xf32, #tpu.memory_space<vmem>>, vector<1x128xf32>
    %227 = vector.broadcast %226 : vector<1x128xf32> to vector<64x128xf32>
    %228 = arith.addf %225, %227 : vector<64x128xf32>
    %cst_191 = arith.constant 0.000000e+00 : f32
    %229 = vector.broadcast %cst_191 : f32 to vector<64x128xf32>
    %230 = arith.maximumf %228, %229 : vector<64x128xf32>
    %c0_192 = arith.constant 0 : index
    %c0_193 = arith.constant 0 : index
    %231 = vector.load %arg12[%c0_192, %c0_193] : memref<1x128xf32, #tpu.memory_space<vmem>>, vector<1x128xf32>
    %c0_194 = arith.constant 0 : index
    %c0_195 = arith.constant 0 : index
    %232 = vector.load %arg13[%c0_194, %c0_195] : memref<1x128xf32, #tpu.memory_space<vmem>>, vector<1x128xf32>
    %cst_196 = arith.constant dense<0.000000e+00> : vector<128xf32>
    %233 = vector.multi_reduction <add>, %230, %cst_196 [0] : vector<64x128xf32> to vector<128xf32>
    %234 = vector.shape_cast %233 : vector<128xf32> to vector<1x128xf32>
    %235 = arith.mulf %230, %230 : vector<64x128xf32>
    %cst_197 = arith.constant dense<0.000000e+00> : vector<128xf32>
    %236 = vector.multi_reduction <add>, %235, %cst_197 [0] : vector<64x128xf32> to vector<128xf32>
    %237 = vector.shape_cast %236 : vector<128xf32> to vector<1x128xf32>
    %cst_198 = arith.constant dense<0.000000e+00> : vector<1x128xf32>
    %238 = tpu.matmul %234, %0, %cst_198 {dimension_numbers = #tpu.dot_dimension_numbers<[1], [0], [0], [1], [0, 0, 1, 1], [], []>} : vector<1x128xf32>, vector<128x128xf32>, vector<1x128xf32> -> vector<1x128xf32>
    %cst_199 = arith.constant dense<0.000000e+00> : vector<1x128xf32>
    %239 = tpu.matmul %237, %0, %cst_199 {dimension_numbers = #tpu.dot_dimension_numbers<[1], [0], [0], [1], [0, 0, 1, 1], [], []>} : vector<1x128xf32>, vector<128x128xf32>, vector<1x128xf32> -> vector<1x128xf32>
    %240 = arith.mulf %238, %238 : vector<1x128xf32>
    %241 = arith.subf %239, %240 : vector<1x128xf32>
    %cst_200 = arith.constant 0.000000e+00 : f32
    %242 = vector.broadcast %cst_200 : f32 to vector<1x128xf32>
    %243 = arith.maximumf %241, %242 : vector<1x128xf32>
    %cst_201 = arith.constant 9.99999974E-6 : f32
    %244 = vector.broadcast %cst_201 : f32 to vector<1x128xf32>
    %245 = arith.addf %243, %244 : vector<1x128xf32>
    %246 = math.rsqrt %245 : vector<1x128xf32>
    %247 = vector.broadcast %238 : vector<1x128xf32> to vector<64x128xf32>
    %248 = arith.subf %230, %247 : vector<64x128xf32>
    %249 = vector.broadcast %246 : vector<1x128xf32> to vector<64x128xf32>
    %250 = arith.mulf %248, %249 : vector<64x128xf32>
    %251 = vector.broadcast %231 : vector<1x128xf32> to vector<64x128xf32>
    %252 = arith.mulf %250, %251 : vector<64x128xf32>
    %253 = vector.broadcast %232 : vector<1x128xf32> to vector<64x128xf32>
    %254 = arith.addf %252, %253 : vector<64x128xf32>
    %cst_202 = arith.constant dense<0.000000e+00> : vector<128xf32>
    %255 = vector.multi_reduction <add>, %254, %cst_202 [0] : vector<64x128xf32> to vector<128xf32>
    %256 = vector.shape_cast %255 : vector<128xf32> to vector<1x128xf32>
    %cst_203 = arith.constant 6.400000e+01 : f32
    %257 = vector.broadcast %cst_203 : f32 to vector<1x128xf32>
    %258 = arith.divf %256, %257 : vector<1x128xf32>
    %c0_204 = arith.constant 0 : index
    %c0_205 = arith.constant 0 : index
    %c0_206 = arith.constant 0 : index
    %259 = vector.load %arg15[%c0_204, %c0_205, %c0_206] : memref<1x1x128xf32, #tpu.memory_space<vmem>>, vector<1x1x128xf32>
    %260 = vector.shape_cast %259 : vector<1x1x128xf32> to vector<1x128xf32>
    %261 = vector.shape_cast %258 : vector<1x128xf32> to vector<1x1x128xf32>
    tpu.vector_store %arg15[%c0_204, %c0_205, %c0_206], %261 {strides = array<i32>} : memref<1x1x128xf32, #tpu.memory_space<vmem>>, vector<1x1x128xf32>,
    return
  }
  func.func @transform_0(%arg0: i32) -> (i32, i32, i32, i32) {
    %c0_i32 = arith.constant 0 : i32
    %c0_i32_0 = arith.constant 0 : i32
    %c0_i32_1 = arith.constant 0 : i32
    %c0_i32_2 = arith.constant 0 : i32
    return %arg0, %c0_i32, %c0_i32_0, %c0_i32_1 : i32, i32, i32, i32
  }
  func.func @transform_1(%arg0: i32) -> (i32, i32, i32) {
    %c0_i32 = arith.constant 0 : i32
    %c0_i32_0 = arith.constant 0 : i32
    %c0_i32_1 = arith.constant 0 : i32
    %c0_i32_2 = arith.constant 0 : i32
    return %c0_i32, %c0_i32_0, %c0_i32_1 : i32, i32, i32
  }
  func.func @transform_2(%arg0: i32) -> (i32, i32) {
    %c0_i32 = arith.constant 0 : i32
    %c0_i32_0 = arith.constant 0 : i32
    %c0_i32_1 = arith.constant 0 : i32
    return %c0_i32, %c0_i32_0 : i32, i32
  }
  func.func @transform_3(%arg0: i32) -> (i32, i32) {
    %c0_i32 = arith.constant 0 : i32
    %c0_i32_0 = arith.constant 0 : i32
    %c0_i32_1 = arith.constant 0 : i32
    return %c0_i32, %c0_i32_0 : i32, i32
  }
  func.func @transform_4(%arg0: i32) -> (i32, i32) {
    %c0_i32 = arith.constant 0 : i32
    %c0_i32_0 = arith.constant 0 : i32
    %c0_i32_1 = arith.constant 0 : i32
    return %c0_i32, %c0_i32_0 : i32, i32
  }
  func.func @transform_5(%arg0: i32) -> (i32, i32, i32) {
    %c0_i32 = arith.constant 0 : i32
    %c0_i32_0 = arith.constant 0 : i32
    %c0_i32_1 = arith.constant 0 : i32
    %c0_i32_2 = arith.constant 0 : i32
    return %c0_i32, %c0_i32_0, %c0_i32_1 : i32, i32, i32
  }
  func.func @transform_6(%arg0: i32) -> (i32, i32) {
    %c0_i32 = arith.constant 0 : i32
    %c0_i32_0 = arith.constant 0 : i32
    %c0_i32_1 = arith.constant 0 : i32
    return %c0_i32, %c0_i32_0 : i32, i32
  }
  func.func @transform_7(%arg0: i32) -> (i32, i32) {
    %c0_i32 = arith.constant 0 : i32
    %c0_i32_0 = arith.constant 0 : i32
    %c0_i32_1 = arith.constant 0 : i32
    return %c0_i32, %c0_i32_0 : i32, i32
  }
  func.func @transform_8(%arg0: i32) -> (i32, i32) {
    %c0_i32 = arith.constant 0 : i32
    %c0_i32_0 = arith.constant 0 : i32
    %c0_i32_1 = arith.constant 0 : i32
    return %c0_i32, %c0_i32_0 : i32, i32
  }
  func.func @transform_9(%arg0: i32) -> (i32, i32, i32) {
    %c0_i32 = arith.constant 0 : i32
    %c0_i32_0 = arith.constant 0 : i32
    %c0_i32_1 = arith.constant 0 : i32
    %c0_i32_2 = arith.constant 0 : i32
    return %c0_i32, %c0_i32_0, %c0_i32_1 : i32, i32, i32
  }
  func.func @transform_10(%arg0: i32) -> (i32, i32) {
    %c0_i32 = arith.constant 0 : i32
    %c0_i32_0 = arith.constant 0 : i32
    %c0_i32_1 = arith.constant 0 : i32
    return %c0_i32, %c0_i32_0 : i32, i32
  }
  func.func @transform_11(%arg0: i32) -> (i32, i32) {
    %c0_i32 = arith.constant 0 : i32
    %c0_i32_0 = arith.constant 0 : i32
    %c0_i32_1 = arith.constant 0 : i32
    return %c0_i32, %c0_i32_0 : i32, i32
  }
  func.func @transform_12(%arg0: i32) -> (i32, i32) {
    %c0_i32 = arith.constant 0 : i32
    %c0_i32_0 = arith.constant 0 : i32
    %c0_i32_1 = arith.constant 0 : i32
    return %c0_i32, %c0_i32_0 : i32, i32
  }
  func.func @transform_13(%arg0: i32) -> (i32, i32) {
    %c0_i32 = arith.constant 0 : i32
    %c0_i32_0 = arith.constant 0 : i32
    %c0_i32_1 = arith.constant 0 : i32
    return %c0_i32, %c0_i32_0 : i32, i32
  }
  func.func @transform_14(%arg0: i32) -> (i32, i32, i32) {
    %c0_i32 = arith.constant 0 : i32
    %c0_i32_0 = arith.constant 0 : i32
    %c0_i32_1 = arith.constant 0 : i32
    return %arg0, %c0_i32, %c0_i32_0 : i32, i32, i32
  }
}

</mosaic_0001>

<bundles_post_ra>
// kernel: mnist_cnn_forward.2
= control target key start
LH: loop header
LB: loop body
LE: loop exit
PB: predicated region body
PF: predicated region fallthrough
CT: control target
= control target key end

     0   :  { %s4784_s21 = smov 0   ;;  %s6065_s0 = inlined_call_operand.vmem [shape: f32[2,18,18,3], index: 0, kind: input, shape index: {}]   ;;  %s6066_s1 = inlined_call_operand.vmem [shape: bf16[9,3,64], index: 1, kind: input, shape index: {}]   ;;  %s6067_s2 = inlined_call_operand.vmem [shape: f32[1,64], index: 2, kind: input, shape index: {}]   ;;  %s6068_s3 = inlined_call_operand.vmem [shape: f32[64,64], index: 3, kind: input, shape index: {}]   ;;  %s6069_s4 = inlined_call_operand.vmem [shape: f32[1,64], index: 4, kind: input, shape index: {}]   ;;  %s6070_s5 = inlined_call_operand.vmem [shape: f32[1,64], index: 5, kind: input, shape index: {}]   ;;  %s6071_s6 = inlined_call_operand.vmem [shape: f32[2,18,18,64], index: 6, kind: output, shape index: {}]  }
   0x1 LB: > { %s3535_s22 = sadd.s32 4294967295, %s4743_s21   ;;  %p3539_p0 = scmp.ge.s32.totalorder %s4743_s21, 1  ;;  %s4743_s21 = sphi %s4784_s21, %s16_s21  }
   0x2   : > { %p212_p1 = scmp.lt.s32.totalorder %s4743_s21, 3 }
   0x4   : > { %p213_p2 = pnand %p3539_p0, %p212_p1 }
   0x5   : > { %vm401_vm0 = vcmask (!%p213_p2), 1040384   ;;  %vm402_vm1 = vcmask (!%p213_p2), 1041408   ;;  %v3673_v0 = vld [vmem:[%s6066_s1 + $0x8] sm:$0x3] (!%p213_p2)  ;;  %p242_p3 = scmp.lt.s32.totalorder (!%p213_p2), %s3535_s22, 1  ;;  %v4745_v1 = vmov (!%p213_p2), 65535  }
   0x6   : > { %216 = sbr.rel (%p213_p2) target bundleno = 841 (0x349), region = 44  ;;  %v403_v2 = vsel (!%p213_p2), %vm401_vm0, 4294967295, %v4745_v1  ;;  %v3542_v3 = vld [vmem:[%s6066_s1 + $0x2] sm:$0x3] (!%p213_p2)  ;;  %v3722_v4 = vld [vmem:[%s6066_s1 + $0xa] sm:$0x3] (!%p213_p2) }
   0x7   : > { %v4801_v5 = vsel (!%p213_p2), %vm402_vm1, %v403_v2, 0  ;;  %v301_v6 = vld [vmem:[%s6066_s1] sm:$0x3] (!%p213_p2)  ;;  %v3771_v11 = vld [vmem:[%s6066_s1 + $0xc] sm:$0x3] (!%p213_p2)  ;;  %vm352_vm2 = vcmask (!%p213_p2), 23552  }
   0x8   : > { %v4809_v7 = vand.u32 (!%p213_p2), %v3673_v0, %v4801_v5  ;;  %v406_v8 = vand.u32 (!%p213_p2), %v3542_v3, %v4801_v5  ;;  %v1763_v9 = vand.u32 (!%p213_p2), %v3722_v4, %v4801_v5  ;;  %v618_v10 = vand.u32 (!%p213_p2), %v4801_v5, %v301_v6  ;;  %v3575_v12 = vld [vmem:[%s6066_s1 + $0x4] sm:$0x3] (!%p213_p2)  ;;  %v3820_v2 = vld [vmem:[%s6066_s1 + $0xe] sm:$0x3] (!%p213_p2) }
   0x9   : > { %v4844_v25 = vand.u32 (!%p213_p2), %v3771_v11, %v4801_v5  ;;  %v4849_v26 = vand.u32 (!%p213_p2), %v3575_v12, %v4801_v5  ;;  %vm4747_vm3 = vmmov (!%p213_p2), 0   ;;  %vm2922_vm4 = vcmask (!%p213_p2), 523264  }
   0xa   : > { %4232 = vmatprep.subr.bf16.mxu0 (!%p213_p2), %v4809_v7  ;;  %4096 = vmatprep.subr.bf16.mxu1 (!%p213_p2), %v406_v8  ;;  %vm3394_vm5 = vcmask (!%p213_p2), 517120  }
   0xb   : > { %4233 = vmatpush3.bf16.msra.mxu0 (!%p213_p2), %v4809_v7  ;;  %4097 = vmatpush3.bf16.msra.mxu1 (!%p213_p2), %v406_v8  ;;  %v4959_v8 = vand.u32 (!%p213_p2), %v3820_v2, %v4801_v5 }
   0xc   : > { %4266 = vmatprep.subr.bf16.mxu0 (!%p213_p2), %v1763_v9  ;;  %4130 = vmatprep.subr.bf16.mxu1 (!%p213_p2), %v618_v10 }
   0xd   : > { %s6073_s22 = smov (!%p242_p3, %s3535_s22), 1 }
   0xe   : > { %s4722_s7 = smul.u32 432, %s6073_s22 }
  0x10   : > { %s4822_s10 = scalar_lea.vmem %s6065_s0, %s4722_s7  ;;  %s5728_s20 = scalar_lea.vmem %s6071_s6, %s4722_s7 }
  0x11   : > { %v302_v13 = vld [vmem:[%s4822_s10 + $0x1] sm:$0xff]  ;;  %v303_v14 = vld [vmem:[%s4822_s10 + $0x9] sm:$0xff]  ;;  %v3641_v15 = vld [vmem:[%s4822_s10 + $0x19] sm:$0xff] }
  0x12   : > { %v334_v16 = vpack.c.bf16 %v303_v14, %v302_v13  ;;  %v3642_v17 = vld [vmem:[%s4822_s10 + $0x21] sm:$0xff]  ;;  %v3643_v18 = vld [vmem:[%s4822_s10 + $0x31] sm:$0xff]  ;;  %v3644_v19 = vld [vmem:[%s4822_s10 + $0x39] sm:$0xff] }
  0x13   : > { %v1402_v20 = vpack.c.bf16 %v3642_v17, %v3641_v15  ;;  %v4836_v21 = vpack.c.bf16 %v3644_v19, %v3643_v18  ;;  %v3645_v22 = vld [vmem:[%s4822_s10 + $0x49] sm:$0xff]  ;;  %v3646_v23 = vld [vmem:[%s4822_s10 + $0x51] sm:$0xff]  ;;  %v3647_v27 = vld [vmem:[%s4822_s10 + $0x61] sm:$0xff] }
  0x14   : > { %4098 = vmatprep.mubr.msk.bf16.mxu1 %vm352_vm2, %v334_v16  ;;  %v4841_v24 = vpack.c.bf16 %v3646_v23, %v3645_v22  ;;  %v3648_v28 = vld [vmem:[%s4822_s10 + $0x69] sm:$0xff]  ;;  %v3649_v29 = vld [vmem:[%s4822_s10 + $0x79] sm:$0xff]  ;;  %v3650_v30 = vld [vmem:[%s4822_s10 + $0x81] sm:$0xff] }
  0x15   : > { %4234 = vmatprep.mubr.msk.bf16.mxu0 %vm352_vm2, %v1402_v20  ;;  %4099 = vmatmul.mubr.msk.bf16.vlgmr.msra.gmra.mrb[0].mxu1 %vm352_vm2, %v1402_v20  ;;  %v4863_v31 = vpack.c.bf16 %v3648_v28, %v3647_v27  ;;  %v4865_v32 = vpack.c.bf16 %v3650_v30, %v3649_v29  ;;  %v3651_v33 = vld [vmem:[%s4822_s10 + $0x91] sm:$0xff]  ;;  %v3652_v34 = vld [vmem:[%s4822_s10 + $0x99] sm:$0xff]  ;;  %v3653_v35 = vld [vmem:[%s4822_s10 + $0xa9] sm:$0xff] }
  0x16   : > { %4235 = vmatmul.mubr.msk.bf16.vlgmr.msra.gmra.mrb[0].mxu0 %vm352_vm2, %v4836_v21  ;;  %4102 = vmatprep.mubr.msk.bf16.mxu1 %vm352_vm2, %v4836_v21  ;;  %v3654_v36 = vld [vmem:[%s4822_s10 + $0xb1] sm:$0xff]  ;;  %v4879_v37 = vpack.c.bf16 %v3652_v34, %v3651_v33  ;;  %v3655_v39 = vld [vmem:[%s4822_s10 + $0xc1] sm:$0xff]  ;;  %v3656_v40 = vld [vmem:[%s4822_s10 + $0xc9] sm:$0xff] }
  0x17   : > { %4267 = vmatpush3.bf16.msra.mxu0 %v1763_v9  ;;  %4238 = vmatprep.mubr.msk.bf16.mxu0 %vm352_vm2, %v4841_v24  ;;  %v4881_v38 = vpack.c.bf16 %v3654_v36, %v3653_v35  ;;  %v3657_v41 = vld [vmem:[%s4822_s10 + $0xd9] sm:$0xff]  ;;  %v3658_v42 = vld [vmem:[%s4822_s10 + $0xe1] sm:$0xff]  ;;  %v4895_v43 = vpack.c.bf16 %v3656_v40, %v3655_v39  ;;  %v3659_v45 = vld [vmem:[%s4822_s10 + $0xf1] sm:$0xff] }
  0x18   : > { %4131 = vmatpush3.bf16.msra.mxu1 %v618_v10  ;;  %4300 = vmatprep.subr.bf16.mxu0 %v4844_v25  ;;  %v4897_v44 = vpack.c.bf16 %v3658_v42, %v3657_v41  ;;  %v3660_v46 = vld [vmem:[%s4822_s10 + $0xf9] sm:$0xff]  ;;  %v3661_v47 = vld [vmem:[%s4822_s10 + $0x109] sm:$0xff]  ;;  %v3662_v48 = vld [vmem:[%s4822_s10 + $0x111] sm:$0xff] }
  0x19   : > { %4164 = vmatprep.subr.bf16.mxu1 %v4849_v26  ;;  %v4911_v49 = vpack.c.bf16 %v3660_v46, %v3659_v45  ;;  %v4913_v50 = vpack.c.bf16 %v3662_v48, %v3661_v47  ;;  %v3663_v51 = vld [vmem:[%s4822_s10 + $0x121] sm:$0xff]  ;;  %v3664_v52 = vld [vmem:[%s4822_s10 + $0x129] sm:$0xff]  ;;  %v328_v57 = vld [vmem:[%s4822_s10 + $0x139] sm:$0xff] }
  0x1a   : > { %v3690_v53 = vld [vmem:[%s4822_s10 + $0x1a] sm:$0xff]  ;;  %v3691_v54 = vld [vmem:[%s4822_s10 + $0x22] sm:$0xff]  ;;  %v4927_v55 = vpack.c.bf16 %v3664_v52, %v3663_v51  ;;  %v3692_v59 = vld [vmem:[%s4822_s10 + $0x32] sm:$0xff] }
  0x1b   : > { %v4929_v56 = vpack.c.bf16 %v3691_v54, %v3690_v53  ;;  %v329_v58 = vld [vmem:[%s4822_s10 + $0x141] sm:$0xff]  ;;  %v330_v61 = vld [vmem:[%s4822_s10 + $0x151] sm:$0xff]  ;;  %v331_v62 = vld [vmem:[%s4822_s10 + $0x159] sm:$0xff] }
  0x1c   : > { %v3693_v60 = vld [vmem:[%s4822_s10 + $0x3a] sm:$0xff]  ;;  %v3694_v63 = vld [vmem:[%s4822_s10 + $0x4a] sm:$0xff]  ;;  %v3695_v0 = vld [vmem:[%s4822_s10 + $0x52] sm:$0xff]  ;;  %v4947_v1 = vpack.c.bf16 %v329_v58, %v328_v57  ;;  %v4954_v4 = vpack.c.bf16 %v331_v62, %v330_v61 }
  0x1d   : > { %4103 = vmatmul.mubr.msk.bf16.gmra.mrb[4].mxu1 %vm352_vm2, %v4841_v24  ;;  %v4952_v3 = vpack.c.bf16 %v3693_v60, %v3692_v59  ;;  %v4956_v6 = vpack.c.bf16 %v3695_v0, %v3694_v63  ;;  %v332_v9 = vld [vmem:[%s4822_s10 + $0x169] sm:$0xff]  ;;  %v333_v10 = vld [vmem:[%s4822_s10 + $0x171] sm:$0xff]  ;;  %v253_v13 = vld [vmem:[%s4822_s10] sm:$0xff] }
  0x1e   : > { %4239 = vmatmul.mubr.msk.bf16.gmra.mrb[4].mxu0 %vm352_vm2, %v4863_v31  ;;  %4106 = vmatprep.mubr.msk.bf16.mxu1 %vm352_vm2, %v4863_v31  ;;  %v3696_v11 = vld [vmem:[%s4822_s10 + $0x62] sm:$0xff]  ;;  %v3697_v12 = vld [vmem:[%s4822_s10 + $0x6a] sm:$0xff]  ;;  %v3698_v15 = vld [vmem:[%s4822_s10 + $0x7a] sm:$0xff]  ;;  %v4979_v17 = vpack.c.bf16 %v333_v10, %v332_v9 }
  0x1f   : > { %4242 = vmatprep.mubr.msk.bf16.mxu0 %vm352_vm2, %v4865_v32  ;;  %v254_v14 = vld [vmem:[%s4822_s10 + $0x8] sm:$0xff]  ;;  %v4981_v18 = vpack.c.bf16 %v3697_v12, %v3696_v11  ;;  %v255_v22 = vld [vmem:[%s4822_s10 + $0x18] sm:$0xff]  ;;  %v256_v23 = vld [vmem:[%s4822_s10 + $0x20] sm:$0xff] }
  0x20   : > { %v3699_v16 = vld [vmem:[%s4822_s10 + $0x82] sm:$0xff]  ;;  %v285_v19 = vpack.c.bf16 %v254_v14, %v253_v13  ;;  %v3701_v27 = vld [vmem:[%s4822_s10 + $0x9a] sm:$0xff]  ;;  %v257_v28 = vld [vmem:[%s4822_s10 + $0x30] sm:$0xff]  ;;  %v5000_v34 = vpack.c.bf16 %v256_v23, %v255_v22 }
  0x21   : > { %v4983_v20 = vpack.c.bf16 %v3699_v16, %v3698_v15  ;;  %v258_v29 = vld [vmem:[%s4822_s10 + $0x38] sm:$0xff]  ;;  %v3702_v30 = vld [vmem:[%s4822_s10 + $0xaa] sm:$0xff]  ;;  %v3624_v35 = vld [vmem:[%s6066_s1 + $0x6] sm:$0x3] }
  0x22   : > { %v3703_v33 = vld [vmem:[%s4822_s10 + $0xb2] sm:$0xff]  ;;  %v5007_v39 = vpack.c.bf16 %v258_v29, %v257_v28  ;;  %v5012_v41 = vand.u32 %v3624_v35, %v4801_v5  ;;  %v259_v42 = vld [vmem:[%s4822_s10 + $0x48] sm:$0xff]  ;;  %v261_v48 = vld [vmem:[%s4822_s10 + $0x60] sm:$0xff] }
  0x23   : > { %v5009_v40 = vpack.c.bf16 %v3703_v33, %v3702_v30  ;;  %v260_v45 = vld [vmem:[%s4822_s10 + $0x50] sm:$0xff]  ;;  %v3704_v46 = vld [vmem:[%s4822_s10 + $0xc2] sm:$0xff]  ;;  %v3706_v52 = vld [vmem:[%s4822_s10 + $0xda] sm:$0xff] }
  0x24   : > { %v3705_v47 = vld [vmem:[%s4822_s10 + $0xca] sm:$0xff]  ;;  %v3707_v53 = vld [vmem:[%s4822_s10 + $0xe2] sm:$0xff]  ;;  %v5032_v54 = vpack.c.bf16 %v260_v45, %v259_v42  ;;  %v3708_v61 = vld [vmem:[%s4822_s10 + $0xf2] sm:$0xff] }
  0x25   : > { %4107 = vmatmul.mubr.msk.bf16.gmra.mrb[8].mxu1 %vm352_vm2, %v4865_v32  ;;  %v262_v51 = vld [vmem:[%s4822_s10 + $0x68] sm:$0xff]  ;;  %v5034_v57 = vpack.c.bf16 %v3705_v47, %v3704_v46  ;;  %v5038_v59 = vpack.c.bf16 %v3707_v53, %v3706_v52  ;;  %v264_v60 = vld [vmem:[%s4822_s10 + $0x80] sm:$0xff]  ;;  %v265_v63 = vld [vmem:[%s4822_s10 + $0x90] sm:$0xff] }
  0x26   : > { %4243 = vmatmul.mubr.msk.bf16.gmra.mrb[8].mxu0 %vm352_vm2, %v4879_v37  ;;  %4110 = vmatprep.mubr.msk.bf16.mxu1 %vm352_vm2, %v4879_v37  ;;  %v5036_v58 = vpack.c.bf16 %v262_v51, %v261_v48  ;;  %v3709_v62 = vld [vmem:[%s4822_s10 + $0xfa] sm:$0xff]  ;;  %v3710_v2 = vld [vmem:[%s4822_s10 + $0x10a] sm:$0xff]  ;;  %v3711_v9 = vld [vmem:[%s4822_s10 + $0x112] sm:$0xff] }
  0x27   : > { %4246 = vmatprep.mubr.msk.bf16.mxu0 %vm352_vm2, %v4881_v38  ;;  %v266_v0 = vld [vmem:[%s4822_s10 + $0x98] sm:$0xff]  ;;  %v5058_v11 = vpack.c.bf16 %v3709_v62, %v3708_v61  ;;  %v5062_v13 = vpack.c.bf16 %v3711_v9, %v3710_v2  ;;  %v267_v14 = vld [vmem:[%s4822_s10 + $0xa8] sm:$0xff]  ;;  %v268_v15 = vld [vmem:[%s4822_s10 + $0xb0] sm:$0xff] }
  0x28   : > { %v5060_v12 = vpack.c.bf16 %v266_v0, %v265_v63  ;;  %v3712_v16 = vld [vmem:[%s4822_s10 + $0x122] sm:$0xff]  ;;  %v5080_v28 = vpack.c.bf16 %v268_v15, %v267_v14  ;;  %v271_v35 = vld [vmem:[%s4822_s10 + $0xd8] sm:$0xff]  ;;  %v273_v47 = vld [vmem:[%s4822_s10 + $0xf0] sm:$0xff] }
  0x29   : > { %v269_v22 = vld [vmem:[%s4822_s10 + $0xc0] sm:$0xff]  ;;  %v270_v23 = vld [vmem:[%s4822_s10 + $0xc8] sm:$0xff]  ;;  %v3716_v45 = vld [vmem:[%s4822_s10 + $0x152] sm:$0xff] }
  0x2a   : > { %v5084_v30 = vpack.c.bf16 %v270_v23, %v269_v22  ;;  %v272_v42 = vld [vmem:[%s4822_s10 + $0xe0] sm:$0xff]  ;;  %v274_v48 = vld [vmem:[%s4822_s10 + $0xf8] sm:$0xff]  ;;  %v3718_v51 = vld [vmem:[%s4822_s10 + $0x16a] sm:$0xff] }
  0x2b   : > { %v3717_v46 = vld [vmem:[%s4822_s10 + $0x15a] sm:$0xff]  ;;  %v3719_v52 = vld [vmem:[%s4822_s10 + $0x172] sm:$0xff]  ;;  %v5104_v53 = vpack.c.bf16 %v272_v42, %v271_v35  ;;  %v275_v62 = vld [vmem:[%s4822_s10 + $0x108] sm:$0xff] }
  0x2c   : > { %v5110_v61 = vpack.c.bf16 %v3719_v52, %v3718_v51  ;;  %v276_v63 = vld [vmem:[%s4822_s10 + $0x110] sm:$0xff]  ;;  %v3720_v0 = vld [vmem:[%s4822_s10 + $0x182] sm:$0xff]  ;;  %v279_v22 = vld [vmem:[%s4822_s10 + $0x138] sm:$0xff] }
  0x2d   : > { %4111 = vmatmul.mubr.msk.bf16.gmra.mrb[12].mxu1 %vm352_vm2, %v4881_v38  ;;  %v3721_v2 = vld [vmem:[%s4822_s10 + $0x18a] sm:$0xff]  ;;  %v277_v9 = vld [vmem:[%s4822_s10 + $0x120] sm:$0xff]  ;;  %v5126_v15 = vpack.c.bf16 %v276_v63, %v275_v62  ;;  %v3769_v63 = vld [vmem:[%s4822_s10 + $0x198] sm:$0xff] }
  0x2e   : > { %4247 = vmatmul.mubr.msk.bf16.gmra.mrb[12].mxu0 %vm352_vm2, %v4895_v43  ;;  %4114 = vmatprep.mubr.msk.bf16.mxu1 %vm352_vm2, %v4895_v43  ;;  %v278_v14 = vld [vmem:[%s4822_s10 + $0x128] sm:$0xff]  ;;  %v280_v23 = vld [vmem:[%s4822_s10 + $0x140] sm:$0xff]  ;;  %v3869_v42 = vld [vmem:[%s6066_s1 + $0x10] sm:$0x3] }
  0x2f   : > { %4250 = vmatprep.mubr.msk.bf16.mxu0 %vm352_vm2, %v4897_v44  ;;  %v5144_v35 = vpack.c.bf16 %v280_v23, %v279_v22  ;;  %v781_v51 = vld [vmem:[%s4822_s10 + $0x2] sm:$0xff]  ;;  %v782_v52 = vld [vmem:[%s4822_s10 + $0xa] sm:$0xff] }
  0x30   : > { %v813_v62 = vpack.c.bf16 %v782_v52, %v781_v51 }
  0x35   : > { %4115 = vmatmul.mubr.msk.bf16.gmra.mrb[16].mxu1 %vm352_vm2, %v4897_v44 }
  0x36   : > { %4251 = vmatmul.mubr.msk.bf16.gmra.mrb[16].mxu0 %vm352_vm2, %v4911_v49  ;;  %4118 = vmatprep.mubr.msk.bf16.mxu1 %vm352_vm2, %v4911_v49 }
  0x37   : > { %4254 = vmatprep.mubr.msk.bf16.mxu0 %vm352_vm2, %v4913_v50 }
  0x3d   : > { %4119 = vmatmul.mubr.msk.bf16.gmra.mrb[20].mxu1 %vm352_vm2, %v4913_v50 }
  0x3e   : > { %4255 = vmatmul.mubr.msk.bf16.gmra.mrb[20].mxu0 %vm352_vm2, %v4927_v55  ;;  %4122 = vmatprep.mubr.msk.bf16.mxu1 %vm352_vm2, %v4927_v55 }
  0x3f   : > { %4268 = vmatprep.mubr.msk.bf16.mxu0 %vm352_vm2, %v4929_v56 }
  0x45   : > { %4123 = vmatmul.mubr.msk.bf16.gmra.mrb[24].mxu1 %vm352_vm2, %v4947_v1 }
  0x46   : > { %4269 = vmatmul.mubr.msk.bf16.vlgmr.msra.gmra.mrb[0].mxu0 %vm352_vm2, %v4952_v3  ;;  %4126 = vmatprep.mubr.msk.bf16.mxu1 %vm352_vm2, %v4954_v4 }
  0x47   : > { %4301 = vmatpush3.bf16.msra.mxu0 %v4844_v25  ;;  %4272 = vmatprep.mubr.msk.bf16.mxu0 %vm352_vm2, %v4956_v6  ;;  %v3700_v25 = vld [vmem:[%s4822_s10 + $0x92] sm:$0xff] }
  0x48   : > { %4334 = vmatprep.subr.bf16.mxu0 %v4959_v8  ;;  %v5005_v36 = vpack.c.bf16 %v3701_v27, %v3700_v25  ;;  %v3714_v25 = vld [vmem:[%s4822_s10 + $0x13a] sm:$0xff]  ;;  %v3715_v27 = vld [vmem:[%s4822_s10 + $0x142] sm:$0xff] }
  0x49   : > { %v5086_v33 = vpack.c.bf16 %v3715_v27, %v3714_v25  ;;  %v281_v25 = vld [vmem:[%s4822_s10 + $0x150] sm:$0xff]  ;;  %v282_v27 = vld [vmem:[%s4822_s10 + $0x158] sm:$0xff] }
  0x4d   : > { %4127 = vmatmul.mubr.msk.bf16.gmra.mrb[28].mxu1 %vm352_vm2, %v4979_v17 }
  0x4e   : > { %4273 = vmatmul.mubr.msk.bf16.gmra.mrb[4].mxu0 %vm352_vm2, %v4981_v18  ;;  %4132 = vmatprep.mubr.msk.bf16.mxu1 %vm352_vm2, %v285_v19  ;;  %v3713_v19 = vld [vmem:[%s4822_s10 + $0x12a] sm:$0xff] }
  0x4f   : > { %4276 = vmatprep.mubr.msk.bf16.mxu0 %vm352_vm2, %v4983_v20  ;;  %v5082_v29 = vpack.c.bf16 %v3713_v19, %v3712_v16  ;;  %v5128_v16 = vpack.c.bf16 %v3721_v2, %v3720_v0  ;;  %v5130_v19 = vpack.c.bf16 %v278_v14, %v277_v9  ;;  %v3770_v0 = vld [vmem:[%s4822_s10 + $0x1a0] sm:$0xff] }
  0x50   : > { %v2006_v2 = vpack.c.bf16 %v3770_v0, %v3769_v63 }
  0x55   : > { %4133 = vmatmul.mubr.msk.bf16.vlgmr.msra.gmra.mrb[0].mxu1 %vm352_vm2, %v5000_v34 }
  0x56   : > { %4277 = vmatmul.mubr.msk.bf16.gmra.mrb[8].mxu0 %vm352_vm2, %v5005_v36  ;;  %4136 = vmatprep.mubr.msk.bf16.mxu1 %vm352_vm2, %v5007_v39 }
  0x57   : > { %4280 = vmatprep.mubr.msk.bf16.mxu0 %vm352_vm2, %v5009_v40  ;;  %4165 = vmatpush3.bf16.msra.mxu1 %v4849_v26  ;;  %v263_v26 = vld [vmem:[%s4822_s10 + $0x78] sm:$0xff] }
  0x58   : > { %4198 = vmatprep.subr.bf16.mxu1 %v5012_v41  ;;  %v5056_v10 = vpack.c.bf16 %v264_v60, %v263_v26  ;;  %v5106_v26 = vpack.c.bf16 %v3717_v46, %v3716_v45  ;;  %v5108_v60 = vpack.c.bf16 %v274_v48, %v273_v47  ;;  %v5149_v45 = vpack.c.bf16 %v282_v27, %v281_v25  ;;  %v283_v47 = vld [vmem:[%s4822_s10 + $0x168] sm:$0xff]  ;;  %v284_v48 = vld [vmem:[%s4822_s10 + $0x170] sm:$0xff] }
  0x59   : > { %v2646_v46 = vand.u32 %v3869_v42, %v4801_v5  ;;  %v5165_v5 = vpack.c.bf16 %v284_v48, %v283_v47 }
  0x5d   : > { %4137 = vmatmul.mubr.msk.bf16.gmra.mrb[4].mxu1 %vm352_vm2, %v5032_v54 }
  0x5e   : > { %4281 = vmatmul.mubr.msk.bf16.gmra.mrb[12].mxu0 %vm352_vm2, %v5034_v57  ;;  %4140 = vmatprep.mubr.msk.bf16.mxu1 %vm352_vm2, %v5036_v58 }
  0x5f   : > { %4284 = vmatprep.mubr.msk.bf16.mxu0 %vm352_vm2, %v5038_v59 }
  0x65   : > { %4141 = vmatmul.mubr.msk.bf16.gmra.mrb[8].mxu1 %vm352_vm2, %v5056_v10 }
  0x66   : > { %4285 = vmatmul.mubr.msk.bf16.gmra.mrb[16].mxu0 %vm352_vm2, %v5058_v11  ;;  %4144 = vmatprep.mubr.msk.bf16.mxu1 %vm352_vm2, %v5060_v12 }
  0x67   : > { %4288 = vmatprep.mubr.msk.bf16.mxu0 %vm352_vm2, %v5062_v13 }
  0x6d   : > { %4145 = vmatmul.mubr.msk.bf16.gmra.mrb[12].mxu1 %vm352_vm2, %v5080_v28 }
  0x6e   : > { %4289 = vmatmul.mubr.msk.bf16.gmra.mrb[20].mxu0 %vm352_vm2, %v5082_v29  ;;  %4148 = vmatprep.mubr.msk.bf16.mxu1 %vm352_vm2, %v5084_v30 }
  0x6f   : > { %4292 = vmatprep.mubr.msk.bf16.mxu0 %vm352_vm2, %v5086_v33 }
  0x75   : > { %4149 = vmatmul.mubr.msk.bf16.gmra.mrb[16].mxu1 %vm352_vm2, %v5104_v53 }
  0x76   : > { %4293 = vmatmul.mubr.msk.bf16.gmra.mrb[24].mxu0 %vm352_vm2, %v5106_v26  ;;  %4152 = vmatprep.mubr.msk.bf16.mxu1 %vm352_vm2, %v5108_v60 }
  0x77   : > { %4296 = vmatprep.mubr.msk.bf16.mxu0 %vm352_vm2, %v5110_v61 }
  0x7d   : > { %4153 = vmatmul.mubr.msk.bf16.gmra.mrb[20].mxu1 %vm352_vm2, %v5126_v15 }
  0x7e   : > { %4297 = vmatmul.mubr.msk.bf16.gmra.mrb[28].mxu0 %vm352_vm2, %v5128_v16  ;;  %4156 = vmatprep.mubr.msk.bf16.mxu1 %vm352_vm2, %v5130_v19 }
  0x7f   : > { %4302 = vmatprep.mubr.msk.bf16.mxu0 %vm352_vm2, %v5007_v39 }
  0x85   : > { %4157 = vmatmul.mubr.msk.bf16.gmra.mrb[24].mxu1 %vm352_vm2, %v5144_v35 }
  0x86   : > { %4303 = vmatmul.mubr.msk.bf16.vlgmr.msra.gmra.mrb[0].mxu0 %vm352_vm2, %v5032_v54  ;;  %4160 = vmatprep.mubr.msk.bf16.mxu1 %vm352_vm2, %v5149_v45 }
  0x87   : > { %4335 = vmatpush3.bf16.msra.mxu0 %v4959_v8  ;;  %4306 = vmatprep.mubr.msk.bf16.mxu0 %vm352_vm2, %v5036_v58  ;;  %v3768_v8 = vld [vmem:[%s4822_s10 + $0x188] sm:$0xff] }
  0x88   : > { %4368 = vmatprep.subr.bf16.mxu0 %v2646_v46 }
  0x8d   : > { %4161 = vmatmul.mubr.msk.bf16.gmra.mrb[28].mxu1 %vm352_vm2, %v5165_v5 }
  0x8e   : > { %4307 = vmatmul.mubr.msk.bf16.gmra.mrb[4].mxu0 %vm352_vm2, %v5056_v10  ;;  %4166 = vmatprep.mubr.msk.bf16.mxu1 %vm352_vm2, %v813_v62 }
  0x8f   : > { %4310 = vmatprep.mubr.msk.bf16.mxu0 %vm352_vm2, %v5060_v12 }
  0x95   : > { %4167 = vmatmul.mubr.msk.bf16.vlgmr.msra.gmra.mrb[0].mxu1 %vm352_vm2, %v4929_v56  ;;  %v3767_v56 = vld [vmem:[%s4822_s10 + $0x180] sm:$0xff] }
  0x96   : > { %4311 = vmatmul.mubr.msk.bf16.gmra.mrb[8].mxu0 %vm352_vm2, %v5080_v28  ;;  %4170 = vmatprep.mubr.msk.bf16.mxu1 %vm352_vm2, %v4952_v3 }
  0x97   : > { %4314 = vmatprep.mubr.msk.bf16.mxu0 %vm352_vm2, %v5084_v30  ;;  %4199 = vmatpush3.bf16.msra.mxu1 %v5012_v41  ;;  %v2005_v41 = vpack.c.bf16 %v3768_v8, %v3767_v56 }
  0x98   : > { %4464 = vmatprep.subr.bf16.mxu1 %v4809_v7 }
  0x9d   : > { %4171 = vmatmul.mubr.msk.bf16.gmra.mrb[4].mxu1 %vm352_vm2, %v4956_v6 }
  0x9e   : > { %4315 = vmatmul.mubr.msk.bf16.gmra.mrb[12].mxu0 %vm352_vm2, %v5104_v53  ;;  %4174 = vmatprep.mubr.msk.bf16.mxu1 %vm352_vm2, %v4981_v18 }
  0x9f   : > { %4318 = vmatprep.mubr.msk.bf16.mxu0 %vm352_vm2, %v5108_v60 }
  0xa5   : > { %4175 = vmatmul.mubr.msk.bf16.gmra.mrb[8].mxu1 %vm352_vm2, %v4983_v20 }
  0xa6   : > { %4319 = vmatmul.mubr.msk.bf16.gmra.mrb[16].mxu0 %vm352_vm2, %v5126_v15  ;;  %4178 = vmatprep.mubr.msk.bf16.mxu1 %vm352_vm2, %v5005_v36 }
  0xa7   : > { %4322 = vmatprep.mubr.msk.bf16.mxu0 %vm352_vm2, %v5130_v19 }
  0xad   : > { %4179 = vmatmul.mubr.msk.bf16.gmra.mrb[12].mxu1 %vm352_vm2, %v5009_v40 }
  0xae   : > { %4323 = vmatmul.mubr.msk.bf16.gmra.mrb[20].mxu0 %vm352_vm2, %v5144_v35  ;;  %4182 = vmatprep.mubr.msk.bf16.mxu1 %vm352_vm2, %v5034_v57 }
  0xaf   : > { %4326 = vmatprep.mubr.msk.bf16.mxu0 %vm352_vm2, %v5149_v45 }
  0xb5   : > { %4183 = vmatmul.mubr.msk.bf16.gmra.mrb[16].mxu1 %vm352_vm2, %v5038_v59 }
  0xb6   : > { %4327 = vmatmul.mubr.msk.bf16.gmra.mrb[24].mxu0 %vm352_vm2, %v5165_v5  ;;  %4186 = vmatprep.mubr.msk.bf16.mxu1 %vm352_vm2, %v5058_v11 }
  0xb7   : > { %4330 = vmatprep.mubr.msk.bf16.mxu0 %vm352_vm2, %v2005_v41 }
  0xbd   : > { %4187 = vmatmul.mubr.msk.bf16.gmra.mrb[20].mxu1 %vm352_vm2, %v5062_v13 }
  0xbe   : > { %4331 = vmatmul.mubr.msk.bf16.gmra.mrb[28].mxu0 %vm352_vm2, %v2006_v2  ;;  %4190 = vmatprep.mubr.msk.bf16.mxu1 %vm352_vm2, %v5082_v29 }
  0xbf   : > { %4336 = vmatprep.mubr.msk.bf16.mxu0 %vm352_vm2, %v4836_v21  ;;  %v3817_v21 = vld [vmem:[%s4822_s10 + $0x189] sm:$0xff] }
  0xc5   : > { %4191 = vmatmul.mubr.msk.bf16.gmra.mrb[24].mxu1 %vm352_vm2, %v5086_v33 }
  0xc6   : > { %4337 = vmatmul.mubr.msk.bf16.vlgmr.msra.gmra.mrb[0].mxu0 %vm352_vm2, %v4841_v24  ;;  %4194 = vmatprep.mubr.msk.bf16.mxu1 %vm352_vm2, %v5106_v26 }
  0xc7   : > { %4369 = vmatpush3.bf16.msra.mxu0 %v2646_v46  ;;  %4340 = vmatprep.mubr.msk.bf16.mxu0 %vm352_vm2, %v4863_v31  ;;  %v3818_v31 = vld [vmem:[%s4822_s10 + $0x199] sm:$0xff] }
  0xcd   : > { %4195 = vmatmul.mubr.msk.bf16.gmra.mrb[28].mxu1 %vm352_vm2, %v5110_v61 }
  0xce   : > { %4341 = vmatmul.mubr.msk.bf16.gmra.mrb[4].mxu0 %vm352_vm2, %v4865_v32  ;;  %4200 = vmatprep.mubr.msk.bf16.mxu1 %vm352_vm2, %v5000_v34  ;;  %v3819_v32 = vld [vmem:[%s4822_s10 + $0x1a1] sm:$0xff] }
  0xcf   : > { %4344 = vmatprep.mubr.msk.bf16.mxu0 %vm352_vm2, %v4879_v37  ;;  %v2300_v37 = vpack.c.bf16 %v3819_v32, %v3818_v31 }
  0xd5   : > { %4201 = vmatmul.mubr.msk.bf16.vlgmr.msra.gmra.mrb[0].mxu1 %vm352_vm2, %v5007_v39 }
  0xd6   : > { %4345 = vmatmul.mubr.msk.bf16.gmra.mrb[8].mxu0 %vm352_vm2, %v4881_v38  ;;  %4204 = vmatprep.mubr.msk.bf16.mxu1 %vm352_vm2, %v5032_v54  ;;  %v3867_v38 = vld [vmem:[%s4822_s10 + $0x19a] sm:$0xff]  ;;  %v2918_v54 = vld [vmem:[%s6068_s3 + $0x30] sm:$0xff] }
  0xd7   : > { %4348 = vmatprep.mubr.msk.bf16.mxu0 %vm352_vm2, %v4895_v43  ;;  %4465 = vmatpush3.bf16.msra.mxu1 %v4809_v7  ;;  %v3816_v7 = vld [vmem:[%s4822_s10 + $0x181] sm:$0xff] }
  0xd8   : > { %v2299_v24 = vpack.c.bf16 %v3817_v21, %v3816_v7  ;;  %v3868_v43 = vld [vmem:[%s4822_s10 + $0x1a2] sm:$0xff] }
  0xdd   : > { %4205 = vmatmul.mubr.msk.bf16.gmra.mrb[4].mxu1 %vm352_vm2, %v5036_v58 }
  0xde   : > { %4349 = vmatmul.mubr.msk.bf16.gmra.mrb[12].mxu0 %vm352_vm2, %v4897_v44  ;;  %4208 = vmatprep.mubr.msk.bf16.mxu1 %vm352_vm2, %v5056_v10  ;;  %v2594_v44 = vpack.c.bf16 %v3868_v43, %v3867_v38 }
  0xdf   : > { %4352 = vmatprep.mubr.msk.bf16.mxu0 %vm352_vm2, %v4911_v49  ;;  %v2912_v49 = vld [vmem:[%s6068_s3] sm:$0xff] }
  0xe5   : > { %4209 = vmatmul.mubr.msk.bf16.gmra.mrb[8].mxu1 %vm352_vm2, %v5060_v12 }
  0xe6   : > { %4353 = vmatmul.mubr.msk.bf16.gmra.mrb[16].mxu0 %vm352_vm2, %v4913_v50  ;;  %4212 = vmatprep.mubr.msk.bf16.mxu1 %vm352_vm2, %v5080_v28  ;;  %v2913_v50 = vld [vmem:[%s6068_s3 + $0x8] sm:$0xff] }
  0xe7   : > { %4356 = vmatprep.mubr.msk.bf16.mxu0 %vm352_vm2, %v4927_v55  ;;  %v5342_v55 = vpack.c.bf16 %v2913_v50, %v2912_v49 }
  0xed   : > { %4213 = vmatmul.mubr.msk.bf16.gmra.mrb[12].mxu1 %vm352_vm2, %v5084_v30 }
  0xee   : > { %4357 = vmatmul.mubr.msk.bf16.gmra.mrb[20].mxu0 %vm352_vm2, %v4947_v1  ;;  %4216 = vmatprep.mubr.msk.bf16.mxu1 %vm352_vm2, %v5104_v53 }
  0xef   : > { %4360 = vmatprep.mubr.msk.bf16.mxu0 %vm352_vm2, %v4954_v4 }
  0xf5   : > { %4217 = vmatmul.mubr.msk.bf16.gmra.mrb[16].mxu1 %vm352_vm2, %v5108_v60 }
  0xf6   : > { %4361 = vmatmul.mubr.msk.bf16.gmra.mrb[24].mxu0 %vm352_vm2, %v4979_v17  ;;  %4220 = vmatprep.mubr.msk.bf16.mxu1 %vm352_vm2, %v5126_v15 }
  0xf7   : > { %4364 = vmatprep.mubr.msk.bf16.mxu0 %vm352_vm2, %v2299_v24 }
  0xfd   : > { %4221 = vmatmul.mubr.msk.bf16.gmra.mrb[20].mxu1 %vm352_vm2, %v5130_v19 }
  0xfe   : > { %4365 = vmatmul.mubr.msk.bf16.gmra.mrb[28].mxu0 %vm352_vm2, %v2300_v37  ;;  %4224 = vmatprep.mubr.msk.bf16.mxu1 %vm352_vm2, %v5144_v35  ;;  %v5414_v35 = vld [vmem:[%s6067_s2] ss:$0 sm:$0xff] }
  0xff   : > { %4370 = vmatprep.mubr.msk.bf16.mxu0 %vm352_vm2, %v4952_v3  ;;  %v2914_v3 = vld [vmem:[%s6068_s3 + $0x10] sm:$0xff] }
 0x105   : > { %4225 = vmatmul.mubr.msk.bf16.gmra.mrb[24].mxu1 %vm352_vm2, %v5149_v45 }
 0x106   : > { %4371 = vmatmul.mubr.msk.bf16.vlgmr.msra.gmra.mrb[0].mxu0 %vm352_vm2, %v4956_v6  ;;  %4228 = vmatprep.mubr.msk.bf16.mxu1 %vm352_vm2, %v5165_v5 }
 0x107   : > { %4374 = vmatprep.mubr.msk.bf16.mxu0 %vm352_vm2, %v4981_v18  ;;  %v2917_v18 = vld [vmem:[%s6068_s3 + $0x28] sm:$0xff] }
 0x10d   : > { %4229 = vmatmul.mubr.msk.bf16.gmra.mrb[28].mxu1 %vm352_vm2, %v2005_v41 }
 0x10e   : > { %4375 = vmatmul.mubr.msk.bf16.gmra.mrb[4].mxu0 %vm352_vm2, %v4983_v20  ;;  %4258 = vmatprep.mubr.msk.bf16.mxu1 %vm352_vm2, %v4947_v1  ;;  %v4746_v1 = vmov 0.0|0.0  }
 0x10f   : > { %4378 = vmatprep.mubr.msk.bf16.mxu0 %vm352_vm2, %v5005_v36  ;;  %4440 = vmatprep.subr.bf16.mxu1 %v4746_v1 }
 0x115   : > { %4259 = vmatmul.mubr.msk.bf16.vlgmr.msra.gmra.mrb[24].mxu1 %vm352_vm2, %v4954_v4  ;;  %v2915_v4 = vld [vmem:[%s6068_s3 + $0x18] sm:$0xff] }
 0x116   : > { %4379 = vmatmul.mubr.msk.bf16.gmra.mrb[8].mxu0 %vm352_vm2, %v5009_v40  ;;  %4262 = vmatprep.mubr.msk.bf16.mxu1 %vm352_vm2, %v4979_v17  ;;  %v5353_v6 = vpack.c.bf16 %v2915_v4, %v2914_v3  ;;  %v2916_v17 = vld [vmem:[%s6068_s3 + $0x20] sm:$0xff] }
 0x117   : > { %4382 = vmatprep.mubr.msk.bf16.mxu0 %vm352_vm2, %v5034_v57  ;;  %4442 = vmatpush3.bf16.msra.mxu1 %v5342_v55  ;;  %v5363_v34 = vpack.c.bf16 %v2917_v18, %v2916_v17  ;;  %v2919_v57 = vld [vmem:[%s6068_s3 + $0x38] sm:$0xff] }
 0x118   : > { %4443 = vmatprep.subr.bf16.mxu1 %v4746_v1  ;;  %v5373_v58 = vpack.c.bf16 %v2919_v57, %v2918_v54 }
 0x11b   : > { %4445 = vmatpush3.bf16.msra.mxu1 %v5353_v6 }
 0x11c   : > { %4446 = vmatprep.subr.bf16.mxu1 %v4746_v1 }
 0x11d   : > { %4263 = vmatmul.mubr.msk.bf16.gmra.mrb[28].mxu1 %vm352_vm2, %v2299_v24 }
 0x11e   : > { %4383 = vmatmul.mubr.msk.bf16.gmra.mrb[12].mxu0 %vm352_vm2, %v5038_v59  ;;  %v4748_v59 = vmov 0.0  }
 0x11f   : > { %4386 = vmatprep.mubr.msk.bf16.mxu0 %vm352_vm2, %v5058_v11  ;;  %4448 = vmatpush3.bf16.msra.mxu1 %v5363_v34  ;;  %3396 = vst.msk [vmem:[%s5728_s20 + $0x18] sm:$0xff] %vm2922_vm4, %v4748_v59  ;;  %3397 = vst.msk [vmem:[%s5728_s20 + $0x20] sm:$0xff] %vm2922_vm4, %v4748_v59 }
 0x120   : > { %4449 = vmatprep.subr.bf16.mxu1 %v4746_v1  ;;  %4418 = vmatprep.mubr.msk.f32.mxu1 %vm4747_vm3, %v4748_v59  ;;  %3399 = vst.msk [vmem:[%s5728_s20 + $0x30] sm:$0xff] %vm2922_vm4, %v4748_v59  ;;  %3400 = vst.msk [vmem:[%s5728_s20 + $0x38] sm:$0xff] %vm2922_vm4, %v4748_v59 }
 0x121   : > { %3402 = vst.msk [vmem:[%s5728_s20 + $0x48] sm:$0xff] %vm2922_vm4, %v4748_v59  ;;  %3403 = vst.msk [vmem:[%s5728_s20 + $0x50] sm:$0xff] %vm2922_vm4, %v4748_v59 }
 0x122   : > { %3405 = vst.msk [vmem:[%s5728_s20 + $0x60] sm:$0xff] %vm2922_vm4, %v4748_v59  ;;  %3406 = vst.msk [vmem:[%s5728_s20 + $0x68] sm:$0xff] %vm2922_vm4, %v4748_v59 }
 0x123   : > { %4451 = vmatpush3.bf16.msra.mxu1 %v5373_v58  ;;  %3408 = vst.msk [vmem:[%s5728_s20 + $0x78] sm:$0xff] %vm2922_vm4, %v4748_v59  ;;  %3409 = vst.msk [vmem:[%s5728_s20 + $0x80] sm:$0xff] %vm2922_vm4, %v4748_v59 }
 0x124   : > { %4452 = vmatprep.subr.bf16.mxu1 %v4746_v1  ;;  %3411 = vst.msk [vmem:[%s5728_s20 + $0x90] sm:$0xff] %vm2922_vm4, %v4748_v59  ;;  %3412 = vst.msk [vmem:[%s5728_s20 + $0x98] sm:$0xff] %vm2922_vm4, %v4748_v59 }
 0x125   : > { %3414 = vst.msk [vmem:[%s5728_s20 + $0xa8] sm:$0xff] %vm2922_vm4, %v4748_v59  ;;  %3415 = vst.msk [vmem:[%s5728_s20 + $0xb0] sm:$0xff] %vm2922_vm4, %v4748_v59 }
 0x126   : > { %4387 = vmatmul.mubr.msk.bf16.gmra.mrb[16].mxu0 %vm352_vm2, %v5062_v13  ;;  %3417 = vst.msk [vmem:[%s5728_s20 + $0xc0] sm:$0xff] %vm2922_vm4, %v4748_v59  ;;  %3418 = vst.msk [vmem:[%s5728_s20 + $0xc8] sm:$0xff] %vm2922_vm4, %v4748_v59 }
 0x127   : > { %4390 = vmatprep.mubr.msk.bf16.mxu0 %vm352_vm2, %v5082_v29  ;;  %3420 = vst.msk [vmem:[%s5728_s20 + $0xd8] sm:$0xff] %vm2922_vm4, %v4748_v59  ;;  %3421 = vst.msk [vmem:[%s5728_s20 + $0xe0] sm:$0xff] %vm2922_vm4, %v4748_v59 }
 0x128   : > { %3423 = vst.msk [vmem:[%s5728_s20 + $0xf0] sm:$0xff] %vm2922_vm4, %v4748_v59  ;;  %3424 = vst.msk [vmem:[%s5728_s20 + $0xf8] sm:$0xff] %vm2922_vm4, %v4748_v59 }
 0x129   : > { %3426 = vst.msk [vmem:[%s5728_s20 + $0x108] sm:$0xff] %vm2922_vm4, %v4748_v59  ;;  %3427 = vst.msk [vmem:[%s5728_s20 + $0x110] sm:$0xff] %vm2922_vm4, %v4748_v59 }
 0x12a   : > { %3429 = vst.msk [vmem:[%s5728_s20 + $0x120] sm:$0xff] %vm2922_vm4, %v4748_v59  ;;  %3430 = vst.msk [vmem:[%s5728_s20 + $0x128] sm:$0xff] %vm2922_vm4, %v4748_v59 }
 0x12b   : > { %3432 = vst.msk [vmem:[%s5728_s20 + $0x138] sm:$0xff] %vm2922_vm4, %v4748_v59  ;;  %3433 = vst.msk [vmem:[%s5728_s20 + $0x140] sm:$0xff] %vm2922_vm4, %v4748_v59 }
 0x12c   : > { %3435 = vst.msk [vmem:[%s5728_s20 + $0x150] sm:$0xff] %vm2922_vm4, %v4748_v59  ;;  %3436 = vst.msk [vmem:[%s5728_s20 + $0x158] sm:$0xff] %vm2922_vm4, %v4748_v59 }
 0x12d   : > { %3438 = vst.msk [vmem:[%s5728_s20 + $0x168] sm:$0xff] %vm2922_vm4, %v4748_v59  ;;  %3439 = vst.msk [vmem:[%s5728_s20 + $0x170] sm:$0xff] %vm2922_vm4, %v4748_v59 }
 0x12e   : > { %4391 = vmatmul.mubr.msk.bf16.gmra.mrb[20].mxu0 %vm352_vm2, %v5086_v33  ;;  %3441 = vst.msk [vmem:[%s5728_s20 + $0x180] sm:$0xff] %vm2922_vm4, %v4748_v59  ;;  %3442 = vst.msk [vmem:[%s5728_s20 + $0x188] sm:$0xff] %vm2922_vm4, %v4748_v59 }
 0x12f   : > { %4394 = vmatprep.mubr.msk.bf16.mxu0 %vm352_vm2, %v5106_v26  ;;  %3392 = vst.msk [vmem:[%s5728_s20] sm:$0xff] %vm2922_vm4, %v4748_v59  ;;  %3393 = vst.msk [vmem:[%s5728_s20 + $0x8] sm:$0xff] %vm2922_vm4, %v4748_v59 }
 0x130   : > { %3444 = vst.msk [vmem:[%s5728_s20 + $0x198] sm:$0xff] %vm2922_vm4, %v4748_v59  ;;  %3445 = vst.msk [vmem:[%s5728_s20 + $0x1a0] sm:$0xff] %vm2922_vm4, %v4748_v59 }
 0x131   : > { %3395 = vst.msk [vmem:[%s5728_s20 + $0x10] sm:$0x3] %vm3394_vm5, %v4748_v59  ;;  %3398 = vst.msk [vmem:[%s5728_s20 + $0x28] sm:$0x3] %vm3394_vm5, %v4748_v59 }
 0x132   : > { %3401 = vst.msk [vmem:[%s5728_s20 + $0x40] sm:$0x3] %vm3394_vm5, %v4748_v59  ;;  %3404 = vst.msk [vmem:[%s5728_s20 + $0x58] sm:$0x3] %vm3394_vm5, %v4748_v59 }
 0x133   : > { %3407 = vst.msk [vmem:[%s5728_s20 + $0x70] sm:$0x3] %vm3394_vm5, %v4748_v59  ;;  %3410 = vst.msk [vmem:[%s5728_s20 + $0x88] sm:$0x3] %vm3394_vm5, %v4748_v59 }
 0x134   : > { %3413 = vst.msk [vmem:[%s5728_s20 + $0xa0] sm:$0x3] %vm3394_vm5, %v4748_v59  ;;  %3416 = vst.msk [vmem:[%s5728_s20 + $0xb8] sm:$0x3] %vm3394_vm5, %v4748_v59 }
 0x135   : > { %3419 = vst.msk [vmem:[%s5728_s20 + $0xd0] sm:$0x3] %vm3394_vm5, %v4748_v59  ;;  %3422 = vst.msk [vmem:[%s5728_s20 + $0xe8] sm:$0x3] %vm3394_vm5, %v4748_v59 }
 0x136   : > { %4395 = vmatmul.mubr.msk.bf16.gmra.mrb[24].mxu0 %vm352_vm2, %v5110_v61  ;;  %3425 = vst.msk [vmem:[%s5728_s20 + $0x100] sm:$0x3] %vm3394_vm5, %v4748_v59  ;;  %3428 = vst.msk [vmem:[%s5728_s20 + $0x118] sm:$0x3] %vm3394_vm5, %v4748_v59 }
 0x137   : > { %4398 = vmatprep.mubr.msk.bf16.mxu0 %vm352_vm2, %v5128_v16  ;;  %3431 = vst.msk [vmem:[%s5728_s20 + $0x130] sm:$0x3] %vm3394_vm5, %v4748_v59  ;;  %3434 = vst.msk [vmem:[%s5728_s20 + $0x148] sm:$0x3] %vm3394_vm5, %v4748_v59 }
 0x138   : > { %3437 = vst.msk [vmem:[%s5728_s20 + $0x160] sm:$0x3] %vm3394_vm5, %v4748_v59  ;;  %3440 = vst.msk [vmem:[%s5728_s20 + $0x178] sm:$0x3] %vm3394_vm5, %v4748_v59 }
 0x139   : > { %3443 = vst.msk [vmem:[%s5728_s20 + $0x190] sm:$0x3] %vm3394_vm5, %v4748_v59  ;;  %3446 = vst.msk [vmem:[%s5728_s20 + $0x1a8] sm:$0x3] %vm3394_vm5, %v4748_v59 }
 0x13e   : > { %4399 = vmatmul.mubr.msk.bf16.gmra.mrb[28].mxu0 %vm352_vm2, %v2594_v44 }
 0x1a8   : > { %v4202_v20 = vpop.f32.mrb[0].mxu1 }
 0x1a9   : > { %v1211_v36 = vpop.f32.mrb[1].mxu1 }
 0x1aa   : > { %v4203_v39 = vpop.f32.mrb[2].mxu1 }
 0x1ab   : > { %v1214_v40 = vpop.f32.mrb[3].mxu1 }
 0x1b0   : > { %v4206_v10 = vpop.f32.mrb[4].mxu1 }
 0x1b1   : > { %v1227_v11 = vpop.f32.mrb[5].mxu1 }
 0x1b2   : > { %v4207_v12 = vpop.f32.mrb[6].mxu1 }
 0x1b3   : > { %v1230_v13 = vpop.f32.mrb[7].mxu1 }
 0x1b8   : > { %v5379_v28 = vpop.f32.mrb[8].mxu1 }
 0x1b9   : > { %v5381_v29 = vpop.f32.mrb[9].mxu1 }
 0x1ba   : > { %v5383_v30 = vpop.f32.mrb[10].mxu1 }
 0x1bb   : > { %v5385_v33 = vpop.f32.mrb[11].mxu1 }
 0x1c0   : > { %v5387_v53 = vpop.f32.mrb[12].mxu1 }
 0x1c1   : > { %v5389_v26 = vpop.f32.mrb[13].mxu1 }
 0x1c2   : > { %v5391_v60 = vpop.f32.mrb[14].mxu1 }
 0x1c3   : > { %v5393_v61 = vpop.f32.mrb[15].mxu1 }
 0x1c8   : > { %v5395_v9 = vpop.f32.mrb[16].mxu1 }
 0x1c9   : > { %v5397_v14 = vpop.f32.mrb[17].mxu1 }
 0x1ca   : > { %v5399_v15 = vpop.f32.mrb[18].mxu1 }
 0x1cb   : > { %v5401_v16 = vpop.f32.mrb[19].mxu1 }
 0x1d0   : > { %v5403_v19 = vpop.f32.mrb[20].mxu1 }
 0x1d1   : > { %v5405_v22 = vpop.f32.mrb[21].mxu1 }
 0x1d2   : > { %v5407_v23 = vpop.f32.mrb[22].mxu1 }
 0x1d3   : > { %v5409_v25 = vpop.f32.mrb[23].mxu1 }
 0x1d9   : > { %v4372_v27 = vpop.f32.mrb[0].mxu0 }
 0x1da   : > { %v4466_v42 = vadd.f32 %v4372_v27, %v4202_v20  ;;  %v2682_v45 = vpop.f32.mrb[1].mxu0 }
 0x1db   : > { %v4467_v46 = vadd.f32 %v2682_v45, %v1211_v36  ;;  %v4373_v47 = vpop.f32.mrb[2].mxu0 }
 0x1dc   : > { %v2850_v48 = vadd.f32 %v4466_v42, %v5414_v35  ;;  %v4468_v51 = vadd.f32 %v4373_v47, %v4203_v39  ;;  %v2685_v52 = vpop.f32.mrb[3].mxu0 }
 0x1dd   : > { %v2848_v5 = vadd.f32 %v4467_v46, %v5414_v35  ;;  %v4469_v62 = vadd.f32 %v2685_v52, %v1214_v40 }
 0x1de   : > { %v5418_v56 = vmax.f32 %v2850_v48, 0.0  ;;  %v2851_v8 = vadd.f32 %v4468_v51, %v5414_v35 }
 0x1df   : > { %v5421_v41 = vmax.f32 %v2848_v5, 0.0  ;;  %v2849_v63 = vadd.f32 %v4469_v62, %v5414_v35 }
 0x1e0   : > { %v5424_v0 = vmax.f32 %v2851_v8, 0.0  ;;  %v2926_v24 = vsel %vm2922_vm4, %v5418_v56, 0.0  ;;  %v2994_v31 = vmul.f32 %v5418_v56, %v5418_v56 }
 0x1e1   : > { %v2992_v2 = vmul.f32 %v5421_v41, %v5421_v41  ;;  %v5428_v7 = vmax.f32 %v2849_v63, 0.0  ;;  %v4376_v21 = vpop.f32.mrb[4].mxu0  ;;  %v2923_v38 = vsel %vm2922_vm4, %v5421_v41, 0.0 }
 0x1e2   : > { %v4470_v32 = vadd.f32 %v4376_v21, %v4206_v10  ;;  %v2698_v37 = vpop.f32.mrb[5].mxu0  ;;  %v2995_v3 = vmul.f32 %v5424_v0, %v5424_v0  ;;  %v3027_v57 = vsel %vm2922_vm4, %v2994_v31, 0.0  ;;  %v2928_v42 = vsel %vm2922_vm4, %v5424_v0, 0.0 }
 0x1e3   : > { %v2924_v43 = vsel %vm2922_vm4, %v5428_v7, 0.0  ;;  %v2993_v44 = vmul.f32 %v5428_v7, %v5428_v7  ;;  %v4471_v49 = vadd.f32 %v2698_v37, %v1227_v11  ;;  %v4377_v50 = vpop.f32.mrb[6].mxu0  ;;  %v3024_v36 = vsel %vm2922_vm4, %v2992_v2, 0.0 }
 0x1e4   : > { %v2925_v4 = vadd.f32 %v2924_v43, %v2923_v38  ;;  %v2854_v17 = vadd.f32 %v4470_v32, %v5414_v35  ;;  %v4472_v18 = vadd.f32 %v4377_v50, %v4207_v12  ;;  %v2701_v20 = vpop.f32.mrb[7].mxu0 }
 0x1e5   : > { %v3025_v39 = vsel %vm2922_vm4, %v2993_v44, 0.0  ;;  %v2852_v40 = vadd.f32 %v4471_v49, %v5414_v35  ;;  %v4473_v54 = vadd.f32 %v2701_v20, %v1230_v13  ;;  %v3029_v13 = vsel %vm2922_vm4, %v2995_v3, 0.0 }
 0x1e6   : > { %v2927_v10 = vadd.f32 %v2926_v24, %v2925_v4  ;;  %v3026_v11 = vadd.f32 %v3025_v39, %v3024_v36  ;;  %v2855_v27 = vadd.f32 %v4472_v18, %v5414_v35  ;;  %v5450_v45 = vmax.f32 %v2854_v17, 0.0 }
 0x1e7   : > { %v5452_v12 = vmax.f32 %v2852_v40, 0.0  ;;  %v2853_v46 = vadd.f32 %v4473_v54, %v5414_v35 }
 0x1e8   : > { %v3028_v47 = vadd.f32 %v3027_v57, %v3026_v11  ;;  %v2929_v48 = vadd.f32 %v2928_v42, %v2927_v10  ;;  %v5455_v51 = vpop.f32.mrb[24].mxu1  ;;  %v5466_v24 = vmax.f32 %v2855_v27, 0.0  ;;  %v2998_v38 = vmul.f32 %v5450_v45, %v5450_v45 }
 0x1e9   : > { %v2930_v52 = vsel %vm2922_vm4, %v5452_v12, 0.0  ;;  %v2996_v5 = vmul.f32 %v5452_v12, %v5452_v12  ;;  %v5462_v62 = vmax.f32 %v2853_v46, 0.0  ;;  %v4380_v8 = vpop.f32.mrb[8].mxu0  ;;  %v5464_v63 = vpop.f32.mrb[25].mxu1  ;;  %v2934_v20 = vsel %vm2922_vm4, %v5450_v45, 0.0 }
 0x1ea   : > { %v2931_v2 = vadd.f32 %v2930_v52, %v2929_v48  ;;  %v3030_v21 = vadd.f32 %v3029_v13, %v3028_v47  ;;  %v4474_v31 = vadd.f32 %v4380_v8, %v5379_v28  ;;  %v2714_v32 = vpop.f32.mrb[9].mxu0  ;;  %v5469_v37 = vpop.f32.mrb[26].mxu1  ;;  %v2936_v54 = vsel %vm2922_vm4, %v5466_v24, 0.0 }
 0x1eb   : > { %v3031_v43 = vsel %vm2922_vm4, %v2996_v5, 0.0  ;;  %v2932_v44 = vsel %vm2922_vm4, %v5462_v62, 0.0  ;;  %v4381_v49 = vpop.f32.mrb[10].mxu0  ;;  %v5476_v50 = vpop.f32.mrb[27].mxu1  ;;  %v2997_v17 = vmul.f32 %v5462_v62, %v5462_v62  ;;  %v4475_v36 = vadd.f32 %v2714_v32, %v5381_v29 }
 0x1ec   : > { %v3032_v3 = vadd.f32 %v3031_v43, %v3030_v21  ;;  %v2933_v4 = vadd.f32 %v2932_v44, %v2931_v2  ;;  %v2858_v28 = vadd.f32 %v4474_v31, %v5414_v35  ;;  %v2717_v18 = vpop.f32.mrb[11].mxu0  ;;  %v4476_v39 = vadd.f32 %v4381_v49, %v5383_v30 }
 0x1ed   : > { %v4477_v40 = vadd.f32 %v2717_v18, %v5385_v33  ;;  %v2999_v57 = vmul.f32 %v5466_v24, %v5466_v24  ;;  %v3033_v11 = vsel %vm2922_vm4, %v2997_v17, 0.0  ;;  %v2856_v42 = vadd.f32 %v4475_v36, %v5414_v35 }
 0x1ee   : > { %v2935_v10 = vadd.f32 %v2934_v20, %v2933_v4  ;;  %v3034_v27 = vadd.f32 %v3033_v11, %v3032_v3  ;;  %v2859_v46 = vadd.f32 %v4476_v39, %v5414_v35  ;;  %v3035_v30 = vsel %vm2922_vm4, %v2998_v38, 0.0 }
 0x1ef   : > { %v2857_v29 = vadd.f32 %v4477_v40, %v5414_v35  ;;  %v5495_v47 = vmax.f32 %v2858_v28, 0.0  ;;  %v5499_v52 = vmax.f32 %v2856_v42, 0.0  ;;  %v3037_v21 = vsel %vm2922_vm4, %v2999_v57, 0.0 }
 0x1f0   : > { %v2937_v33 = vadd.f32 %v2936_v54, %v2935_v10  ;;  %v5497_v48 = vpop.f32.mrb[28].mxu1  ;;  %v3036_v13 = vadd.f32 %v3035_v30, %v3034_v27  ;;  %v5513_v3 = vmax.f32 %v2859_v46, 0.0 }
 0x1f1   : > { %v5501_v5 = vmax.f32 %v2857_v29, 0.0  ;;  %v4384_v8 = vpop.f32.mrb[12].mxu0  ;;  %v5503_v2 = vpop.f32.mrb[29].mxu1  ;;  %v2938_v38 = vsel %vm2922_vm4, %v5499_v52, 0.0  ;;  %v3000_v44 = vmul.f32 %v5499_v52, %v5499_v52  ;;  %v3002_v28 = vmul.f32 %v5495_v47, %v5495_v47 }
 0x1f2   : > { %v4478_v31 = vadd.f32 %v4384_v8, %v5387_v53  ;;  %v2730_v32 = vpop.f32.mrb[13].mxu0  ;;  %v5507_v43 = vpop.f32.mrb[30].mxu1  ;;  %v3038_v49 = vadd.f32 %v3037_v21, %v3036_v13  ;;  %v2939_v18 = vadd.f32 %v2938_v38, %v2937_v33  ;;  %v2942_v10 = vsel %vm2922_vm4, %v5495_v47, 0.0 }
 0x1f3   : > { %v4385_v4 = vpop.f32.mrb[14].mxu0  ;;  %v5515_v17 = vpop.f32.mrb[31].mxu1  ;;  %v2940_v53 = vsel %vm2922_vm4, %v5501_v5, 0.0  ;;  %v3001_v20 = vmul.f32 %v5501_v5, %v5501_v5  ;;  %v3039_v39 = vsel %vm2922_vm4, %v3000_v44, 0.0  ;;  %v4479_v54 = vadd.f32 %v2730_v32, %v5389_v26 }
 0x1f4   : > { %v2733_v36 = vpop.f32.mrb[15].mxu0  ;;  %v2862_v40 = vadd.f32 %v4478_v31, %v5414_v35  ;;  %v4480_v57 = vadd.f32 %v4385_v4, %v5391_v60  ;;  %v3040_v11 = vadd.f32 %v3039_v39, %v3038_v49  ;;  %v2941_v27 = vadd.f32 %v2940_v53, %v2939_v18 }
 0x1f5   : > { %v3041_v42 = vsel %vm2922_vm4, %v3001_v20, 0.0  ;;  %v3003_v46 = vmul.f32 %v5513_v3, %v5513_v3  ;;  %v2860_v30 = vadd.f32 %v4479_v54, %v5414_v35  ;;  %v4481_v33 = vadd.f32 %v2733_v36, %v5393_v61 }
 0x1f6   : > { %v5532_v29 = vmax.f32 %v2862_v40, 0.0  ;;  %v2943_v13 = vadd.f32 %v2942_v10, %v2941_v27  ;;  %v3042_v26 = vadd.f32 %v3041_v42, %v3040_v11  ;;  %v2863_v60 = vadd.f32 %v4480_v57, %v5414_v35 }
 0x1f7   : > { %v3043_v8 = vsel %vm2922_vm4, %v3002_v28, 0.0  ;;  %v2944_v21 = vsel %vm2922_vm4, %v5513_v3, 0.0  ;;  %v5540_v31 = vmax.f32 %v2860_v30, 0.0  ;;  %v2861_v49 = vadd.f32 %v4481_v33, %v5414_v35 }
 0x1f8   : > { %v3044_v38 = vadd.f32 %v3043_v8, %v3042_v26  ;;  %v2945_v44 = vadd.f32 %v2944_v21, %v2943_v13  ;;  %v3045_v61 = vsel %vm2922_vm4, %v3003_v46, 0.0  ;;  %v3006_v53 = vmul.f32 %v5532_v29, %v5532_v29 }
 0x1f9   : > { %v4388_v32 = vpop.f32.mrb[16].mxu0  ;;  %v2946_v28 = vsel %vm2922_vm4, %v5540_v31, 0.0  ;;  %v3004_v20 = vmul.f32 %v5540_v31, %v5540_v31  ;;  %v5551_v54 = vmax.f32 %v2863_v60, 0.0  ;;  %v5553_v57 = vmax.f32 %v2861_v49, 0.0 }
 0x1fa   : > { %v4482_v4 = vadd.f32 %v4388_v32, %v5395_v9  ;;  %v2746_v18 = vpop.f32.mrb[17].mxu0  ;;  %v2947_v39 = vadd.f32 %v2946_v28, %v2945_v44  ;;  %v3046_v40 = vadd.f32 %v3045_v61, %v3044_v38  ;;  %v2950_v13 = vsel %vm2922_vm4, %v5532_v29, 0.0 }
 0x1fb   : > { %v4389_v36 = vpop.f32.mrb[18].mxu0  ;;  %v3047_v10 = vsel %vm2922_vm4, %v3004_v20, 0.0  ;;  %v4483_v27 = vadd.f32 %v2746_v18, %v5397_v14  ;;  %v2948_v30 = vsel %vm2922_vm4, %v5553_v57, 0.0  ;;  %v3005_v33 = vmul.f32 %v5553_v57, %v5553_v57 }
 0x1fc   : > { %v2749_v9 = vpop.f32.mrb[19].mxu0  ;;  %v2866_v11 = vadd.f32 %v4482_v4, %v5414_v35  ;;  %v4484_v42 = vadd.f32 %v4389_v36, %v5399_v15  ;;  %v3048_v46 = vadd.f32 %v3047_v10, %v3046_v40  ;;  %v2949_v26 = vadd.f32 %v2948_v30, %v2947_v39 }
 0x1fd   : > { %v2864_v60 = vadd.f32 %v4483_v27, %v5414_v35  ;;  %v3007_v14 = vmul.f32 %v5551_v54, %v5551_v54  ;;  %v3049_v15 = vsel %vm2922_vm4, %v3005_v33, 0.0  ;;  %v4485_v32 = vadd.f32 %v2749_v9, %v5401_v16 }
 0x1fe   : > { %v2867_v8 = vadd.f32 %v4484_v42, %v5414_v35  ;;  %v5570_v21 = vmax.f32 %v2866_v11, 0.0  ;;  %v3051_v38 = vsel %vm2922_vm4, %v3006_v53, 0.0  ;;  %v2951_v44 = vadd.f32 %v2950_v13, %v2949_v26 }
 0x1ff   : > { %v3050_v49 = vadd.f32 %v3049_v15, %v3048_v46  ;;  %v2952_v18 = vsel %vm2922_vm4, %v5551_v54, 0.0  ;;  %v5576_v61 = vmax.f32 %v2864_v60, 0.0  ;;  %v2865_v28 = vadd.f32 %v4485_v32, %v5414_v35 }
 0x200   : > { %v2953_v40 = vadd.f32 %v2952_v18, %v2951_v44  ;;  %v5580_v10 = vmax.f32 %v2867_v8, 0.0  ;;  %v3053_v9 = vsel %vm2922_vm4, %v3007_v14, 0.0  ;;  %v3010_v11 = vmul.f32 %v5570_v21, %v5570_v21 }
 0x201   : > { %v4392_v4 = vpop.f32.mrb[20].mxu0  ;;  %v3052_v39 = vadd.f32 %v3051_v38, %v3050_v49  ;;  %v2954_v27 = vsel %vm2922_vm4, %v5576_v61, 0.0  ;;  %v3008_v42 = vmul.f32 %v5576_v61, %v5576_v61  ;;  %v5590_v33 = vmax.f32 %v2865_v28, 0.0 }
 0x202   : > { %v4486_v20 = vadd.f32 %v4392_v4, %v5403_v19  ;;  %v2762_v36 = vpop.f32.mrb[21].mxu0  ;;  %v2955_v46 = vadd.f32 %v2954_v27, %v2953_v40  ;;  %v3011_v14 = vmul.f32 %v5580_v10, %v5580_v10  ;;  %v3059_v18 = vsel %vm2922_vm4, %v3010_v11, 0.0 }
 0x203   : > { %v4487_v16 = vadd.f32 %v2762_v36, %v5405_v22  ;;  %v4393_v53 = vpop.f32.mrb[22].mxu0  ;;  %v3054_v30 = vadd.f32 %v3053_v9, %v3052_v39  ;;  %v3055_v22 = vsel %vm2922_vm4, %v3008_v42, 0.0  ;;  %v2956_v15 = vsel %vm2922_vm4, %v5590_v33, 0.0 }
 0x204   : > { %v2765_v19 = vpop.f32.mrb[23].mxu0  ;;  %v2870_v13 = vadd.f32 %v4486_v20, %v5414_v35  ;;  %v4488_v60 = vadd.f32 %v4393_v53, %v5407_v23  ;;  %v3009_v32 = vmul.f32 %v5590_v33, %v5590_v33  ;;  %v2957_v38 = vadd.f32 %v2956_v15, %v2955_v46 }
 0x205   : > { %v2868_v26 = vadd.f32 %v4487_v16, %v5414_v35  ;;  %v3056_v8 = vadd.f32 %v3055_v22, %v3054_v30  ;;  %v4489_v4 = vadd.f32 %v2765_v19, %v5409_v25  ;;  %v2958_v23 = vsel %vm2922_vm4, %v5570_v21, 0.0 }
 0x206   : > { %v2871_v49 = vadd.f32 %v4488_v60, %v5414_v35  ;;  %v3057_v28 = vsel %vm2922_vm4, %v3009_v32, 0.0  ;;  %v5610_v20 = vmax.f32 %v2870_v13, 0.0  ;;  %v2960_v39 = vsel %vm2922_vm4, %v5580_v10, 0.0 }
 0x207   : > { %v5602_v44 = vmax.f32 %v2868_v26, 0.0  ;;  %v2959_v40 = vadd.f32 %v2958_v23, %v2957_v38  ;;  %v3058_v16 = vadd.f32 %v3057_v28, %v3056_v8  ;;  %v3061_v25 = vsel %vm2922_vm4, %v3011_v14, 0.0 }
 0x208   : > { %v2869_v11 = vadd.f32 %v4489_v4, %v5414_v35  ;;  %v5621_v13 = vmax.f32 %v2871_v49, 0.0  ;;  %v3014_v60 = vmul.f32 %v5610_v20, %v5610_v20  ;;  %v2966_v49 = vsel %vm2922_vm4, %v5610_v20, 0.0 }
 0x209   : > { %v4396_v36 = vpop.f32.mrb[24].mxu0  ;;  %v3012_v53 = vmul.f32 %v5602_v44, %v5602_v44  ;;  %v2962_v27 = vsel %vm2922_vm4, %v5602_v44, 0.0  ;;  %v3060_v46 = vadd.f32 %v3059_v18, %v3058_v16  ;;  %v2961_v30 = vadd.f32 %v2960_v39, %v2959_v40 }
 0x20a   : > { %v2778_v9 = vpop.f32.mrb[25].mxu0  ;;  %v4490_v42 = vadd.f32 %v4396_v36, %v5455_v51  ;;  %v5627_v14 = vmax.f32 %v2869_v11, 0.0  ;;  %v3015_v28 = vmul.f32 %v5621_v13, %v5621_v13 }
 0x20b   : > { %v4397_v19 = vpop.f32.mrb[26].mxu0  ;;  %v4491_v22 = vadd.f32 %v2778_v9, %v5464_v63  ;;  %v3063_v8 = vsel %vm2922_vm4, %v3012_v53, 0.0  ;;  %v2963_v32 = vadd.f32 %v2962_v27, %v2961_v30  ;;  %v3062_v38 = vadd.f32 %v3061_v25, %v3060_v46 }
 0x20c   : > { %v2781_v26 = vpop.f32.mrb[27].mxu0  ;;  %v2874_v15 = vadd.f32 %v4490_v42, %v5414_v35  ;;  %v4492_v4 = vadd.f32 %v4397_v19, %v5469_v37  ;;  %v2964_v63 = vsel %vm2922_vm4, %v5627_v14, 0.0  ;;  %v3013_v23 = vmul.f32 %v5627_v14, %v5627_v14 }
 0x20d   : > { %v2872_v51 = vadd.f32 %v4491_v22, %v5414_v35  ;;  %v3064_v18 = vadd.f32 %v3063_v8, %v3062_v38  ;;  %v2965_v36 = vadd.f32 %v2964_v63, %v2963_v32  ;;  %v4493_v53 = vadd.f32 %v2781_v26, %v5476_v50 }
 0x20e   : > { %v3065_v40 = vsel %vm2922_vm4, %v3013_v23, 0.0  ;;  %v5643_v16 = vmax.f32 %v2874_v15, 0.0  ;;  %v2875_v37 = vadd.f32 %v4492_v4, %v5414_v35  ;;  %v3067_v25 = vsel %vm2922_vm4, %v3014_v60, 0.0 }
 0x20f   : > { %v5640_v39 = vmax.f32 %v2872_v51, 0.0  ;;  %v2967_v27 = vadd.f32 %v2966_v49, %v2965_v36  ;;  %v3066_v11 = vadd.f32 %v3065_v40, %v3064_v18  ;;  %v2968_v46 = vsel %vm2922_vm4, %v5621_v13, 0.0 }
 0x210   : > { %v2873_v22 = vadd.f32 %v4493_v53, %v5414_v35  ;;  %v3069_v26 = vsel %vm2922_vm4, %v3015_v28, 0.0  ;;  %v3018_v51 = vmul.f32 %v5643_v16, %v5643_v16  ;;  %v5661_v49 = vmax.f32 %v2875_v37, 0.0 }
 0x211   : > { %v4400_v9 = vpop.f32.mrb[28].mxu0  ;;  %v3016_v42 = vmul.f32 %v5640_v39, %v5640_v39  ;;  %v2970_v30 = vsel %vm2922_vm4, %v5640_v39, 0.0  ;;  %v3068_v60 = vadd.f32 %v3067_v25, %v3066_v11  ;;  %v2969_v15 = vadd.f32 %v2968_v46, %v2967_v27 }
 0x212   : > { %v2794_v19 = vpop.f32.mrb[29].mxu0  ;;  %v4494_v8 = vadd.f32 %v4400_v9, %v5497_v48  ;;  %v5663_v63 = vmax.f32 %v2873_v22, 0.0  ;;  %v2974_v37 = vsel %vm2922_vm4, %v5643_v16, 0.0  ;;  %v3075_v27 = vsel %vm2922_vm4, %v3018_v51, 0.0 }
 0x213   : > { %v4401_v50 = vpop.f32.mrb[30].mxu0  ;;  %v4495_v32 = vadd.f32 %v2794_v19, %v5503_v2  ;;  %v3071_v4 = vsel %vm2922_vm4, %v3016_v42, 0.0  ;;  %v2971_v23 = vadd.f32 %v2970_v30, %v2969_v15  ;;  %v3070_v18 = vadd.f32 %v3069_v26, %v3068_v60 }
 0x214   : > { %v2797_v38 = vpop.f32.mrb[31].mxu0  ;;  %v4496_v28 = vadd.f32 %v4401_v50, %v5507_v43  ;;  %v2972_v36 = vsel %vm2922_vm4, %v5663_v63, 0.0  ;;  %v3017_v2 = vmul.f32 %v5663_v63, %v5663_v63  ;;  %v2878_v40 = vadd.f32 %v4494_v8, %v5414_v35 }
 0x215   : > { %v2876_v48 = vadd.f32 %v4495_v32, %v5414_v35  ;;  %v3072_v53 = vadd.f32 %v3071_v4, %v3070_v18  ;;  %v2973_v9 = vadd.f32 %v2972_v36, %v2971_v23  ;;  %v3019_v43 = vmul.f32 %v5661_v49, %v5661_v49 }
 0x216   : > { %v3073_v11 = vsel %vm2922_vm4, %v3017_v2, 0.0  ;;  %v4497_v42 = vadd.f32 %v2797_v38, %v5515_v17  ;;  %v2976_v19 = vsel %vm2922_vm4, %v5661_v49, 0.0  ;;  %v5685_v8 = vmax.f32 %v2878_v40, 0.0 }
 0x217   : > { %v5674_v25 = vmax.f32 %v2876_v48, 0.0  ;;  %v2975_v46 = vadd.f32 %v2974_v37, %v2973_v9  ;;  %v3074_v30 = vadd.f32 %v3073_v11, %v3072_v53  ;;  %v2879_v26 = vadd.f32 %v4496_v28, %v5414_v35 }
 0x218   : > { %v2877_v60 = vadd.f32 %v4497_v42, %v5414_v35  ;;  %v3077_v17 = vsel %vm2922_vm4, %v3019_v43, 0.0  ;;  %v3022_v18 = vmul.f32 %v5685_v8, %v5685_v8  ;;  %v2982_v40 = vsel %vm2922_vm4, %v5685_v8, 0.0 }
 0x219   : > { %v3020_v22 = vmul.f32 %v5674_v25, %v5674_v25  ;;  %v2978_v50 = vsel %vm2922_vm4, %v5674_v25, 0.0  ;;  %v3076_v15 = vadd.f32 %v3075_v27, %v3074_v30  ;;  %v2977_v32 = vadd.f32 %v2976_v19, %v2975_v46 }
 0x21a   : > { %v5693_v51 = vmax.f32 %v2877_v60, 0.0  ;;  %v5697_v48 = vmax.f32 %v2879_v26, 0.0  ;;  %v3083_v27 = vsel %vm2922_vm4, %v3022_v18, 0.0 }
 0x21b   : > { %v3079_v38 = vsel %vm2922_vm4, %v3020_v22, 0.0  ;;  %v2979_v4 = vadd.f32 %v2978_v50, %v2977_v32  ;;  %v3078_v23 = vadd.f32 %v3077_v17, %v3076_v15 }
 0x21c   : > { %v2980_v28 = vsel %vm2922_vm4, %v5693_v51, 0.0  ;;  %v3021_v35 = vmul.f32 %v5693_v51, %v5693_v51  ;;  %v2984_v43 = vsel %vm2922_vm4, %v5697_v48, 0.0  ;;  %v3023_v11 = vmul.f32 %v5697_v48, %v5697_v48 }
 0x21d   : > { %v3080_v36 = vadd.f32 %v3079_v38, %v3078_v23  ;;  %v2981_v2 = vadd.f32 %v2980_v28, %v2979_v4 }
 0x21e   : > { %v3081_v37 = vsel %vm2922_vm4, %v3021_v35, 0.0  ;;  %v3085_v30 = vsel %vm2922_vm4, %v3023_v11, 0.0 }
 0x21f   : > { %v2983_v53 = vadd.f32 %v2982_v40, %v2981_v2  ;;  %v3082_v9 = vadd.f32 %v3081_v37, %v3080_v36 }
 0x221   : > { %v2985_v42 = vadd.f32 %v2984_v43, %v2983_v53  ;;  %v3084_v19 = vadd.f32 %v3083_v27, %v3082_v9 }
 0x223   : > { %v2986_v46 = vrot.slane %v2985_v42, 4  ;;  %v3086_v50 = vadd.f32 %v3085_v30, %v3084_v19 }
 0x225   : > { %v2987_v22 = vadd.f32 %v2986_v46, %v2985_v42  ;;  %v3087_v15 = vrot.slane %v3086_v50, 4 }
 0x227   : > { %v2988_v26 = vrot.slane %v2987_v22, 2  ;;  %v3088_v38 = vadd.f32 %v3087_v15, %v3086_v50 }
 0x229   : > { %v2989_v60 = vadd.f32 %v2988_v26, %v2987_v22  ;;  %v3089_v4 = vrot.slane %v3088_v38, 2 }
 0x22b   : > { %v2990_v32 = vrot.slane %v2989_v60, 1  ;;  %v3090_v23 = vadd.f32 %v3089_v4, %v3088_v38 }
 0x22d   : > { %v2991_v17 = vadd.f32 %v2990_v32, %v2989_v60  ;;  %v3091_v18 = vrot.slane %v3090_v23, 1 }
 0x22f   : > { %4419 = vmatmul.mubr.msk.f32.vlgmr.msra.gmra.mrb[32].mxu1 %vm2922_vm4, %v2991_v17  ;;  %v3092_v28 = vadd.f32 %v3091_v18, %v3090_v23 }
 0x230   : > { %4454 = vmatpush3.bf16.msra.mxu1 %v5342_v55  ;;  %4437 = vmatprep.mubr.msk.f32.mxu1 %vm4747_vm3, %v4748_v59 }
 0x231   : > { %4455 = vmatprep.subr.bf16.mxu1 %v4746_v1 }
 0x234   : > { %4457 = vmatpush3.bf16.msra.mxu1 %v5353_v6  ;;  %v3244_v6 = vlaneseq }
 0x235   : > { %4458 = vmatprep.subr.bf16.mxu1 %v4746_v1 }
 0x238   : > { %4460 = vmatpush3.bf16.msra.mxu1 %v5363_v34 }
 0x239   : > { %4461 = vmatprep.subr.bf16.mxu1 %v4746_v1 }
 0x23c   : > { %4463 = vmatpush3.bf16.msra.mxu1 %v5373_v58  ;;  %v3245_v58 = vshrl.u32 %v3244_v6, 7  ;;  %v3889_v6 = vld [vmem:[%s6069_s4] ss:$0 sm:$0xff] }
 0x23e   : > { %v3246_v40 = vsub.s32 0, %v3245_v58 }
 0x23f   : > { %4438 = vmatmul.mubr.msk.f32.vlgmr.msra.gmra.mrb[34].mxu1 %vm2922_vm4, %v3092_v28 }
 0x302   : > { %v3162_v55 = vpop.f32.mrb[32].mxu1 }
 0x303   : > { %v4420_v1 = vpop.f32.mrb[33].mxu1  ;;  %v3239_v34 = vmul.f32 %v3162_v55, %v3162_v55  ;;  %v5892_v9 = vrot.slane %v3162_v55, %v3246_v40 }
 0x305   : > { %v3248_v27 = vsub.f32 %v5421_v41, %v5892_v9  ;;  %v3249_v59 = vsub.f32 %v5428_v7, %v5892_v9  ;;  %v3250_v43 = vsub.f32 %v5418_v56, %v5892_v9  ;;  %v3251_v11 = vsub.f32 %v5424_v0, %v5892_v9 }
 0x306   : > { %v3252_v42 = vsub.f32 %v5452_v12, %v5892_v9  ;;  %v3253_v19 = vsub.f32 %v5462_v62, %v5892_v9  ;;  %v3254_v46 = vsub.f32 %v5450_v45, %v5892_v9  ;;  %v3255_v41 = vsub.f32 %v5466_v24, %v5892_v9 }
 0x307   : > { %v3256_v7 = vsub.f32 %v5499_v52, %v5892_v9  ;;  %v3257_v56 = vsub.f32 %v5501_v5, %v5892_v9  ;;  %v3258_v0 = vsub.f32 %v5495_v47, %v5892_v9  ;;  %v3259_v12 = vsub.f32 %v5513_v3, %v5892_v9 }
 0x308   : > { %v3260_v62 = vsub.f32 %v5540_v31, %v5892_v9  ;;  %v3261_v45 = vsub.f32 %v5553_v57, %v5892_v9  ;;  %v3262_v24 = vsub.f32 %v5532_v29, %v5892_v9  ;;  %v3263_v52 = vsub.f32 %v5551_v54, %v5892_v9 }
 0x309   : > { %v3264_v5 = vsub.f32 %v5576_v61, %v5892_v9  ;;  %v3265_v47 = vsub.f32 %v5590_v33, %v5892_v9  ;;  %v3266_v3 = vsub.f32 %v5570_v21, %v5892_v9  ;;  %v3267_v31 = vsub.f32 %v5580_v10, %v5892_v9 }
 0x30a   : > { %v3268_v57 = vsub.f32 %v5602_v44, %v5892_v9  ;;  %v3269_v29 = vsub.f32 %v5627_v14, %v5892_v9  ;;  %v3270_v54 = vsub.f32 %v5610_v20, %v5892_v9  ;;  %v3271_v61 = vsub.f32 %v5621_v13, %v5892_v9 }
 0x30b   : > { %v3272_v33 = vsub.f32 %v5640_v39, %v5892_v9  ;;  %v3273_v21 = vsub.f32 %v5663_v63, %v5892_v9  ;;  %v3274_v10 = vsub.f32 %v5643_v16, %v5892_v9  ;;  %v3275_v44 = vsub.f32 %v5661_v49, %v5892_v9 }
 0x30c   : > { %v3276_v14 = vsub.f32 %v5674_v25, %v5892_v9  ;;  %v3277_v20 = vsub.f32 %v5693_v51, %v5892_v9  ;;  %v3278_v13 = vsub.f32 %v5685_v8, %v5892_v9  ;;  %v3279_v39 = vsub.f32 %v5697_v48, %v5892_v9 }
 0x312   : > { %v3235_v35 = vpop.f32.mrb[34].mxu1 }
 0x313   : > { %v3240_v36 = vsub.f32 %v3235_v35, %v3239_v34  ;;  %v4439_v2 = vpop.f32.mrb[35].mxu1 }
 0x315   : > { %v3241_v37 = vmax.f32 %v3240_v36, 0.0 }
 0x317   : > { %v3242_v53 = vadd.f32 1e-05, %v3241_v37 }
 0x319   : > { %4735 = vrsqrt.f32 %v3242_v53 }
 0x323   : > { %v4736_v30 = vpop.eup %4735 }
 0x324   : > { %v3283_v22 = vrot.slane %v4736_v30, %v3246_v40 }
 0x326   : > { %v3284_v63 = vmul.f32 %v3283_v22, %v3248_v27  ;;  %v3285_v50 = vmul.f32 %v3283_v22, %v3249_v59  ;;  %v3286_v26 = vmul.f32 %v3283_v22, %v3250_v43  ;;  %v3287_v16 = vmul.f32 %v3283_v22, %v3251_v11 }
 0x327   : > { %v3288_v60 = vmul.f32 %v3283_v22, %v3252_v42  ;;  %v3289_v15 = vmul.f32 %v3283_v22, %v3253_v19  ;;  %v3290_v49 = vmul.f32 %v3283_v22, %v3254_v46  ;;  %v3291_v32 = vmul.f32 %v3283_v22, %v3255_v41 }
 0x328   : > { %v3292_v17 = vmul.f32 %v3283_v22, %v3256_v7  ;;  %v3293_v38 = vmul.f32 %v3283_v22, %v3257_v56  ;;  %v3294_v25 = vmul.f32 %v3283_v22, %v3258_v0  ;;  %v3295_v4 = vmul.f32 %v3283_v22, %v3259_v12 }
 0x329   : > { %v3296_v23 = vmul.f32 %v3283_v22, %v3260_v62  ;;  %v3297_v51 = vmul.f32 %v3283_v22, %v3261_v45  ;;  %v3298_v18 = vmul.f32 %v3283_v22, %v3262_v24  ;;  %v3299_v28 = vmul.f32 %v3283_v22, %v3263_v52 }
 0x32a   : > { %v3300_v8 = vmul.f32 %v3283_v22, %v3264_v5  ;;  %v3301_v55 = vmul.f32 %v3283_v22, %v3265_v47  ;;  %v3302_v1 = vmul.f32 %v3283_v22, %v3266_v3  ;;  %v3303_v48 = vmul.f32 %v3283_v22, %v3267_v31 }
 0x32b   : > { %v3304_v34 = vmul.f32 %v3283_v22, %v3268_v57  ;;  %v3305_v58 = vmul.f32 %v3283_v22, %v3269_v29  ;;  %v3306_v35 = vmul.f32 %v3283_v22, %v3270_v54  ;;  %v3307_v36 = vmul.f32 %v3283_v22, %v3271_v61  ;;  %v5964_v54 = vld [vmem:[%s6070_s5] ss:$0 sm:$0xff] }
 0x32c   : > { %v3308_v2 = vmul.f32 %v3283_v22, %v3272_v33  ;;  %v3309_v40 = vmul.f32 %v3283_v22, %v3273_v21  ;;  %v3310_v37 = vmul.f32 %v3283_v22, %v3274_v10  ;;  %v3311_v53 = vmul.f32 %v3283_v22, %v3275_v44 }
 0x32d   : > { %v3312_v9 = vmul.f32 %v3283_v22, %v3276_v14  ;;  %v3313_v27 = vmul.f32 %v3283_v22, %v3277_v20  ;;  %v3314_v59 = vmul.f32 %v3283_v22, %v3278_v13  ;;  %v3315_v43 = vmul.f32 %v3283_v22, %v3279_v39 }
 0x32e   : > { %v3322_v11 = vmul.f32 %v3889_v6, %v3284_v63  ;;  %v3323_v42 = vmul.f32 %v3889_v6, %v3285_v50  ;;  %v3324_v19 = vmul.f32 %v3889_v6, %v3286_v26  ;;  %v3325_v46 = vmul.f32 %v3889_v6, %v3287_v16 }
 0x32f   : > { %v3326_v41 = vmul.f32 %v3889_v6, %v3288_v60  ;;  %v3327_v7 = vmul.f32 %v3889_v6, %v3289_v15  ;;  %v3328_v56 = vmul.f32 %v3889_v6, %v3290_v49  ;;  %v3329_v0 = vmul.f32 %v3889_v6, %v3291_v32 }
 0x330   : > { %v3330_v12 = vmul.f32 %v3889_v6, %v3292_v17  ;;  %v3331_v62 = vmul.f32 %v3889_v6, %v3293_v38  ;;  %v3332_v45 = vmul.f32 %v3889_v6, %v3294_v25  ;;  %v3333_v24 = vmul.f32 %v3889_v6, %v3295_v4 }
 0x331   : > { %v3334_v52 = vmul.f32 %v3889_v6, %v3296_v23  ;;  %v3335_v5 = vmul.f32 %v3889_v6, %v3297_v51  ;;  %v3336_v47 = vmul.f32 %v3889_v6, %v3298_v18  ;;  %v3337_v3 = vmul.f32 %v3889_v6, %v3299_v28 }
 0x332   : > { %v3338_v31 = vmul.f32 %v3889_v6, %v3300_v8  ;;  %v3339_v57 = vmul.f32 %v3889_v6, %v3301_v55  ;;  %v3340_v30 = vmul.f32 %v3889_v6, %v3302_v1  ;;  %v3341_v29 = vmul.f32 %v3889_v6, %v3303_v48 }
 0x333   : > { %v3342_v61 = vmul.f32 %v3889_v6, %v3304_v34  ;;  %v3343_v33 = vmul.f32 %v3889_v6, %v3305_v58  ;;  %v3344_v21 = vmul.f32 %v3889_v6, %v3306_v35  ;;  %v3345_v10 = vmul.f32 %v3889_v6, %v3307_v36 }
 0x334   : > { %v3346_v44 = vmul.f32 %v3889_v6, %v3308_v2  ;;  %v3347_v22 = vmul.f32 %v3889_v6, %v3309_v40  ;;  %v3348_v14 = vmul.f32 %v3889_v6, %v3310_v37  ;;  %v3349_v20 = vmul.f32 %v3889_v6, %v3311_v53 }
 0x335   : > { %v3350_v13 = vmul.f32 %v3889_v6, %v3312_v9  ;;  %v3351_v39 = vmul.f32 %v3889_v6, %v3313_v27  ;;  %v3352_v63 = vmul.f32 %v3889_v6, %v3314_v59  ;;  %v3353_v50 = vmul.f32 %v3889_v6, %v3315_v43 }
 0x336   : > { %v3360_v26 = vadd.f32 %v5964_v54, %v3322_v11  ;;  %v3361_v16 = vadd.f32 %v5964_v54, %v3323_v42  ;;  %v3362_v60 = vadd.f32 %v5964_v54, %v3324_v19  ;;  %v3363_v15 = vadd.f32 %v5964_v54, %v3325_v46 }
 0x337   : > { %v3364_v49 = vadd.f32 %v5964_v54, %v3326_v41  ;;  %v3365_v32 = vadd.f32 %v5964_v54, %v3327_v7  ;;  %v3366_v17 = vadd.f32 %v5964_v54, %v3328_v56  ;;  %v3367_v38 = vadd.f32 %v5964_v54, %v3329_v0 }
 0x338   : > { %v3368_v25 = vadd.f32 %v5964_v54, %v3330_v12  ;;  %v3369_v4 = vadd.f32 %v5964_v54, %v3331_v62  ;;  %v3370_v23 = vadd.f32 %v5964_v54, %v3332_v45  ;;  %v3371_v51 = vadd.f32 %v5964_v54, %v3333_v24  ;;  %3891 = vst.msk [vmem:[%s5728_s20 + $0x19] sm:$0xff] %vm2922_vm4, %v3360_v26 }
 0x339   : > { %3892 = vst.msk [vmem:[%s5728_s20 + $0x21] sm:$0xff] %vm2922_vm4, %v3361_v16  ;;  %3893 = vst.msk [vmem:[%s5728_s20 + $0x31] sm:$0xff] %vm2922_vm4, %v3362_v60  ;;  %v3372_v18 = vadd.f32 %v5964_v54, %v3334_v52  ;;  %v3373_v28 = vadd.f32 %v5964_v54, %v3335_v5  ;;  %v3374_v8 = vadd.f32 %v5964_v54, %v3336_v47 }
 0x33a   : > { %3894 = vst.msk [vmem:[%s5728_s20 + $0x39] sm:$0xff] %vm2922_vm4, %v3363_v15  ;;  %v3375_v55 = vadd.f32 %v5964_v54, %v3337_v3  ;;  %3895 = vst.msk [vmem:[%s5728_s20 + $0x49] sm:$0xff] %vm2922_vm4, %v3364_v49  ;;  %v3376_v1 = vadd.f32 %v5964_v54, %v3338_v31  ;;  %v3377_v48 = vadd.f32 %v5964_v54, %v3339_v57 }
 0x33b   : > { %3896 = vst.msk [vmem:[%s5728_s20 + $0x51] sm:$0xff] %vm2922_vm4, %v3365_v32  ;;  %3897 = vst.msk [vmem:[%s5728_s20 + $0x61] sm:$0xff] %vm2922_vm4, %v3366_v17  ;;  %v3378_v6 = vadd.f32 %v5964_v54, %v3340_v30  ;;  %v3379_v34 = vadd.f32 %v5964_v54, %v3341_v29  ;;  %v3380_v58 = vadd.f32 %v5964_v54, %v3342_v61 }
 0x33c   : > { %3898 = vst.msk [vmem:[%s5728_s20 + $0x69] sm:$0xff] %vm2922_vm4, %v3367_v38  ;;  %3899 = vst.msk [vmem:[%s5728_s20 + $0x79] sm:$0xff] %vm2922_vm4, %v3368_v25  ;;  %v3381_v35 = vadd.f32 %v5964_v54, %v3343_v33  ;;  %v3382_v36 = vadd.f32 %v5964_v54, %v3344_v21  ;;  %v3383_v2 = vadd.f32 %v5964_v54, %v3345_v10 }
 0x33d   : > { %3900 = vst.msk [vmem:[%s5728_s20 + $0x81] sm:$0xff] %vm2922_vm4, %v3369_v4  ;;  %3901 = vst.msk [vmem:[%s5728_s20 + $0x91] sm:$0xff] %vm2922_vm4, %v3370_v23  ;;  %v3384_v40 = vadd.f32 %v5964_v54, %v3346_v44  ;;  %v3385_v37 = vadd.f32 %v5964_v54, %v3347_v22  ;;  %v3386_v53 = vadd.f32 %v5964_v54, %v3348_v14 }
 0x33e   : > { %3902 = vst.msk [vmem:[%s5728_s20 + $0x99] sm:$0xff] %vm2922_vm4, %v3371_v51  ;;  %3903 = vst.msk [vmem:[%s5728_s20 + $0xa9] sm:$0xff] %vm2922_vm4, %v3372_v18  ;;  %v3387_v9 = vadd.f32 %v5964_v54, %v3349_v20  ;;  %v3388_v27 = vadd.f32 %v5964_v54, %v3350_v13  ;;  %v3389_v59 = vadd.f32 %v5964_v54, %v3351_v39 }
 0x33f   : > { %3904 = vst.msk [vmem:[%s5728_s20 + $0xb1] sm:$0xff] %vm2922_vm4, %v3373_v28  ;;  %3905 = vst.msk [vmem:[%s5728_s20 + $0xc1] sm:$0xff] %vm2922_vm4, %v3374_v8  ;;  %v3390_v43 = vadd.f32 %v5964_v54, %v3352_v63  ;;  %v3391_v11 = vadd.f32 %v5964_v54, %v3353_v50 }
 0x340   : > { %3906 = vst.msk [vmem:[%s5728_s20 + $0xc9] sm:$0xff] %vm2922_vm4, %v3375_v55  ;;  %3907 = vst.msk [vmem:[%s5728_s20 + $0xd9] sm:$0xff] %vm2922_vm4, %v3376_v1 }
 0x341   : > { %3908 = vst.msk [vmem:[%s5728_s20 + $0xe1] sm:$0xff] %vm2922_vm4, %v3377_v48  ;;  %3909 = vst.msk [vmem:[%s5728_s20 + $0xf1] sm:$0xff] %vm2922_vm4, %v3378_v6 }
 0x342   : > { %3910 = vst.msk [vmem:[%s5728_s20 + $0xf9] sm:$0xff] %vm2922_vm4, %v3379_v34  ;;  %3911 = vst.msk [vmem:[%s5728_s20 + $0x109] sm:$0xff] %vm2922_vm4, %v3380_v58 }
 0x343   : > { %3912 = vst.msk [vmem:[%s5728_s20 + $0x111] sm:$0xff] %vm2922_vm4, %v3381_v35  ;;  %3913 = vst.msk [vmem:[%s5728_s20 + $0x121] sm:$0xff] %vm2922_vm4, %v3382_v36 }
 0x344   : > { %3914 = vst.msk [vmem:[%s5728_s20 + $0x129] sm:$0xff] %vm2922_vm4, %v3383_v2  ;;  %3915 = vst.msk [vmem:[%s5728_s20 + $0x139] sm:$0xff] %vm2922_vm4, %v3384_v40 }
 0x345   : > { %3916 = vst.msk [vmem:[%s5728_s20 + $0x141] sm:$0xff] %vm2922_vm4, %v3385_v37  ;;  %3917 = vst.msk [vmem:[%s5728_s20 + $0x151] sm:$0xff] %vm2922_vm4, %v3386_v53 }
 0x346   : > { %3918 = vst.msk [vmem:[%s5728_s20 + $0x159] sm:$0xff] %vm2922_vm4, %v3387_v9  ;;  %3919 = vst.msk [vmem:[%s5728_s20 + $0x169] sm:$0xff] %vm2922_vm4, %v3388_v27 }
 0x347   : > { %3920 = vst.msk [vmem:[%s5728_s20 + $0x171] sm:$0xff] %vm2922_vm4, %v3389_v59  ;;  %3921 = vst.msk [vmem:[%s5728_s20 + $0x181] sm:$0xff] %vm2922_vm4, %v3390_v43 }
 0x348   : > { %3922 = vst.msk [vmem:[%s5728_s20 + $0x189] sm:$0xff] %vm2922_vm4, %v3391_v11 }
 0x349 PF: > { %s16_s21 = sadd.s32 1, %s4743_s21  }
 0x34a   : > { %p13_p4 = scmp.ge.s32.totalorder %s16_s21, 4  }
 0x34c   :  { %15 = sbr.rel (!%p13_p4) target bundleno = 1 (0x1), region = 85 }

// kernel: mnist_cnn_forward.3
= control target key start
LH: loop header
LB: loop body
LE: loop exit
PB: predicated region body
PF: predicated region fallthrough
CT: control target
= control target key end

     0   :  { %19 = vsyncpa [#allocation4], 0  ;;  %s9181_s0 = inlined_call_operand.vmem [shape: f32[2,9,9,256], index: 0, kind: input, shape index: {}]   ;;  %s9182_s1 = inlined_call_operand.vmem [shape: bf16[4,256,128], index: 1, kind: input, shape index: {}]   ;;  %s9183_s2 = inlined_call_operand.vmem [shape: f32[1,128], index: 2, kind: input, shape index: {}]   ;;  %s9184_s3 = inlined_call_operand.vmem [shape: f32[1,128], index: 3, kind: input, shape index: {}]   ;;  %s9185_s4 = inlined_call_operand.vmem [shape: f32[1,128], index: 4, kind: input, shape index: {}]   ;;  %s9186_s5 = inlined_call_operand.vmem [shape: bf16[9,128,128], index: 5, kind: input, shape index: {}]   ;;  %s9187_s6 = inlined_call_operand.vmem [shape: f32[1,128], index: 6, kind: input, shape index: {}]   ;;  %s9188_s7 = inlined_call_operand.vmem [shape: f32[1,128], index: 7, kind: input, shape index: {}]   ;;  %s9189_s8 = inlined_call_operand.vmem [shape: f32[1,128], index: 8, kind: input, shape index: {}]   ;;  %s9190_s9 = inlined_call_operand.vmem [shape: bf16[9,128,128], index: 9, kind: input, shape index: {}]   ;;  %s9191_s10 = inlined_call_operand.vmem [shape: f32[1,128], index: 10, kind: input, shape index: {}]   ;;  %s9192_s11 = inlined_call_operand.vmem [shape: f32[1,128], index: 11, kind: input, shape index: {}]   ;;  %s9193_s12 = inlined_call_operand.vmem [shape: f32[1,128], index: 12, kind: input, shape index: {}]   ;;  %s9194_s13 = inlined_call_operand.vmem [shape: f32[128,128], index: 13, kind: input, shape index: {}]   ;;  %s9195_s14 = inlined_call_operand.hbm [shape: f32[2,1,128], index: 14, kind: output, shape index: {}]  }
   0x1   :  { %21 = vsyncpa [#allocation4 + $0x1], 0  ;;  %s7570_s29 = smov 0   ;;  %s7572_s30 = smov 0  }
   0x2   :  { %s7574_s15 = smov 0   ;;  %s7576_s16 = smov 0  }
   0x3 LB: > { %9200 = sst [smem:[#allocation6_spill]] %s7485_s15  ;;  %s7591_s17 = sadd.s32 4294967295, %s7489_s16   ;;  %s7489_s16 = sphi %s7576_s16, %s9207_s16   ;;  %s7485_s15 = sphi %s7574_s15, %s9209_s15   ;;  %s7481_s30 = sphi %s7572_s30, %s9211_s30   ;;  %s7477_s29 = sphi %s7570_s29, %s9210_s29  }
   0x4   : > { %s5151_s18 = sadd.s32 4294967294, %s7489_s16   ;;  %s7595_s19 = sadd.s32 1, %s7489_s16  }
   0x5   : > { %9201 = sst [smem:[#allocation7_spill]] %s7595_s19  ;;  %s333_s20 = sadd.s32 1, %s7485_s15 }
   0x6   : > { %s330_s21 = ssub.s32 %s7489_s16, %s7595_s19  ;;  %p343_p0 = scmp.ne.s32.totalorder %s7485_s15, %s7481_s30 }
   0x7   : > { %p331_p1 = scmp.eq.s32.totalorder %s330_s21, 0  ;;  %p344_p2 = scmp.eq.s32.totalorder %s7591_s17, 1 }
   0x8   : > { %p349_p3 = scmp.ne.s32.totalorder %s7481_s30, %s7477_s29  ;;  %p350_p4 = scmp.eq.s32.totalorder %s5151_s18, 1 }
   0x9   : > { %s7606_s22 = scalar_select %p331_p1, %s7485_s15, %s333_s20  }
   0xa   : > { %p7608_p5 = por %p344_p2, %p343_p0  ;;  %p7612_p6 = por %p350_p4, %p349_p3 }
   0xb   : > { %9202 = sst [smem:[#allocation8_spill]] %s7606_s22  ;;  %p5154_p7 = scmp.ge.s32.totalorder %s7489_s16, 1 }
   0xc   : > { %s9204_s24 = scalar_select %p7612_p6, 1, 0 }
   0xd   : > { %p415_p8 = scmp.lt.s32.totalorder %s7489_s16, 3 }
   0xe   : > { %9205 = sst [smem:[#allocation9_spill]] %s9204_s24 }
   0xf   : > { %p416_p9 = pnand %p5154_p7, %p415_p8 }
  0x10   : > { %v7211_v0 = vld [vmem:[%s9182_s1 + $0xc0] sm:$0xff] (!%p416_p9)   ;;  %v7215_v4 = vld [vmem:[%s9182_s1 + $0xc8] sm:$0xff] (!%p416_p9)   ;;  %v7219_v8 = vld [vmem:[%s9182_s1 + $0xd0] sm:$0xff] (!%p416_p9)   ;;  %p460_p10 = scmp.lt.s32.totalorder (!%p416_p9), %s7591_s17, 1  ;;  %vm602_vm0 = vcmask (!%p416_p9), 1046528   ;;  %vm7492_vm1 = vmmov (!%p416_p9), 0  }
  0x11   : > { %419 = sbr.rel (%p416_p9) target bundleno = 2172 (0x87c), region = 76  ;;  %v7212_v1 = vld [vmem:[%s9182_s1 + $0x40] sm:$0xff] (!%p416_p9)   ;;  %5776 = vmatprep.subr.bf16.mxu0 (!%p416_p9), %v7211_v0  ;;  %v7216_v5 = vld [vmem:[%s9182_s1 + $0x48] sm:$0xff] (!%p416_p9)   ;;  %v7220_v9 = vld [vmem:[%s9182_s1 + $0x50] sm:$0xff] (!%p416_p9)   ;;  %s458_s19 = sand.u32 (!%p416_p9), 1, %s7481_s30  }
  0x12   : > { %v7213_v2 = vld [vmem:[%s9182_s1 + $0x80] sm:$0xff] (!%p416_p9)   ;;  %5816 = vmatprep.subr.bf16.mxu1 (!%p416_p9), %v7212_v1  ;;  %v7217_v6 = vld [vmem:[%s9182_s1 + $0x88] sm:$0xff] (!%p416_p9)   ;;  %v7221_v10 = vld [vmem:[%s9182_s1 + $0x90] sm:$0xff] (!%p416_p9)   ;;  %s5773_s25 = sshll.u32 (!%p416_p9), %s7591_s17, 4  ;;  %s459_s26 = scalar_lea.vmem (!%p416_p9), [#allocation3], %s458_s19 }
  0x13   : > { %v7214_v3 = vld [vmem:[%s9182_s1] sm:$0xff] (!%p416_p9)   ;;  %5777 = vmatpush3.bf16.msra.mxu0 (!%p416_p9), %v7213_v2  ;;  %v7218_v7 = vld [vmem:[%s9182_s1 + $0x8] sm:$0xff] (!%p416_p9)   ;;  %v7222_v11 = vld [vmem:[%s9182_s1 + $0x10] sm:$0xff] (!%p416_p9)   ;;  %s9139_s20 = scalar_lea.hbm (!%p416_p9), %s9195_s14, %s5773_s25  ;;  %s5084_s22 = scalar_lea.sflag (!%p416_p9), [#allocation4], %s458_s19 }
  0x14   : > { %5817 = vmatpush3.bf16.msra.mxu1 (!%p416_p9), %v7214_v3  ;;  %5778 = vmatprep.subr.bf16.mxu0 (!%p416_p9), %v7215_v4  ;;  %v7223_v12 = vld [vmem:[%s9182_s1 + $0xd8] sm:$0xff] (!%p416_p9)   ;;  %v7227_v16 = vld [vmem:[%s9182_s1 + $0xe0] sm:$0xff] (!%p416_p9)   ;;  %v7231_v20 = vld [vmem:[%s9182_s1 + $0xe8] sm:$0xff] (!%p416_p9)  }
  0x15   : > { %5818 = vmatprep.subr.bf16.mxu1 (!%p416_p9), %v7216_v5  ;;  %v7224_v13 = vld [vmem:[%s9182_s1 + $0x58] sm:$0xff] (!%p416_p9)   ;;  %v7228_v17 = vld [vmem:[%s9182_s1 + $0x60] sm:$0xff] (!%p416_p9)   ;;  %v7232_v21 = vld [vmem:[%s9182_s1 + $0x68] sm:$0xff] (!%p416_p9)  }
  0x16   : > { %v7225_v14 = vld [vmem:[%s9182_s1 + $0x98] sm:$0xff] (!%p416_p9)   ;;  %v7229_v18 = vld [vmem:[%s9182_s1 + $0xa0] sm:$0xff] (!%p416_p9)   ;;  %v7233_v22 = vld [vmem:[%s9182_s1 + $0xa8] sm:$0xff] (!%p416_p9)  }
  0x17   : > { %5779 = vmatpush3.bf16.msra.mxu0 (!%p416_p9), %v7217_v6  ;;  %v7226_v15 = vld [vmem:[%s9182_s1 + $0x18] sm:$0xff] (!%p416_p9)   ;;  %v7230_v19 = vld [vmem:[%s9182_s1 + $0x20] sm:$0xff] (!%p416_p9)   ;;  %v7234_v23 = vld [vmem:[%s9182_s1 + $0x28] sm:$0xff] (!%p416_p9)  }
  0x18   : > { %5819 = vmatpush3.bf16.msra.mxu1 %v7218_v7  ;;  %5780 = vmatprep.subr.bf16.mxu0 %v7219_v8  ;;  %s461_s18 = scalar_select %p460_p10, %s7591_s17, 1  ;;  %v7235_v24 = vld [vmem:[%s9182_s1 + $0xf0] sm:$0xff]   ;;  %v7239_v28 = vld [vmem:[%s9182_s1 + $0xf8] sm:$0xff]   ;;  %v7243_v58 = vld [vmem:[%s9182_s1 + $0x140] sm:$0xff]  }
  0x19   : > { %5820 = vmatprep.subr.bf16.mxu1 %v7220_v9  ;;  %v7236_v25 = vld [vmem:[%s9182_s1 + $0x70] sm:$0xff]   ;;  %v7240_v29 = vld [vmem:[%s9182_s1 + $0x78] sm:$0xff]   ;;  %v7244_v60 = vld [vmem:[%s9182_s1 + $0x1c0] sm:$0xff]   ;;  %s7494_s17 = smov [#allocation3]  }
  0x1a   : > { %s7168_s28 = smul.u32 288, %s461_s18  ;;  %v7237_v26 = vld [vmem:[%s9182_s1 + $0xb0] sm:$0xff]   ;;  %v7241_v30 = vld [vmem:[%s9182_s1 + $0xb8] sm:$0xff]   ;;  %v7245_v62 = vld [vmem:[%s9182_s1 + $0x100] sm:$0xff]   ;;  %s5096_s18 = sshll.u32 %s459_s26, 4  ;;  %s9141_s18 = int_to_ptr.vmem [resolvable:$true] %s5096_s18 }
  0x1b   : > { %5781 = vmatpush3.bf16.msra.mxu0 %v7221_v10  ;;  %v7238_v27 = vld [vmem:[%s9182_s1 + $0x30] sm:$0xff]   ;;  %v7242_v31 = vld [vmem:[%s9182_s1 + $0x38] sm:$0xff]   ;;  %v7246_v63 = vld [vmem:[%s9182_s1 + $0x180] sm:$0xff]   ;;  %s7427_s21 = scalar_lea.vmem %s9141_s18, 16  ;;  %s7431_s15 = sshll.u32 %s7494_s17, 4  ;;  %s7432_s15 = int_to_ptr.vmem [resolvable:$false] %s7431_s15 }
  0x1c   : > { %5821 = vmatpush3.bf16.msra.mxu1 %v7222_v11  ;;  %5782 = vmatprep.subr.bf16.mxu0 %v7223_v12  ;;  %s7713_s24 = scalar_lea.vmem %s9181_s0, %s7168_s28  ;;  %v7247_v0 = vld [vmem:[%s9182_s1 + $0x148] sm:$0xff]   ;;  %p7428_p11 = scmp.ne.s32.totalorder %s9141_s18, %s7427_s21 }
  0x1d   : > { %5822 = vmatprep.subr.bf16.mxu1 %v7224_v13  ;;  %v539_v32 = vld [vmem:[%s7713_s24 + $0x8] sm:$0xfe]  ;;  %v541_v33 = vld [vmem:[%s7713_s24 + $0x18] sm:$0x1]  ;;  %v538_v42 = vld [vmem:[%s7713_s24] sm:$0xfe]  ;;  %p7434_p0 = scmp.lt.s32.totalorder %s9141_s18, %s7432_s15 }
  0x1e   : > { %v543_v34 = vld [vmem:[%s7713_s24 + $0x28] sm:$0xfe]  ;;  %v545_v35 = vld [vmem:[%s7713_s24 + $0x38] sm:$0x1]  ;;  %v606_v36 = vrot.slane %v539_v32, 1  ;;  %v607_v37 = vrot.slane %v541_v33, 1  ;;  %p7429_p12 = pnand %p7428_p11, %p7608_p5 }
  0x1f   : > { %5783 = vmatpush3.bf16.msra.mxu0 %v7225_v14  ;;  %v612_v38 = vrot.slane %v543_v34, 1  ;;  %v483_v39 = vld [vmem:[%s7713_s24 + $0x8] sm:$0xff]  ;;  %v613_v40 = vrot.slane %v545_v35, 1  ;;  %v540_v43 = vld [vmem:[%s7713_s24 + $0x10] sm:$0x1]  ;;  %v603_v48 = vrot.slane %v538_v42, 1 }
  0x20   : > { %5823 = vmatpush3.bf16.msra.mxu1 %v7226_v15  ;;  %5784 = vmatprep.subr.bf16.mxu0 %v7227_v16  ;;  %v7727_v41 = vld [vmem:[%s7713_s24 + $0x28] sm:$0xff]  ;;  %v608_v44 = vsel %vm602_vm0, %v606_v36, %v607_v37  ;;  %v542_v46 = vld [vmem:[%s7713_s24 + $0x20] sm:$0xfe]  ;;  %v544_v47 = vld [vmem:[%s7713_s24 + $0x30] sm:$0x1]  ;;  %v604_v49 = vrot.slane %v540_v43, 1  ;;  %p7430_p13 = pneg %p7429_p12 }
  0x21   : > { %5824 = vmatprep.subr.bf16.mxu1 %v7228_v17  ;;  %v499_v45 = vpack.c.bf16 %v7727_v41, %v483_v39  ;;  %v614_v50 = vsel %vm602_vm0, %v612_v38, %v613_v40  ;;  %v609_v51 = vrot.slane %v542_v46, 1  ;;  %v610_v52 = vrot.slane %v544_v47, 1  ;;  %v482_v53 = vld [vmem:[%s7713_s24] sm:$0xff]  ;;  %v7248_v1 = vld [vmem:[%s9182_s1 + $0x1c8] sm:$0xff]   ;;  %v549_v5 = vld [vmem:[%s7713_s24 + $0x58] sm:$0x1] }
  0x22   : > { %v7738_v54 = vld [vmem:[%s7713_s24 + $0x20] sm:$0xff]  ;;  %v668_v55 = vpack.c.bf16 %v614_v50, %v608_v44  ;;  %v605_v56 = vsel %vm602_vm0, %v603_v48, %v604_v49  ;;  %v7249_v2 = vld [vmem:[%s9182_s1 + $0x108] sm:$0xff]   ;;  %v553_v7 = vld [vmem:[%s7713_s24 + $0x78] sm:$0x1]  ;;  %v619_v9 = vrot.slane %v549_v5, 1  ;;  %s7433_s28 = scalar_lea.vmem %s7432_s15, 32 }
  0x23   : > { %5785 = vmatpush3.bf16.msra.mxu0 %v7229_v18  ;;  %997 = vmatprep.mubr.bf16.mxu1 %v499_v45  ;;  %v498_v57 = vpack.c.bf16 %v7738_v54, %v482_v53  ;;  %v611_v59 = vsel %vm602_vm0, %v609_v51, %v610_v52  ;;  %v7250_v3 = vld [vmem:[%s9182_s1 + $0x188] sm:$0xff]   ;;  %v625_v11 = vrot.slane %v553_v7, 1  ;;  %v546_v15 = vld [vmem:[%s7713_s24 + $0x40] sm:$0xfe]  ;;  %v548_v16 = vld [vmem:[%s7713_s24 + $0x50] sm:$0x1]  ;;  %p7435_p1 = scmp.lt.s32.totalorder %s7433_s28, %s7427_s21 }
  0x24   : > { %5825 = vmatpush3.bf16.msra.mxu1 %v7230_v19  ;;  %5786 = vmatprep.subr.bf16.mxu0 %v7231_v20  ;;  %v667_v61 = vpack.c.bf16 %v611_v59, %v605_v56  ;;  %v547_v4 = vld [vmem:[%s7713_s24 + $0x48] sm:$0xfe]  ;;  %v550_v17 = vld [vmem:[%s7713_s24 + $0x60] sm:$0xfe]  ;;  %v552_v20 = vld [vmem:[%s7713_s24 + $0x70] sm:$0x1] }
  0x25   : > { %5826 = vmatprep.subr.bf16.mxu1 %v7232_v21  ;;  %836 = vmatprep.mubr.bf16.mxu0 %v668_v55  ;;  %v551_v6 = vld [vmem:[%s7713_s24 + $0x68] sm:$0xfe]  ;;  %v618_v8 = vrot.slane %v547_v4, 1  ;;  %v615_v21 = vrot.slane %v546_v15, 1  ;;  %v7252_v32 = vld [vmem:[%s9182_s1 + $0x1d0] sm:$0xff]   ;;  %v7255_v36 = vld [vmem:[%s9182_s1 + $0x158] sm:$0xff]   ;;  %p7436_p2 = por %p7435_p1, %p7434_p0 }
  0x26   : > { %v624_v10 = vrot.slane %v551_v6, 1  ;;  %v7772_v12 = vld [vmem:[%s7713_s24 + $0x48] sm:$0xff]  ;;  %v7253_v34 = vld [vmem:[%s9182_s1 + $0x110] sm:$0xff]   ;;  %v7256_v37 = vld [vmem:[%s9182_s1 + $0x1d8] sm:$0xff]  }
  0x27   : > { %5787 = vmatpush3.bf16.msra.mxu0 %v7233_v22  ;;  %v7775_v13 = vld [vmem:[%s7713_s24 + $0x68] sm:$0xff]  ;;  %v620_v18 = vsel %vm602_vm0, %v618_v8, %v619_v9  ;;  %v616_v22 = vrot.slane %v548_v16, 1  ;;  %v7254_v35 = vld [vmem:[%s9182_s1 + $0x190] sm:$0xff]   ;;  %v7257_v38 = vld [vmem:[%s9182_s1 + $0x118] sm:$0xff]   ;;  %p7437_p3 = pnand %p7436_p2, %p7430_p13 }
  0x28   : > { %5827 = vmatpush3.bf16.msra.mxu1 %v7234_v23  ;;  %5788 = vmatprep.subr.bf16.mxu0 %v7235_v24  ;;  %v501_v14 = vpack.c.bf16 %v7775_v13, %v7772_v12  ;;  %v626_v19 = vsel %vm602_vm0, %v624_v10, %v625_v11  ;;  %v7786_v23 = vld [vmem:[%s7713_s24 + $0x40] sm:$0xff]  ;;  %v7258_v39 = vld [vmem:[%s9182_s1 + $0x198] sm:$0xff]   ;;  %v555_v40 = vld [vmem:[%s7713_s24 + $0x88] sm:$0xfe] }
  0x29   : > { %5828 = vmatprep.subr.bf16.mxu1 %v7236_v25  ;;  %v7789_v24 = vld [vmem:[%s7713_s24 + $0x60] sm:$0xff]  ;;  %v670_v25 = vpack.c.bf16 %v626_v19, %v620_v18  ;;  %v557_v42 = vld [vmem:[%s7713_s24 + $0x98] sm:$0x1]  ;;  %v559_v43 = vld [vmem:[%s7713_s24 + $0xa8] sm:$0xfe]  ;;  %v630_v45 = vrot.slane %v555_v40, 1 }
  0x2a   : > { %v561_v44 = vld [vmem:[%s7713_s24 + $0xb8] sm:$0x1]  ;;  %v631_v46 = vrot.slane %v557_v42, 1  ;;  %v636_v47 = vrot.slane %v559_v43, 1  ;;  %v7824_v49 = vld [vmem:[%s7713_s24 + $0x88] sm:$0xff]  ;;  %v7260_v4 = vld [vmem:[%s9182_s1 + $0x1e0] sm:$0xff]  }
  0x2b   : > { %5789 = vmatpush3.bf16.msra.mxu0 %v7237_v26  ;;  %v621_v26 = vrot.slane %v550_v17, 1  ;;  %v637_v48 = vrot.slane %v561_v44, 1  ;;  %v7827_v50 = vld [vmem:[%s7713_s24 + $0xa8] sm:$0xff]  ;;  %v554_v51 = vld [vmem:[%s7713_s24 + $0x80] sm:$0xfe] }
  0x2c   : > { %5829 = vmatpush3.bf16.msra.mxu1 %v7238_v27  ;;  %5790 = vmatprep.subr.bf16.mxu0 %v7239_v28  ;;  %v622_v27 = vrot.slane %v552_v20, 1  ;;  %v500_v28 = vpack.c.bf16 %v7789_v24, %v7786_v23  ;;  %v632_v52 = vsel %vm602_vm0, %v630_v45, %v631_v46  ;;  %v503_v53 = vpack.c.bf16 %v7827_v50, %v7824_v49  ;;  %v556_v55 = vld [vmem:[%s7713_s24 + $0x90] sm:$0x1]  ;;  %v558_v56 = vld [vmem:[%s7713_s24 + $0xa0] sm:$0xfe]  ;;  %v7263_v10 = vld [vmem:[%s9182_s1 + $0x168] sm:$0xff]  }
  0x2d   : > { %5830 = vmatprep.subr.bf16.mxu1 %v7240_v29  ;;  %v617_v29 = vsel %vm602_vm0, %v615_v21, %v616_v22  ;;  %v627_v59 = vrot.slane %v554_v51, 1  ;;  %v7261_v7 = vld [vmem:[%s9182_s1 + $0x120] sm:$0xff]   ;;  %v7264_v11 = vld [vmem:[%s9182_s1 + $0x1e8] sm:$0xff]   ;;  %v565_v17 = vld [vmem:[%s7713_s24 + $0xd8] sm:$0x1] }
  0x2e   : > { %v7262_v9 = vld [vmem:[%s9182_s1 + $0x1a0] sm:$0xff]   ;;  %v7266_v15 = vld [vmem:[%s9182_s1 + $0x1a8] sm:$0xff]   ;;  %v569_v19 = vld [vmem:[%s7713_s24 + $0xf8] sm:$0x1]  ;;  %v643_v21 = vrot.slane %v565_v17, 1 }
  0x2f   : > { %5791 = vmatpush3.bf16.msra.mxu0 %v7241_v30  ;;  %v7251_v30 = vld [vmem:[%s9182_s1 + $0x150] sm:$0xff]   ;;  %v563_v16 = vld [vmem:[%s7713_s24 + $0xc8] sm:$0xfe] }
  0x30   : > { %5831 = vmatpush3.bf16.msra.mxu1 %v7242_v31  ;;  %5856 = vmatprep.subr.bf16.mxu0 %v7243_v58  ;;  %v623_v31 = vsel %vm602_vm0, %v621_v26, %v622_v27  ;;  %v638_v58 = vsel %vm602_vm0, %v636_v47, %v637_v48  ;;  %v567_v18 = vld [vmem:[%s7713_s24 + $0xe8] sm:$0xfe]  ;;  %v642_v20 = vrot.slane %v563_v16, 1  ;;  %v7267_v45 = vld [vmem:[%s9182_s1 + $0x170] sm:$0xff]   ;;  %v5295_v16 = vld [vmem:[%s7713_s24 + $0x78] sm:$0x1] }
  0x31   : > { %5896 = vmatprep.subr.bf16.mxu1 %v7244_v60  ;;  %v669_v33 = vpack.c.bf16 %v623_v31, %v617_v29  ;;  %v628_v60 = vrot.slane %v556_v55, 1  ;;  %v648_v22 = vrot.slane %v567_v18, 1  ;;  %v7876_v26 = vld [vmem:[%s7713_s24 + $0xc8] sm:$0xff]  ;;  %v562_v29 = vld [vmem:[%s7713_s24 + $0xc0] sm:$0xfe]  ;;  %v7268_v47 = vld [vmem:[%s9182_s1 + $0x1f0] sm:$0xff]  }
  0x32   : > { %837 = vmatmul.mubr.bf16.vlgmr.msra.gmra.mrb[0].mxu0 %v667_v61  ;;  %v633_v61 = vrot.slane %v558_v56, 1  ;;  %v7879_v27 = vld [vmem:[%s7713_s24 + $0xe8] sm:$0xff]  ;;  %v566_v31 = vld [vmem:[%s7713_s24 + $0xe0] sm:$0xfe]  ;;  %v7269_v51 = vld [vmem:[%s9182_s1 + $0x130] sm:$0xff]  }
  0x33   : > { %998 = vmatmul.mubr.bf16.vlgmr.msra.gmra.mrb[0].mxu1 %v498_v57  ;;  %5857 = vmatpush3.bf16.msra.mxu0 %v7245_v62  ;;  %v560_v57 = vld [vmem:[%s7713_s24 + $0xb0] sm:$0x1]  ;;  %v7838_v62 = vld [vmem:[%s7713_s24 + $0x80] sm:$0xff]  ;;  %v629_v5 = vsel %vm602_vm0, %v627_v59, %v628_v60  ;;  %v645_v40 = vrot.slane %v566_v31, 1  ;;  %v7271_v55 = vld [vmem:[%s9182_s1 + $0x178] sm:$0xff]  }
  0x34   : > { %5897 = vmatpush3.bf16.msra.mxu1 %v7246_v63  ;;  %5858 = vmatprep.subr.bf16.mxu0 %v7247_v0  ;;  %v7841_v63 = vld [vmem:[%s7713_s24 + $0xa0] sm:$0xff]  ;;  %v7272_v56 = vld [vmem:[%s9182_s1 + $0x1f8] sm:$0xff]   ;;  %v5289_v59 = vld [vmem:[%s7713_s24 + $0x48] sm:$0xfe] }
  0x35   : > { %5898 = vmatprep.subr.bf16.mxu1 %v7248_v1  ;;  %1005 = vmatprep.mubr.bf16.mxu1 %v501_v14  ;;  %v7259_v0 = vld [vmem:[%s9182_s1 + $0x160] sm:$0xff]   ;;  %v672_v1 = vpack.c.bf16 %v638_v58, %v632_v52  ;;  %v7265_v14 = vld [vmem:[%s9182_s1 + $0x128] sm:$0xff]   ;;  %v1048_v52 = vpack.c.bf16 %v7772_v12, %v7727_v41  ;;  %v7273_v41 = vld [vmem:[%s9182_s1 + $0x138] sm:$0xff]  }
  0x36   : > { %844 = vmatprep.mubr.bf16.mxu0 %v670_v25  ;;  %v649_v25 = vrot.slane %v569_v19, 1  ;;  %v7274_v12 = vld [vmem:[%s9182_s1 + $0x1b8] sm:$0xff]  }
  0x37   : > { %5859 = vmatpush3.bf16.msra.mxu0 %v7249_v2  ;;  %v634_v2 = vrot.slane %v560_v57, 1  ;;  %v5285_v57 = vld [vmem:[%s7713_s24 + $0x28] sm:$0xfe]  ;;  %v5287_v58 = vld [vmem:[%s7713_s24 + $0x38] sm:$0x1] }
  0x38   : > { %5899 = vmatpush3.bf16.msra.mxu1 %v7250_v3  ;;  %5860 = vmatprep.subr.bf16.mxu0 %v7251_v30  ;;  %v502_v3 = vpack.c.bf16 %v7841_v63, %v7838_v62  ;;  %v564_v30 = vld [vmem:[%s7713_s24 + $0xd0] sm:$0x1]  ;;  %v5291_v60 = vld [vmem:[%s7713_s24 + $0x58] sm:$0x1] }
  0x39   : > { %5900 = vmatprep.subr.bf16.mxu1 %v7252_v32  ;;  %v635_v6 = vsel %vm602_vm0, %v633_v61, %v634_v2  ;;  %v644_v32 = vsel %vm602_vm0, %v642_v20, %v643_v21  ;;  %v1324_v61 = vrot.slane %v5285_v57, 1  ;;  %v1330_v2 = vrot.slane %v5289_v59, 1  ;;  %v5299_v18 = vld [vmem:[%s7713_s24 + $0x98] sm:$0x1] }
  0x3a   : > { %845 = vmatmul.mubr.bf16.gmra.mrb[4].mxu0 %v669_v33  ;;  %v671_v8 = vpack.c.bf16 %v635_v6, %v629_v5  ;;  %v650_v33 = vsel %vm602_vm0, %v648_v22, %v649_v25  ;;  %v5286_v5 = vld [vmem:[%s7713_s24 + $0x30] sm:$0x1]  ;;  %v1050_v6 = vpack.c.bf16 %v7824_v49, %v7775_v13  ;;  %v5297_v49 = vld [vmem:[%s7713_s24 + $0x88] sm:$0xfe]  ;;  %v1337_v20 = vrot.slane %v5295_v16, 1 }
  0x3b   : > { %1006 = vmatmul.mubr.bf16.gmra.mrb[4].mxu1 %v500_v28  ;;  %5861 = vmatpush3.bf16.msra.mxu0 %v7253_v34  ;;  %v505_v28 = vpack.c.bf16 %v7879_v27, %v7876_v26  ;;  %v568_v34 = vld [vmem:[%s7713_s24 + $0xf0] sm:$0x1]  ;;  %v1342_v22 = vrot.slane %v5297_v49, 1  ;;  %v1343_v25 = vrot.slane %v5299_v18, 1 }
  0x3c   : > { %5901 = vmatpush3.bf16.msra.mxu1 %v7254_v35  ;;  %5862 = vmatprep.subr.bf16.mxu0 %v7255_v36  ;;  %v639_v35 = vrot.slane %v562_v29, 1  ;;  %v640_v36 = vrot.slane %v564_v30, 1  ;;  %v646_v42 = vrot.slane %v568_v34, 1  ;;  %v5294_v29 = vld [vmem:[%s7713_s24 + $0x70] sm:$0x1] }
  0x3d   : > { %5902 = vmatprep.subr.bf16.mxu1 %v7256_v37  ;;  %1013 = vmatprep.mubr.bf16.mxu1 %v503_v53  ;;  %v7890_v37 = vld [vmem:[%s7713_s24 + $0xc0] sm:$0xff]  ;;  %v7270_v53 = vld [vmem:[%s9182_s1 + $0x1b0] sm:$0xff]  }
  0x3e   : > { %852 = vmatprep.mubr.bf16.mxu0 %v672_v1  ;;  %v641_v44 = vsel %vm602_vm0, %v639_v35, %v640_v36  ;;  %v647_v46 = vsel %vm602_vm0, %v645_v40, %v646_v42  ;;  %v1047_v1 = vpack.c.bf16 %v7786_v23, %v7738_v54  ;;  %v1334_v35 = vrot.slane %v5294_v29, 1 }
  0x3f   : > { %5863 = vmatpush3.bf16.msra.mxu0 %v7257_v38  ;;  %v7893_v38 = vld [vmem:[%s7713_s24 + $0xe0] sm:$0xff]  ;;  %v673_v48 = vpack.c.bf16 %v647_v46, %v641_v44  ;;  %v1344_v36 = vsel %vm602_vm0, %v1342_v22, %v1343_v25  ;;  %v5303_v44 = vld [vmem:[%s7713_s24 + $0xb8] sm:$0x1]  ;;  %v1052_v46 = vpack.c.bf16 %v7876_v26, %v7827_v50  ;;  %v5306_v26 = vld [vmem:[%s7713_s24 + $0xd0] sm:$0x1] }
  0x40   : > { %5903 = vmatpush3.bf16.msra.mxu1 %v7258_v39  ;;  %5864 = vmatprep.subr.bf16.mxu0 %v7259_v0  ;;  %v674_v39 = vpack.c.bf16 %v650_v33, %v644_v32  ;;  %v504_v43 = vpack.c.bf16 %v7893_v38, %v7890_v37  ;;  %v1325_v0 = vrot.slane %v5287_v58, 1  ;;  %v5296_v32 = vld [vmem:[%s7713_s24 + $0x80] sm:$0xfe]  ;;  %v5298_v33 = vld [vmem:[%s7713_s24 + $0x90] sm:$0x1] }
  0x41   : > { %5904 = vmatprep.subr.bf16.mxu1 %v7260_v4  ;;  %v5284_v4 = vld [vmem:[%s7713_s24 + $0x20] sm:$0xfe]  ;;  %v1339_v40 = vrot.slane %v5296_v32, 1  ;;  %v1340_v42 = vrot.slane %v5298_v33, 1  ;;  %v467_v32 = vld [vmem:[%s9194_s13 + $0x8] sm:$0xff] }
  0x42   : > { %853 = vmatmul.mubr.bf16.gmra.mrb[8].mxu0 %v671_v8  ;;  %v5288_v8 = vld [vmem:[%s7713_s24 + $0x40] sm:$0xfe] }
  0x43   : > { %1014 = vmatmul.mubr.bf16.gmra.mrb[8].mxu1 %v502_v3  ;;  %5865 = vmatpush3.bf16.msra.mxu0 %v7261_v7  ;;  %v1331_v3 = vrot.slane %v5291_v60, 1  ;;  %v1326_v7 = vsel %vm602_vm0, %v1324_v61, %v1325_v0  ;;  %v1327_v23 = vrot.slane %v5288_v8, 1  ;;  %v5304_v50 = vld [vmem:[%s7713_s24 + $0xc0] sm:$0xfe]  ;;  %v5309_v61 = vld [vmem:[%s7713_s24 + $0xe8] sm:$0xfe] }
  0x44   : > { %5905 = vmatpush3.bf16.msra.mxu1 %v7262_v9  ;;  %5866 = vmatprep.subr.bf16.mxu0 %v7263_v10  ;;  %v5290_v9 = vld [vmem:[%s7713_s24 + $0x50] sm:$0x1]  ;;  %v1321_v10 = vrot.slane %v5284_v4, 1  ;;  %v1351_v60 = vrot.slane %v5304_v50, 1  ;;  %v5234_v25 = vld [vmem:[%s7713_s24 + $0x100] sm:$0xff] }
  0x45   : > { %5906 = vmatprep.subr.bf16.mxu1 %v7264_v11  ;;  %1021 = vmatprep.mubr.bf16.mxu1 %v505_v28  ;;  %v1322_v11 = vrot.slane %v5286_v5, 1  ;;  %v1332_v54 = vsel %vm602_vm0, %v1330_v2, %v1331_v3  ;;  %v5292_v28 = vld [vmem:[%s7713_s24 + $0x60] sm:$0xfe]  ;;  %v5313_v2 = vld [vmem:[%s7713_s24 + $0x108] sm:$0xfe]  ;;  %v1352_v5 = vrot.slane %v5306_v26, 1 }
  0x46   : > { %860 = vmatprep.mubr.bf16.mxu0 %v674_v39  ;;  %v1386_v17 = vpack.c.bf16 %v1332_v54, %v1326_v7  ;;  %v1333_v34 = vrot.slane %v5292_v28, 1  ;;  %v1049_v39 = vpack.c.bf16 %v7838_v62, %v7789_v24  ;;  %v1341_v62 = vsel %vm602_vm0, %v1339_v40, %v1340_v42  ;;  %v5315_v3 = vld [vmem:[%s7713_s24 + $0x118] sm:$0x1]  ;;  %v5310_v54 = vld [vmem:[%s7713_s24 + $0xf0] sm:$0x1]  ;;  %v471_v40 = vld [vmem:[%s9194_s13 + $0x28] sm:$0xff] }
  0x47   : > { %5867 = vmatpush3.bf16.msra.mxu0 %v7265_v14  ;;  %v1328_v14 = vrot.slane %v5290_v9, 1  ;;  %v1323_v13 = vsel %vm602_vm0, %v1321_v10, %v1322_v11  ;;  %v1360_v7 = vrot.slane %v5309_v61, 1  ;;  %v5308_v9 = vld [vmem:[%s7713_s24 + $0xe0] sm:$0xfe]  ;;  %v1366_v10 = vrot.slane %v5313_v2, 1 }
  0x48   : > { %5907 = vmatpush3.bf16.msra.mxu1 %v7266_v15  ;;  %5868 = vmatprep.subr.bf16.mxu0 %v7267_v45  ;;  %v5293_v15 = vld [vmem:[%s7713_s24 + $0x68] sm:$0xfe]  ;;  %v1335_v24 = vsel %vm602_vm0, %v1333_v34, %v1334_v35  ;;  %v1367_v11 = vrot.slane %v5315_v3, 1  ;;  %v1358_v16 = vrot.slane %v5310_v54, 1  ;;  %v7491_v34 = vmov 0.0|0.0   ;;  %v469_v35 = vld [vmem:[%s9194_s13 + $0x18] sm:$0xff] }
  0x49   : > { %5908 = vmatprep.subr.bf16.mxu1 %v7268_v47  ;;  %v1336_v19 = vrot.slane %v5293_v15, 1  ;;  %v1329_v21 = vsel %vm602_vm0, %v1327_v23, %v1328_v14  ;;  %v5305_v47 = vld [vmem:[%s7713_s24 + $0xc8] sm:$0xfe]  ;;  %v1387_v0 = vpack.c.bf16 %v1341_v62, %v1335_v24  ;;  %v5312_v23 = vld [vmem:[%s7713_s24 + $0x100] sm:$0xfe]  ;;  %v1357_v15 = vrot.slane %v5308_v9, 1 }
  0x4a   : > { %861 = vmatmul.mubr.bf16.gmra.mrb[12].mxu0 %v673_v48  ;;  %v1385_v30 = vpack.c.bf16 %v1329_v21, %v1323_v13  ;;  %v5307_v48 = vld [vmem:[%s7713_s24 + $0xd8] sm:$0x1]  ;;  %v5314_v14 = vld [vmem:[%s7713_s24 + $0x110] sm:$0x1]  ;;  %v1363_v13 = vrot.slane %v5312_v23, 1  ;;  %v1368_v22 = vsel %vm602_vm0, %v1366_v10, %v1367_v11  ;;  %v478_v62 = vld [vmem:[%s9194_s13 + $0x60] sm:$0xff] }
  0x4b   : > { %1022 = vmatmul.mubr.bf16.gmra.mrb[12].mxu1 %v504_v43  ;;  %5869 = vmatpush3.bf16.msra.mxu0 %v7269_v51  ;;  %v1338_v31 = vsel %vm602_vm0, %v1336_v19, %v1337_v20  ;;  %v5301_v43 = vld [vmem:[%s7713_s24 + $0xa8] sm:$0xfe]  ;;  %v1364_v49 = vrot.slane %v5314_v14, 1  ;;  %v1353_v19 = vsel %vm602_vm0, %v1351_v60, %v1352_v5 }
  0x4c   : > { %5909 = vmatpush3.bf16.msra.mxu1 %v7270_v53  ;;  %5870 = vmatprep.subr.bf16.mxu0 %v7271_v55  ;;  %v1388_v45 = vpack.c.bf16 %v1344_v36, %v1338_v31  ;;  %v1348_v51 = vrot.slane %v5301_v43, 1  ;;  %v1354_v53 = vrot.slane %v5305_v47, 1  ;;  %v1355_v55 = vrot.slane %v5307_v48, 1  ;;  %v472_v43 = vld [vmem:[%s9194_s13 + $0x30] sm:$0xff]  ;;  %v475_v47 = vld [vmem:[%s9194_s13 + $0x48] sm:$0xff] }
  0x4d   : > { %1216 = vmatprep.mubr.bf16.mxu0 %v1048_v52  ;;  %5910 = vmatprep.subr.bf16.mxu1 %v7272_v56  ;;  %v1349_v52 = vrot.slane %v5303_v44, 1  ;;  %v5300_v56 = vld [vmem:[%s7713_s24 + $0xa0] sm:$0xfe]  ;;  %v473_v44 = vld [vmem:[%s9194_s13 + $0x38] sm:$0xff] }
  0x4e   : > { %1554 = vmatprep.mubr.bf16.mxu1 %v1386_v17  ;;  %v1356_v57 = vsel %vm602_vm0, %v1354_v53, %v1355_v55  ;;  %v1345_v58 = vrot.slane %v5300_v56, 1  ;;  %v1051_v17 = vpack.c.bf16 %v7890_v37, %v7841_v63  ;;  %v1053_v63 = vpack.c.bf16 %v5234_v25, %v7893_v38  ;;  %v468_v38 = vld [vmem:[%s9194_s13 + $0x10] sm:$0xff]  ;;  %v479_v53 = vld [vmem:[%s9194_s13 + $0x68] sm:$0xff] }
  0x4f   : > { %5871 = vmatpush3.bf16.msra.mxu0 %v7273_v41  ;;  %v5302_v41 = vld [vmem:[%s7713_s24 + $0xb0] sm:$0x1]  ;;  %v1359_v37 = vsel %vm602_vm0, %v1357_v15, %v1358_v16  ;;  %v8007_v36 = vpack.c.bf16 %v469_v35, %v468_v38  ;;  %v8067_v55 = vpack.c.bf16 %v479_v53, %v478_v62 }
  0x50   : > { %5911 = vmatpush3.bf16.msra.mxu1 %v7274_v12  ;;  %v1350_v12 = vsel %vm602_vm0, %v1348_v51, %v1349_v52  ;;  %v1346_v59 = vrot.slane %v5302_v41, 1  ;;  %6896 = vmatprep.subr.bf16.mxu0 %v7491_v34  ;;  %v476_v51 = vld [vmem:[%s9194_s13 + $0x50] sm:$0xff]  ;;  %v477_v52 = vld [vmem:[%s9194_s13 + $0x58] sm:$0xff] }
  0x51   : > { %v1390_v4 = vpack.c.bf16 %v1356_v57, %v1350_v12  ;;  %6920 = vmatprep.subr.bf16.mxu1 %v7491_v34  ;;  %v8055_v24 = vpack.c.bf16 %v477_v52, %v476_v51  ;;  %v480_v56 = vld [vmem:[%s9194_s13 + $0x70] sm:$0xff]  ;;  %v481_v41 = vld [vmem:[%s9194_s13 + $0x78] sm:$0xff]  ;;  %v7493_v12 = vmov 0.0  }
  0x52   : > { %1217 = vmatmul.mubr.bf16.vlgmr.msra.gmra.mrb[16].mxu0 %v1047_v1  ;;  %v5311_v1 = vld [vmem:[%s7713_s24 + $0xf8] sm:$0x1]  ;;  %v1347_v18 = vsel %vm602_vm0, %v1345_v58, %v1346_v59  ;;  %1851 = vst [vmem:[#allocation2] sm:$0xff] %v7493_v12  ;;  %1852 = vst [vmem:[#allocation2 + $0x8] sm:$0x3] %v7493_v12  ;;  %v8101_v50 = vpack.c.bf16 %v481_v41, %v480_v56 }
  0x53   : > { %1224 = vmatprep.mubr.bf16.mxu0 %v1050_v6  ;;  %1555 = vmatmul.mubr.bf16.vlgmr.msra.gmra.mrb[16].mxu1 %v1385_v30  ;;  %v5235_v6 = vld [vmem:[%s7713_s24 + $0x108] sm:$0xff]  ;;  %v1361_v8 = vrot.slane %v5311_v1, 1  ;;  %v1389_v28 = vpack.c.bf16 %v1353_v19, %v1347_v18  ;;  %v1365_v30 = vsel %vm602_vm0, %v1363_v13, %v1364_v49  ;;  %1853 = vst [vmem:[#allocation2 + $0x10] sm:$0xff] %v7493_v12  ;;  %1854 = vst [vmem:[#allocation2 + $0x18] sm:$0x3] %v7493_v12 }
  0x54   : > { %1562 = vmatprep.mubr.bf16.mxu1 %v1388_v45  ;;  %v1054_v20 = vpack.c.bf16 %v5235_v6, %v7879_v27  ;;  %v1391_v31 = vpack.c.bf16 %v1365_v30, %v1359_v37  ;;  %v466_v27 = vld [vmem:[%s9194_s13] sm:$0xff]  ;;  %v8031_v45 = vpack.c.bf16 %v473_v44, %v472_v43  ;;  %1855 = vst [vmem:[#allocation2 + $0x20] sm:$0xff] %v7493_v12  ;;  %1856 = vst [vmem:[#allocation2 + $0x28] sm:$0x3] %v7493_v12 }
  0x55   : > { %v1362_v21 = vsel %vm602_vm0, %v1360_v7, %v1361_v8  ;;  %v7993_v33 = vpack.c.bf16 %v467_v32, %v466_v27  ;;  %1857 = vst [vmem:[#allocation2 + $0x30] sm:$0xff] %v7493_v12  ;;  %1858 = vst [vmem:[#allocation2 + $0x38] sm:$0x3] %v7493_v12 }
  0x56   : > { %v1392_v29 = vpack.c.bf16 %v1368_v22, %v1362_v21  ;;  %1859 = vst [vmem:[#allocation2 + $0x40] sm:$0xff] %v7493_v12  ;;  %1860 = vst [vmem:[#allocation2 + $0x48] sm:$0x3] %v7493_v12 }
  0x57   : > { %6898 = vmatpush3.bf16.msra.mxu0 %v7993_v33  ;;  %6922 = vmatpush3.bf16.msra.mxu1 %v7993_v33  ;;  %1861 = vst [vmem:[#allocation2 + $0x50] sm:$0xff] %v7493_v12  ;;  %1862 = vst [vmem:[#allocation2 + $0x58] sm:$0x3] %v7493_v12 }
  0x58   : > { %6899 = vmatprep.subr.bf16.mxu0 %v7491_v34  ;;  %6923 = vmatprep.subr.bf16.mxu1 %v7491_v34  ;;  %1863 = vst [vmem:[#allocation2 + $0x60] sm:$0xff] %v7493_v12  ;;  %1864 = vst [vmem:[#allocation2 + $0x68] sm:$0x3] %v7493_v12 }
  0x59   : > { %1865 = vst [vmem:[#allocation2 + $0x70] sm:$0xff] %v7493_v12  ;;  %1866 = vst [vmem:[#allocation2 + $0x78] sm:$0x3] %v7493_v12 }
  0x5a   : > { %1225 = vmatmul.mubr.bf16.gmra.mrb[20].mxu0 %v1049_v39  ;;  %v470_v39 = vld [vmem:[%s9194_s13 + $0x20] sm:$0xff]  ;;  %1867 = vst [vmem:[#allocation2 + $0x80] sm:$0xff] %v7493_v12  ;;  %1868 = vst [vmem:[#allocation2 + $0x88] sm:$0x3] %v7493_v12 }
  0x5b   : > { %1232 = vmatprep.mubr.bf16.mxu0 %v1052_v46  ;;  %1563 = vmatmul.mubr.bf16.gmra.mrb[20].mxu1 %v1387_v0  ;;  %v8019_v42 = vpack.c.bf16 %v471_v40, %v470_v39  ;;  %v474_v46 = vld [vmem:[%s9194_s13 + $0x40] sm:$0xff]  ;;  %1869 = vst [vmem:[#allocation2 + $0x90] sm:$0xff] %v7493_v12  ;;  %1870 = vst [vmem:[#allocation2 + $0x98] sm:$0x3] %v7493_v12 }
  0x5c   : > { %1570 = vmatprep.mubr.bf16.mxu1 %v1390_v4  ;;  %6901 = vmatpush3.bf16.msra.mxu0 %v8007_v36  ;;  %v8043_v48 = vpack.c.bf16 %v475_v47, %v474_v46 }
  0x5d   : > { %6925 = vmatpush3.bf16.msra.mxu1 %v8007_v36  ;;  %6902 = vmatprep.subr.bf16.mxu0 %v7491_v34 }
  0x5e   : > { %6926 = vmatprep.subr.bf16.mxu1 %v7491_v34 }
  0x60   : > { %6904 = vmatpush3.bf16.msra.mxu0 %v8019_v42 }
  0x61   : > { %6928 = vmatpush3.bf16.msra.mxu1 %v8019_v42  ;;  %6905 = vmatprep.subr.bf16.mxu0 %v7491_v34 }
  0x62   : > { %1233 = vmatmul.mubr.bf16.gmra.mrb[24].mxu0 %v1051_v17  ;;  %6929 = vmatprep.subr.bf16.mxu1 %v7491_v34 }
  0x63   : > { %1240 = vmatprep.mubr.bf16.mxu0 %v1054_v20  ;;  %1571 = vmatmul.mubr.bf16.gmra.mrb[24].mxu1 %v1389_v28 }
  0x64   : > { %1578 = vmatprep.mubr.bf16.mxu1 %v1392_v29  ;;  %6907 = vmatpush3.bf16.msra.mxu0 %v8031_v45 }
  0x65   : > { %6931 = vmatpush3.bf16.msra.mxu1 %v8031_v45  ;;  %6908 = vmatprep.subr.bf16.mxu0 %v7491_v34 }
  0x66   : > { %6932 = vmatprep.subr.bf16.mxu1 %v7491_v34 }
  0x68   : > { %6910 = vmatpush3.bf16.msra.mxu0 %v8043_v48 }
  0x69   : > { %6934 = vmatpush3.bf16.msra.mxu1 %v8043_v48  ;;  %6911 = vmatprep.subr.bf16.mxu0 %v7491_v34 }
  0x6a   : > { %1241 = vmatmul.mubr.bf16.gmra.mrb[28].mxu0 %v1053_v63  ;;  %6935 = vmatprep.subr.bf16.mxu1 %v7491_v34 }
  0x6b   : > { %1579 = vmatmul.mubr.bf16.gmra.mrb[28].mxu1 %v1391_v31  ;;  %6286 = vmatprep.mubr.msk.f32.mxu0 %vm7492_vm1, %v7493_v12 }
  0x6c   : > { %6913 = vmatpush3.bf16.msra.mxu0 %v8055_v24  ;;  %6321 = vmatprep.mubr.msk.f32.mxu1 %vm7492_vm1, %v7493_v12 }
  0x6d   : > { %6937 = vmatpush3.bf16.msra.mxu1 %v8055_v24  ;;  %6914 = vmatprep.subr.bf16.mxu0 %v7491_v34 }
  0x6e   : > { %6938 = vmatprep.subr.bf16.mxu1 %v7491_v34 }
  0x70   : > { %6916 = vmatpush3.bf16.msra.mxu0 %v8067_v55 }
  0x71   : > { %6940 = vmatpush3.bf16.msra.mxu1 %v8067_v55  ;;  %6917 = vmatprep.subr.bf16.mxu0 %v7491_v34 }
  0x72   : > { %6941 = vmatprep.subr.bf16.mxu1 %v7491_v34 }
  0x74   : > { %6919 = vmatpush3.bf16.msra.mxu0 %v8101_v50 }
  0x75   : > { %6943 = vmatpush3.bf16.msra.mxu1 %v8101_v50 }
  0x76   : > { %6944 = vmatprep.subr.bf16.mxu1 %v7491_v34 }
 0x105   : > { %v5792_v58 = vpop.f32.mrb[0].mxu0 }
 0x106   : > { %v5832_v26 = vpop.f32.mrb[0].mxu1  ;;  %v5793_v61 = vpop.f32.mrb[1].mxu0 }
 0x107   : > { %v5833_v57 = vpop.f32.mrb[1].mxu1  ;;  %v5794_v1 = vadd.f32 %v5793_v61, %v5792_v58  ;;  %v5795_v2 = vpop.f32.mrb[2].mxu0 }
 0x108   : > { %v5834_v59 = vadd.f32 %v5833_v57, %v5832_v26  ;;  %v5835_v60 = vpop.f32.mrb[2].mxu1  ;;  %v5796_v4 = vpop.f32.mrb[3].mxu0 }
 0x109   : > { %v5836_v0 = vpop.f32.mrb[3].mxu1  ;;  %v5797_v6 = vadd.f32 %v5796_v4, %v5795_v2 }
 0x10a   : > { %v5837_v3 = vadd.f32 %v5836_v0, %v5835_v60  ;;  %v1000_v5 = vadd.f32 %v5834_v59, %v5794_v1 }
 0x10c   : > { %v1003_v7 = vadd.f32 %v5837_v3, %v5797_v6 }
 0x10d   : > { %v5798_v54 = vpop.f32.mrb[4].mxu0 }
 0x10e   : > { %v5838_v8 = vpop.f32.mrb[4].mxu1  ;;  %v5799_v14 = vpop.f32.mrb[5].mxu0 }
 0x10f   : > { %v5839_v9 = vpop.f32.mrb[5].mxu1  ;;  %v5800_v16 = vadd.f32 %v5799_v14, %v5798_v54  ;;  %v5801_v17 = vpop.f32.mrb[6].mxu0 }
 0x110   : > { %v5840_v10 = vadd.f32 %v5839_v9, %v5838_v8  ;;  %v5841_v11 = vpop.f32.mrb[6].mxu1  ;;  %v5802_v13 = vpop.f32.mrb[7].mxu0 }
 0x111   : > { %v5842_v23 = vpop.f32.mrb[7].mxu1  ;;  %v5803_v18 = vadd.f32 %v5802_v13, %v5801_v17 }
 0x112   : > { %v5843_v15 = vadd.f32 %v5842_v23, %v5841_v11  ;;  %v1008_v49 = vadd.f32 %v5840_v10, %v5800_v16 }
 0x114   : > { %v1011_v19 = vadd.f32 %v5843_v15, %v5803_v18  ;;  %v8119_v18 = vld [vmem:[%s9183_s2] ss:$0 sm:$0xff] }
 0x115   : > { %v5804_v28 = vpop.f32.mrb[8].mxu0 }
 0x116   : > { %v5844_v20 = vpop.f32.mrb[8].mxu1  ;;  %v5805_v63 = vpop.f32.mrb[9].mxu0 }
 0x117   : > { %v5845_v21 = vpop.f32.mrb[9].mxu1  ;;  %v5806_v30 = vadd.f32 %v5805_v63, %v5804_v28  ;;  %v5807_v31 = vpop.f32.mrb[10].mxu0 }
 0x118   : > { %v5846_v22 = vadd.f32 %v5845_v21, %v5844_v20  ;;  %v5847_v25 = vpop.f32.mrb[10].mxu1  ;;  %v5808_v27 = vpop.f32.mrb[11].mxu0 }
 0x119   : > { %v5848_v29 = vpop.f32.mrb[11].mxu1  ;;  %v5809_v38 = vadd.f32 %v5808_v27, %v5807_v31 }
 0x11a   : > { %v5849_v37 = vadd.f32 %v5848_v29, %v5847_v25  ;;  %v8108_v32 = vadd.f32 %v5846_v22, %v5806_v30 }
 0x11c   : > { %v8110_v35 = vadd.f32 %v5849_v37, %v5809_v38 }
 0x11d   : > { %v5810_v46 = vpop.f32.mrb[12].mxu0 }
 0x11e   : > { %v5850_v39 = vpop.f32.mrb[12].mxu1  ;;  %v5811_v51 = vpop.f32.mrb[13].mxu0 }
 0x11f   : > { %v5851_v40 = vpop.f32.mrb[13].mxu1  ;;  %v5812_v62 = vadd.f32 %v5811_v51, %v5810_v46  ;;  %v5813_v53 = vpop.f32.mrb[14].mxu0 }
 0x120   : > { %v5852_v43 = vadd.f32 %v5851_v40, %v5850_v39  ;;  %v5853_v44 = vpop.f32.mrb[14].mxu1  ;;  %v5814_v56 = vpop.f32.mrb[15].mxu0 }
 0x121   : > { %v5854_v47 = vpop.f32.mrb[15].mxu1  ;;  %v5815_v26 = vadd.f32 %v5814_v56, %v5813_v53 }
 0x122   : > { %v5855_v52 = vadd.f32 %v5854_v47, %v5853_v44  ;;  %v8112_v41 = vadd.f32 %v5852_v43, %v5812_v62 }
 0x124   : > { %v8114_v57 = vadd.f32 %v5855_v52, %v5815_v26 }
 0x125   : > { %v5872_v58 = vpop.f32.mrb[16].mxu0 }
 0x126   : > { %v5873_v59 = vpop.f32.mrb[17].mxu0  ;;  %v5912_v1 = vpop.f32.mrb[16].mxu1 }
 0x127   : > { %v5874_v60 = vadd.f32 %v5873_v59, %v5872_v58  ;;  %v5875_v61 = vpop.f32.mrb[18].mxu0  ;;  %v5913_v4 = vpop.f32.mrb[17].mxu1 }
 0x128   : > { %v5876_v0 = vpop.f32.mrb[19].mxu0  ;;  %v5914_v6 = vadd.f32 %v5913_v4, %v5912_v1  ;;  %v5915_v8 = vpop.f32.mrb[18].mxu1 }
 0x129   : > { %v1249_v2 = vadd.f32 %v5874_v60, %v1000_v5  ;;  %v5877_v3 = vadd.f32 %v5876_v0, %v5875_v61  ;;  %v5916_v10 = vpop.f32.mrb[19].mxu1 }
 0x12a   : > { %v5917_v54 = vadd.f32 %v5916_v10, %v5915_v8 }
 0x12b   : > { %v1250_v9 = vadd.f32 %v5877_v3, %v1003_v7  ;;  %v1587_v11 = vadd.f32 %v5914_v6, %v1249_v2 }
 0x12d   : > { %v5878_v23 = vpop.f32.mrb[20].mxu0  ;;  %v1588_v15 = vadd.f32 %v5917_v54, %v1250_v9  ;;  %v1602_v63 = vadd.f32 %v8119_v18, %v1587_v11 }
 0x12e   : > { %v5879_v14 = vpop.f32.mrb[21].mxu0  ;;  %v5918_v5 = vpop.f32.mrb[20].mxu1 }
 0x12f   : > { %v5880_v16 = vadd.f32 %v5879_v14, %v5878_v23  ;;  %v5881_v17 = vpop.f32.mrb[22].mxu0  ;;  %v1603_v22 = vadd.f32 %v8119_v18, %v1588_v15  ;;  %v5919_v7 = vpop.f32.mrb[21].mxu1  ;;  %v8126_v46 = vmax.f32 %v1602_v63, 0.0 }
 0x130   : > { %v5882_v13 = vpop.f32.mrb[23].mxu0  ;;  %v5920_v25 = vadd.f32 %v5919_v7, %v5918_v5  ;;  %v5921_v28 = vpop.f32.mrb[22].mxu1 }
 0x131   : > { %v1251_v20 = vadd.f32 %v5880_v16, %v1008_v49  ;;  %v5883_v21 = vadd.f32 %v5882_v13, %v5881_v17  ;;  %v5922_v37 = vpop.f32.mrb[23].mxu1  ;;  %v8123_v38 = vmax.f32 %v1603_v22, 0.0  ;;  %v1633_v60 = vmul.f32 %v8126_v46, %v8126_v46 }
 0x132   : > { %v5923_v31 = vadd.f32 %v5922_v37, %v5921_v28 }
 0x133   : > { %v1252_v29 = vadd.f32 %v5883_v21, %v1011_v19  ;;  %v1589_v30 = vadd.f32 %v5920_v25, %v1251_v20  ;;  %v1634_v56 = vmul.f32 %v8123_v38, %v8123_v38  ;;  %v1620_v2 = vadd.f32 %v8123_v38, %v8126_v46 }
 0x135   : > { %v5884_v27 = vpop.f32.mrb[24].mxu0  ;;  %v1604_v40 = vadd.f32 %v8119_v18, %v1589_v30  ;;  %v1590_v43 = vadd.f32 %v5923_v31, %v1252_v29  ;;  %v1641_v6 = vadd.f32 %v1634_v56, %v1633_v60 }
 0x136   : > { %v5885_v39 = vpop.f32.mrb[25].mxu0  ;;  %v5924_v52 = vpop.f32.mrb[24].mxu1 }
 0x137   : > { %v5886_v49 = vadd.f32 %v5885_v39, %v5884_v27  ;;  %v5887_v44 = vpop.f32.mrb[26].mxu0  ;;  %v8128_v51 = vmax.f32 %v1604_v40, 0.0  ;;  %v1605_v19 = vadd.f32 %v8119_v18, %v1590_v43  ;;  %v5925_v26 = vpop.f32.mrb[25].mxu1 }
 0x138   : > { %v5888_v47 = vpop.f32.mrb[27].mxu0  ;;  %v5926_v58 = vadd.f32 %v5925_v26, %v5924_v52  ;;  %v5927_v59 = vpop.f32.mrb[26].mxu1 }
 0x139   : > { %v1253_v62 = vadd.f32 %v5886_v49, %v8108_v32  ;;  %v5889_v53 = vadd.f32 %v5888_v47, %v5887_v44  ;;  %v1635_v61 = vmul.f32 %v8128_v51, %v8128_v51  ;;  %v5928_v1 = vpop.f32.mrb[27].mxu1  ;;  %v8141_v32 = vmax.f32 %v1605_v19, 0.0 }
 0x13a   : > { %v5929_v8 = vadd.f32 %v5928_v1, %v5927_v59  ;;  %v1621_v10 = vadd.f32 %v1620_v2, %v8128_v51 }
 0x13b   : > { %v1254_v0 = vadd.f32 %v5889_v53, %v8110_v35  ;;  %v1591_v3 = vadd.f32 %v5926_v58, %v1253_v62  ;;  %v1642_v14 = vadd.f32 %v1641_v6, %v1635_v61  ;;  %v1636_v16 = vmul.f32 %v8141_v32, %v8141_v32 }
 0x13c   : > { %v1622_v7 = vadd.f32 %v1621_v10, %v8141_v32 }
 0x13d   : > { %v5890_v4 = vpop.f32.mrb[28].mxu0  ;;  %v1606_v11 = vadd.f32 %v8119_v18, %v1591_v3  ;;  %v1592_v15 = vadd.f32 %v5929_v8, %v1254_v0  ;;  %v1643_v31 = vadd.f32 %v1642_v14, %v1636_v16  ;;  %v7277_v14 = vld [vmem:[%s9186_s5 + $0x50] sm:$0xff]   ;;  %v7280_v16 = vld [vmem:[%s9186_s5 + $0x68] sm:$0xff]  }
 0x13e   : > { %v5891_v9 = vpop.f32.mrb[29].mxu0  ;;  %v5930_v13 = vpop.f32.mrb[28].mxu1 }
 0x13f   : > { %v5892_v54 = vadd.f32 %v5891_v9, %v5890_v4  ;;  %v5893_v23 = vpop.f32.mrb[30].mxu0  ;;  %v8147_v17 = vmax.f32 %v1606_v11, 0.0  ;;  %v1607_v21 = vadd.f32 %v8119_v18, %v1592_v15  ;;  %v5931_v22 = vpop.f32.mrb[29].mxu1  ;;  %v7278_v15 = vld [vmem:[%s9186_s5 + $0x58] sm:$0xff]  }
 0x140   : > { %v5894_v35 = vpop.f32.mrb[31].mxu0  ;;  %v5932_v28 = vadd.f32 %v5931_v22, %v5930_v13  ;;  %v5933_v29 = vpop.f32.mrb[30].mxu1  ;;  %v7281_v13 = vld [vmem:[%s9186_s5 + $0x70] sm:$0xff]  }
 0x141   : > { %v1255_v5 = vadd.f32 %v5892_v54, %v8112_v41  ;;  %v5895_v20 = vadd.f32 %v5894_v35, %v5893_v23  ;;  %v1637_v25 = vmul.f32 %v8147_v17, %v8147_v17  ;;  %v8155_v37 = vmax.f32 %v1607_v21, 0.0  ;;  %v5934_v30 = vpop.f32.mrb[31].mxu1  ;;  %v7275_v54 = vld [vmem:[%s9186_s5 + $0x40] sm:$0xff]   ;;  %v7276_v23 = vld [vmem:[%s9186_s5 + $0x48] sm:$0xff]  }
 0x142   : > { %v1623_v27 = vadd.f32 %v1622_v7, %v8147_v17  ;;  %v5935_v39 = vadd.f32 %v5934_v30, %v5933_v29  ;;  %6324 = vmatprep.subr.bf16.mxu0 %v7275_v54  ;;  %v7279_v35 = vld [vmem:[%s9186_s5 + $0x60] sm:$0xff]   ;;  %v1799_v29 = vlaneseq }
 0x143   : > { %v1256_v63 = vadd.f32 %v5895_v20, %v8114_v57  ;;  %v1593_v41 = vadd.f32 %v5932_v28, %v1255_v5  ;;  %v1644_v40 = vadd.f32 %v1643_v31, %v1637_v25  ;;  %v1638_v43 = vmul.f32 %v8155_v37, %v8155_v37  ;;  %v7282_v5 = vld [vmem:[%s9186_s5 + $0x78] sm:$0xff]   ;;  %v8218_v20 = vld [vmem:[%s9186_s5] sm:$0xff]  }
 0x144   : > { %v1624_v47 = vadd.f32 %v1623_v27, %v8155_v37  ;;  %v1800_v31 = vshrl.u32 %v1799_v29, 7  ;;  %v7285_v29 = vld [vmem:[%s9186_s5 + $0x10] sm:$0xff]  }
 0x145   : > { %v1608_v49 = vadd.f32 %v8119_v18, %v1593_v41  ;;  %v1594_v44 = vadd.f32 %v5935_v39, %v1256_v63  ;;  %v1645_v52 = vadd.f32 %v1644_v40, %v1638_v43 }
 0x146   : > { %v8221_v41 = vsub.s32 0, %v1800_v31 }
 0x147   : > { %v8162_v19 = vmax.f32 %v1608_v49, 0.0  ;;  %v1609_v57 = vadd.f32 %v8119_v18, %v1594_v44 }
 0x149   : > { %v1625_v62 = vadd.f32 %v1624_v47, %v8162_v19  ;;  %v1639_v53 = vmul.f32 %v8162_v19, %v8162_v19  ;;  %v8168_v56 = vmax.f32 %v1609_v57, 0.0 }
 0x14b   : > { %v1646_v26 = vadd.f32 %v1645_v52, %v1639_v53  ;;  %v1626_v58 = vadd.f32 %v1625_v62, %v8168_v56  ;;  %v1640_v59 = vmul.f32 %v8168_v56, %v8168_v56 }
 0x14d   : > { %v1627_v60 = vrot.slane %v1626_v58, 4  ;;  %v1647_v61 = vadd.f32 %v1646_v26, %v1640_v59 }
 0x14f   : > { %v1628_v0 = vadd.f32 %v1627_v60, %v1626_v58  ;;  %v1648_v1 = vrot.slane %v1647_v61, 4 }
 0x151   : > { %v1629_v2 = vrot.slane %v1628_v0, 2  ;;  %v1649_v18 = vadd.f32 %v1648_v1, %v1647_v61 }
 0x153   : > { %v1630_v3 = vadd.f32 %v1629_v2, %v1628_v0  ;;  %v1650_v4 = vrot.slane %v1649_v18, 2  ;;  %v1908_v2 = vld [vmem:[#allocation2 + $0x1] sm:$0xff] }
 0x155   : > { %v1631_v6 = vrot.slane %v1630_v3, 1  ;;  %v1651_v8 = vadd.f32 %v1650_v4, %v1649_v18 }
 0x157   : > { %v1632_v9 = vadd.f32 %v1631_v6, %v1630_v3  ;;  %v1652_v10 = vrot.slane %v1651_v8, 1 }
 0x159   : > { %6287 = vmatmul.mubr.f32.vlgmr.msra.gmra.mrb[32].mxu0 %v1632_v9  ;;  %v1653_v11 = vadd.f32 %v1652_v10, %v1651_v8 }
 0x15a   : > { %6325 = vmatpush3.bf16.msra.mxu0 %v7275_v54 }
 0x15b   : > { %6322 = vmatmul.mubr.f32.vlgmr.msra.gmra.mrb[32].mxu1 %v1653_v11  ;;  %6326 = vmatprep.subr.bf16.mxu0 %v7276_v23 }
 0x15c   : > { %6946 = vmatpush3.bf16.msra.mxu1 %v7993_v33  ;;  %6572 = vmatprep.mubr.msk.f32.mxu1 %vm7492_vm1, %v7493_v12 }
 0x15d   : > { %6947 = vmatprep.subr.bf16.mxu1 %v7491_v34 }
 0x15e   : > { %6327 = vmatpush3.bf16.msra.mxu0 %v7276_v23 }
 0x15f   : > { %6328 = vmatprep.subr.bf16.mxu0 %v7277_v14 }
 0x160   : > { %6949 = vmatpush3.bf16.msra.mxu1 %v8007_v36 }
 0x161   : > { %6950 = vmatprep.subr.bf16.mxu1 %v7491_v34 }
 0x162   : > { %6329 = vmatpush3.bf16.msra.mxu0 %v7277_v14 }
 0x163   : > { %6330 = vmatprep.subr.bf16.mxu0 %v7278_v15 }
 0x164   : > { %6952 = vmatpush3.bf16.msra.mxu1 %v8019_v42 }
 0x165   : > { %6953 = vmatprep.subr.bf16.mxu1 %v7491_v34 }
 0x166   : > { %6331 = vmatpush3.bf16.msra.mxu0 %v7278_v15 }
 0x167   : > { %6332 = vmatprep.subr.bf16.mxu0 %v7279_v35 }
 0x168   : > { %6955 = vmatpush3.bf16.msra.mxu1 %v8031_v45 }
 0x169   : > { %6956 = vmatprep.subr.bf16.mxu1 %v7491_v34 }
 0x16a   : > { %6333 = vmatpush3.bf16.msra.mxu0 %v7279_v35 }
 0x16b   : > { %6334 = vmatprep.subr.bf16.mxu0 %v7280_v16 }
 0x16c   : > { %6958 = vmatpush3.bf16.msra.mxu1 %v8043_v48 }
 0x16d   : > { %6959 = vmatprep.subr.bf16.mxu1 %v7491_v34 }
 0x16e   : > { %6335 = vmatpush3.bf16.msra.mxu0 %v7280_v16 }
 0x16f   : > { %6336 = vmatprep.subr.bf16.mxu0 %v7281_v13 }
 0x170   : > { %6961 = vmatpush3.bf16.msra.mxu1 %v8055_v24 }
 0x171   : > { %6962 = vmatprep.subr.bf16.mxu1 %v7491_v34 }
 0x172   : > { %6337 = vmatpush3.bf16.msra.mxu0 %v7281_v13 }
 0x173   : > { %6338 = vmatprep.subr.bf16.mxu0 %v7282_v5 }
 0x174   : > { %6964 = vmatpush3.bf16.msra.mxu1 %v8067_v55 }
 0x175   : > { %6965 = vmatprep.subr.bf16.mxu1 %v7491_v34 }
 0x176   : > { %6339 = vmatpush3.bf16.msra.mxu0 %v7282_v5 }
 0x177   : > { %6348 = vmatprep.subr.bf16.mxu0 %v8218_v20 }
 0x178   : > { %6967 = vmatpush3.bf16.msra.mxu1 %v8101_v50 }
 0x179   : > { %6968 = vmatprep.subr.bf16.mxu1 %v7491_v34 }
 0x22c   : > { %v1720_v21 = vpop.f32.mrb[32].mxu0 }
 0x22d   : > { %v1794_v22 = vmul.f32 %v1720_v21, %v1720_v21  ;;  %v6288_v7 = vpop.f32.mrb[33].mxu0  ;;  %v1802_v39 = vrot.slane %v1720_v21, %v8221_v41 }
 0x22e   : > { %v1790_v25 = vpop.f32.mrb[32].mxu1 }
 0x22f   : > { %v6323_v28 = vpop.f32.mrb[33].mxu1  ;;  %v1795_v63 = vsub.f32 %v1790_v25, %v1794_v22  ;;  %v1803_v43 = vsub.f32 %v8126_v46, %v1802_v39  ;;  %v1804_v49 = vsub.f32 %v8123_v38, %v1802_v39  ;;  %v1805_v44 = vsub.f32 %v8128_v51, %v1802_v39  ;;  %v5365_v46 = vld [vmem:[%s9184_s3] ss:$0 sm:$0xff]  ;;  %v7284_v22 = vld [vmem:[%s9186_s5 + $0x8] sm:$0xff]  }
 0x230   : > { %v1806_v47 = vsub.f32 %v8141_v32, %v1802_v39  ;;  %v1807_v52 = vsub.f32 %v8147_v17, %v1802_v39  ;;  %v1808_v62 = vsub.f32 %v8155_v37, %v1802_v39  ;;  %v1809_v53 = vsub.f32 %v8162_v19, %v1802_v39  ;;  %v5366_v17 = vld [vmem:[%s9185_s4] ss:$0 sm:$0xff] }
 0x231   : > { %v1796_v30 = vmax.f32 %v1795_v63, 0.0  ;;  %v1810_v26 = vsub.f32 %v8168_v56, %v1802_v39  ;;  %v7290_v39 = vld [vmem:[%s9186_s5 + $0x38] sm:$0xff]  }
 0x233   : > { %v1797_v27 = vadd.f32 1e-05, %v1796_v30  ;;  %v7286_v30 = vld [vmem:[%s9186_s5 + $0x18] sm:$0xff]  }
 0x235   : > { %7419 = vrsqrt.f32 %v1797_v27  ;;  %v7288_v27 = vld [vmem:[%s9186_s5 + $0x28] sm:$0xff]  }
 0x23f   : > { %v7420_v40 = vpop.eup %7419 }
 0x240   : > { %v1814_v57 = vrot.slane %v7420_v40, %v8221_v41  ;;  %v7291_v40 = vld [vmem:[%s9186_s5 + $0x80] sm:$0xff]  }
 0x242   : > { %v1815_v58 = vmul.f32 %v1814_v57, %v1803_v43  ;;  %v1816_v38 = vmul.f32 %v1814_v57, %v1804_v49  ;;  %v1817_v59 = vmul.f32 %v1814_v57, %v1805_v44  ;;  %v1818_v51 = vmul.f32 %v1814_v57, %v1806_v47 }
 0x243   : > { %v1819_v60 = vmul.f32 %v1814_v57, %v1807_v52  ;;  %v1820_v32 = vmul.f32 %v1814_v57, %v1808_v62  ;;  %v1821_v61 = vmul.f32 %v1814_v57, %v1809_v53  ;;  %v1822_v0 = vmul.f32 %v1814_v57, %v1810_v26  ;;  %v7292_v52 = vld [vmem:[%s9186_s5 + $0x88] sm:$0xff]   ;;  %v7293_v53 = vld [vmem:[%s9186_s5 + $0x90] sm:$0xff]  }
 0x244   : > { %v1829_v37 = vmul.f32 %v5365_v46, %v1815_v58  ;;  %v1830_v19 = vmul.f32 %v5365_v46, %v1816_v38  ;;  %v1831_v1 = vmul.f32 %v5365_v46, %v1817_v59  ;;  %v1832_v56 = vmul.f32 %v5365_v46, %v1818_v51  ;;  %v2163_v58 = vld [vmem:[#allocation2 + $0x2] sm:$0xff]  ;;  %v7294_v51 = vld [vmem:[%s9186_s5 + $0x98] sm:$0xff]  }
 0x245   : > { %v1833_v18 = vmul.f32 %v5365_v46, %v1819_v60  ;;  %v1834_v3 = vmul.f32 %v5365_v46, %v1820_v32  ;;  %v1835_v4 = vmul.f32 %v5365_v46, %v1821_v61  ;;  %v1836_v6 = vmul.f32 %v5365_v46, %v1822_v0  ;;  %v7295_v32 = vld [vmem:[%s9186_s5 + $0xa0] sm:$0xff]   ;;  %v7296_v61 = vld [vmem:[%s9186_s5 + $0xa8] sm:$0xff]   ;;  %v7297_v0 = vld [vmem:[%s9186_s5 + $0xb0] sm:$0xff]  }
 0x246   : > { %v8239_v8 = vadd.f32 %v5366_v17, %v1829_v37  ;;  %v8241_v9 = vadd.f32 %v5366_v17, %v1830_v19  ;;  %v8243_v10 = vadd.f32 %v5366_v17, %v1831_v1  ;;  %v8245_v11 = vadd.f32 %v5366_v17, %v1832_v56  ;;  %v7299_v37 = vld [vmem:[%s9186_s5 + $0xc0] sm:$0xff]  }
 0x247   : > { %v8247_v54 = vadd.f32 %v5366_v17, %v1833_v18  ;;  %v8249_v23 = vadd.f32 %v5366_v17, %v1834_v3  ;;  %v8251_v14 = vadd.f32 %v5366_v17, %v1835_v4  ;;  %v8253_v15 = vadd.f32 %v5366_v17, %v1836_v6  ;;  %v7298_v17 = vld [vmem:[%s9186_s5 + $0xb8] sm:$0xff]   ;;  %v7300_v3 = vld [vmem:[%s9186_s5 + $0xc8] sm:$0xff]   ;;  %v7301_v6 = vld [vmem:[%s9186_s5 + $0xd0] sm:$0xff]  }
 0x248   : > { %1872 = vst [vmem:[#allocation2 + $0x11] sm:$0xff] %v8239_v8  ;;  %v1916_v35 = vpack.c.bf16 %v8239_v8, %v1908_v2  ;;  %1873 = vst [vmem:[#allocation2 + $0x21] sm:$0xff] %v8241_v9  ;;  %v8261_v16 = vpack.c.bf16 %v8243_v10, %v8241_v9  ;;  %v2471_v13 = vpack.c.bf16 %v8241_v9, %v8239_v8  ;;  %v7314_v8 = vld [vmem:[%s9186_s5 + $0x138] sm:$0xff]   ;;  %v7315_v9 = vld [vmem:[%s9186_s5 + $0x140] sm:$0xff]  }
 0x249   : > { %1874 = vst [vmem:[#allocation2 + $0x31] sm:$0xff] %v8243_v10  ;;  %1875 = vst [vmem:[#allocation2 + $0x41] sm:$0xff] %v8245_v11  ;;  %v2472_v5 = vpack.c.bf16 %v8245_v11, %v8243_v10  ;;  %v8271_v21 = vpack.c.bf16 %v8247_v54, %v8245_v11  ;;  %v8280_v7 = vpack.c.bf16 %v8251_v14, %v8249_v23  ;;  %v7319_v11 = vld [vmem:[%s9186_s5 + $0x160] sm:$0xff]  }
 0x24a   : > { %1876 = vst [vmem:[#allocation2 + $0x51] sm:$0xff] %v8247_v54  ;;  %1877 = vst [vmem:[#allocation2 + $0x61] sm:$0xff] %v8249_v23  ;;  %v2473_v25 = vpack.c.bf16 %v8249_v23, %v8247_v54  ;;  %v2474_v28 = vpack.c.bf16 %v8253_v15, %v8251_v14  ;;  %6340 = vmatprep.mubr.bf16.mxu0 %v1916_v35  ;;  %v7320_v54 = vld [vmem:[%s9186_s5 + $0x168] sm:$0xff]   ;;  %v7321_v23 = vld [vmem:[%s9186_s5 + $0x170] sm:$0xff]  }
 0x24b   : > { %1878 = vst [vmem:[#allocation2 + $0x71] sm:$0xff] %v8251_v14  ;;  %1879 = vst [vmem:[#allocation2 + $0x81] sm:$0xff] %v8253_v15  ;;  %6341 = vmatmul.mubr.bf16.vlgmr.msra.gmra.mrb[36].mxu0 %v8261_v16  ;;  %v7322_v14 = vld [vmem:[%s9186_s5 + $0x178] sm:$0xff]  }
 0x24c   : > { %6349 = vmatpush3.bf16.msra.mxu0 %v8218_v20  ;;  %6344 = vmatprep.mubr.bf16.mxu0 %v8271_v21  ;;  %v7287_v20 = vld [vmem:[%s9186_s5 + $0x20] sm:$0xff]  }
 0x24d   : > { %6350 = vmatprep.subr.bf16.mxu0 %v7284_v22 }
 0x24f   : > { %v8293_v63 = vld [vmem:[#allocation2 + $0x10] sm:$0xff]  ;;  %v8316_v43 = vld [vmem:[#allocation2 + $0x20] sm:$0xff] }
 0x250   : > { %6351 = vmatpush3.bf16.msra.mxu0 %v7284_v22  ;;  %v1888_v31 = vpack.c.bf16 %v8293_v63, %v7493_v12  ;;  %v7289_v12 = vld [vmem:[%s9186_s5 + $0x30] sm:$0xff]   ;;  %v8320_v44 = vld [vmem:[#allocation2 + $0x40] sm:$0xff] }
 0x251   : > { %6352 = vmatprep.subr.bf16.mxu0 %v7285_v29  ;;  %v8318_v49 = vld [vmem:[#allocation2 + $0x30] sm:$0xff]  ;;  %v8340_v26 = vld [vmem:[#allocation2 + $0x60] sm:$0xff] }
 0x252   : > { %v8322_v47 = vld [vmem:[#allocation2 + $0x50] sm:$0xff]  ;;  %v8326_v57 = vpack.c.bf16 %v8318_v49, %v8316_v43  ;;  %v8370_v19 = vld [vmem:[#allocation2 + $0x22] sm:$0xff] }
 0x253   : > { %6345 = vmatmul.mubr.bf16.gmra.mrb[40].mxu0 %v8280_v7  ;;  %v8333_v62 = vpack.c.bf16 %v8322_v47, %v8320_v44  ;;  %v8342_v46 = vld [vmem:[#allocation2 + $0x70] sm:$0xff]  ;;  %v8374_v56 = vld [vmem:[#allocation2 + $0x42] sm:$0xff] }
 0x254   : > { %6353 = vmatpush3.bf16.msra.mxu0 %v7285_v29  ;;  %6364 = vmatprep.mubr.bf16.mxu0 %v1888_v31  ;;  %v8344_v38 = vld [vmem:[#allocation2 + $0x12] sm:$0xff]  ;;  %v8348_v59 = vpack.c.bf16 %v8342_v46, %v8340_v26  ;;  %v8394_v35 = vld [vmem:[#allocation2 + $0x62] sm:$0xff]  ;;  %v2321_v31 = vpack.c.bf16 %v8316_v43, %v8293_v63 }
 0x255   : > { %6354 = vmatprep.subr.bf16.mxu0 %v7286_v30  ;;  %v2171_v60 = vpack.c.bf16 %v8344_v38, %v2163_v58  ;;  %v8372_v1 = vld [vmem:[#allocation2 + $0x32] sm:$0xff]  ;;  %v7308_v43 = vld [vmem:[%s9186_s5 + $0x108] sm:$0xff]   ;;  %v8433_v58 = vld [vmem:[#allocation2 + $0x80] sm:$0xff]  ;;  %v2621_v10 = vpack.c.bf16 %v8370_v19, %v8344_v38 }
 0x256   : > { %v8376_v2 = vld [vmem:[#allocation2 + $0x52] sm:$0xff]  ;;  %v8380_v18 = vpack.c.bf16 %v8372_v1, %v8370_v19  ;;  %v7328_v19 = vld [vmem:[%s9186_s5 + $0x1a8] sm:$0xff]  }
 0x257   : > { %v8387_v4 = vpack.c.bf16 %v8376_v2, %v8374_v56  ;;  %v8396_v22 = vld [vmem:[#allocation2 + $0x72] sm:$0xff]  ;;  %v2623_v38 = vpack.c.bf16 %v8394_v35, %v8376_v2  ;;  %v7332_v2 = vld [vmem:[%s9186_s5 + $0x1c8] sm:$0xff]  }
 0x258   : > { %6355 = vmatpush3.bf16.msra.mxu0 %v7286_v30  ;;  %v8400_v29 = vpack.c.bf16 %v8396_v22, %v8394_v35  ;;  %v7302_v30 = vld [vmem:[%s9186_s5 + $0xd8] sm:$0xff]   ;;  %v7305_v63 = vld [vmem:[%s9186_s5 + $0xf0] sm:$0xff]  }
 0x259   : > { %6356 = vmatprep.subr.bf16.mxu0 %v7287_v20 }
 0x25c   : > { %6357 = vmatpush3.bf16.msra.mxu0 %v7287_v20  ;;  %v7303_v20 = vld [vmem:[%s9186_s5 + $0xe0] sm:$0xff]  }
 0x25d   : > { %6358 = vmatprep.subr.bf16.mxu0 %v7288_v27 }
 0x260   : > { %6359 = vmatpush3.bf16.msra.mxu0 %v7288_v27  ;;  %v7304_v27 = vld [vmem:[%s9186_s5 + $0xe8] sm:$0xff]  }
 0x261   : > { %6360 = vmatprep.subr.bf16.mxu0 %v7289_v12 }
 0x264   : > { %6361 = vmatpush3.bf16.msra.mxu0 %v7289_v12  ;;  %v7306_v12 = vld [vmem:[%s9186_s5 + $0xf8] sm:$0xff]  }
 0x265   : > { %6362 = vmatprep.subr.bf16.mxu0 %v7290_v39 }
 0x268   : > { %6363 = vmatpush3.bf16.msra.mxu0 %v7290_v39  ;;  %v7307_v39 = vld [vmem:[%s9186_s5 + $0x100] sm:$0xff]  }
 0x269   : > { %6372 = vmatprep.subr.bf16.mxu0 %v7291_v40 }
 0x26b   : > { %6365 = vmatmul.mubr.bf16.vlgmr.msra.gmra.mrb[36].mxu0 %v8326_v57 }
 0x26c   : > { %6368 = vmatprep.mubr.bf16.mxu0 %v8333_v62  ;;  %6373 = vmatpush3.bf16.msra.mxu0 %v7291_v40  ;;  %v2322_v40 = vpack.c.bf16 %v8320_v44, %v8318_v49  ;;  %v2324_v49 = vpack.c.bf16 %v8433_v58, %v8342_v46  ;;  %v7310_v44 = vld [vmem:[%s9186_s5 + $0x118] sm:$0xff]   ;;  %v7313_v46 = vld [vmem:[%s9186_s5 + $0x130] sm:$0xff]  }
 0x26d   : > { %6374 = vmatprep.subr.bf16.mxu0 %v7292_v52 }
 0x270   : > { %6375 = vmatpush3.bf16.msra.mxu0 %v7292_v52  ;;  %v2323_v52 = vpack.c.bf16 %v8340_v26, %v8322_v47  ;;  %v7311_v47 = vld [vmem:[%s9186_s5 + $0x120] sm:$0xff]   ;;  %v7312_v26 = vld [vmem:[%s9186_s5 + $0x128] sm:$0xff]  }
 0x271   : > { %6376 = vmatprep.subr.bf16.mxu0 %v7293_v53 }
 0x273   : > { %6369 = vmatmul.mubr.bf16.gmra.mrb[40].mxu0 %v8348_v59 }
 0x274   : > { %6377 = vmatpush3.bf16.msra.mxu0 %v7293_v53  ;;  %6388 = vmatprep.mubr.bf16.mxu0 %v2171_v60  ;;  %v7309_v53 = vld [vmem:[%s9186_s5 + $0x110] sm:$0xff]   ;;  %v7318_v60 = vld [vmem:[%s9186_s5 + $0x158] sm:$0xff]  }
 0x275   : > { %6378 = vmatprep.subr.bf16.mxu0 %v7294_v51 }
 0x278   : > { %6379 = vmatpush3.bf16.msra.mxu0 %v7294_v51  ;;  %v7317_v51 = vld [vmem:[%s9186_s5 + $0x150] sm:$0xff]  }
 0x279   : > { %6380 = vmatprep.subr.bf16.mxu0 %v7295_v32 }
 0x27c   : > { %6381 = vmatpush3.bf16.msra.mxu0 %v7295_v32  ;;  %v7325_v32 = vld [vmem:[%s9186_s5 + $0x190] sm:$0xff]  }
 0x27d   : > { %6382 = vmatprep.subr.bf16.mxu0 %v7296_v61 }
 0x280   : > { %6383 = vmatpush3.bf16.msra.mxu0 %v7296_v61  ;;  %v8503_v61 = vld [vmem:[#allocation2 + $0x82] sm:$0xff] }
 0x281   : > { %6384 = vmatprep.subr.bf16.mxu0 %v7297_v0 }
 0x284   : > { %6385 = vmatpush3.bf16.msra.mxu0 %v7297_v0  ;;  %v2624_v0 = vpack.c.bf16 %v8503_v61, %v8396_v22  ;;  %v7334_v22 = vld [vmem:[%s9186_s5 + $0x1d8] sm:$0xff]  }
 0x285   : > { %6386 = vmatprep.subr.bf16.mxu0 %v7298_v17 }
 0x288   : > { %6387 = vmatpush3.bf16.msra.mxu0 %v7298_v17  ;;  %v7326_v17 = vld [vmem:[%s9186_s5 + $0x198] sm:$0xff]  }
 0x289   : > { %6396 = vmatprep.subr.bf16.mxu0 %v7299_v37 }
 0x28b   : > { %6389 = vmatmul.mubr.bf16.vlgmr.msra.gmra.mrb[36].mxu0 %v8380_v18 }
 0x28c   : > { %6392 = vmatprep.mubr.bf16.mxu0 %v8387_v4  ;;  %6397 = vmatpush3.bf16.msra.mxu0 %v7299_v37  ;;  %v7327_v37 = vld [vmem:[%s9186_s5 + $0x1a0] sm:$0xff]  }
 0x28d   : > { %6398 = vmatprep.subr.bf16.mxu0 %v7300_v3 }
 0x290   : > { %6399 = vmatpush3.bf16.msra.mxu0 %v7300_v3  ;;  %v7333_v3 = vld [vmem:[%s9186_s5 + $0x1d0] sm:$0xff]  }
 0x291   : > { %6400 = vmatprep.subr.bf16.mxu0 %v7301_v6 }
 0x293   : > { %6393 = vmatmul.mubr.bf16.gmra.mrb[40].mxu0 %v8400_v29 }
 0x294   : > { %6401 = vmatpush3.bf16.msra.mxu0 %v7301_v6  ;;  %6412 = vmatprep.mubr.bf16.mxu0 %v2321_v31  ;;  %v8534_v6 = vld [vmem:[#allocation2] sm:$0xff] }
 0x295   : > { %6402 = vmatprep.subr.bf16.mxu0 %v7302_v30  ;;  %v2775_v35 = vpack.c.bf16 %v8534_v6, %v8433_v58  ;;  %v7339_v31 = vld [vmem:[%s9186_s5 + $0x200] sm:$0xff]  }
 0x298   : > { %6403 = vmatpush3.bf16.msra.mxu0 %v7302_v30  ;;  %v7337_v30 = vld [vmem:[%s9186_s5 + $0x1f0] sm:$0xff]  }
 0x299   : > { %6404 = vmatprep.subr.bf16.mxu0 %v7303_v20 }
 0x29c   : > { %6405 = vmatpush3.bf16.msra.mxu0 %v7303_v20  ;;  %v7340_v20 = vld [vmem:[%s9186_s5 + $0x208] sm:$0xff]  }
 0x29d   : > { %6406 = vmatprep.subr.bf16.mxu0 %v7304_v27 }
 0x2a0   : > { %6407 = vmatpush3.bf16.msra.mxu0 %v7304_v27  ;;  %v7341_v27 = vld [vmem:[%s9186_s5 + $0x210] sm:$0xff]  }
 0x2a1   : > { %6408 = vmatprep.subr.bf16.mxu0 %v7305_v63 }
 0x2a4   : > { %6409 = vmatpush3.bf16.msra.mxu0 %v7305_v63  ;;  %v2921_v63 = vld [vmem:[#allocation2 + $0x91] sm:$0xff] }
 0x2a5   : > { %6410 = vmatprep.subr.bf16.mxu0 %v7306_v12 }
 0x2a8   : > { %6411 = vmatpush3.bf16.msra.mxu0 %v7306_v12  ;;  %v2925_v12 = vpack.c.bf16 %v2921_v63, %v8253_v15  ;;  %v7344_v15 = vld [vmem:[%s9186_s5 + $0x228] sm:$0xff]  }
 0x2a9   : > { %6420 = vmatprep.subr.bf16.mxu0 %v7307_v39 }
 0x2ab   : > { %6413 = vmatmul.mubr.bf16.vlgmr.msra.gmra.mrb[36].mxu0 %v2322_v40  ;;  %v3071_v40 = vld [vmem:[#allocation2 + $0x92] sm:$0xff] }
 0x2ac   : > { %6416 = vmatprep.mubr.bf16.mxu0 %v2323_v52  ;;  %6421 = vmatpush3.bf16.msra.mxu0 %v7307_v39  ;;  %v7342_v39 = vld [vmem:[%s9186_s5 + $0x218] sm:$0xff]  }
 0x2ad   : > { %6422 = vmatprep.subr.bf16.mxu0 %v7308_v43 }
 0x2b0   : > { %6423 = vmatpush3.bf16.msra.mxu0 %v7308_v43  ;;  %v3075_v43 = vpack.c.bf16 %v3071_v40, %v8503_v61 }
 0x2b1   : > { %6424 = vmatprep.subr.bf16.mxu0 %v7309_v53 }
 0x2b3   : > { %6417 = vmatmul.mubr.bf16.gmra.mrb[40].mxu0 %v2324_v49 }
 0x2b4   : > { %6425 = vmatpush3.bf16.msra.mxu0 %v7309_v53  ;;  %6436 = vmatprep.mubr.bf16.mxu0 %v2471_v13  ;;  %v7316_v13 = vld [vmem:[%s9186_s5 + $0x148] sm:$0xff]  }
 0x2b5   : > { %6426 = vmatprep.subr.bf16.mxu0 %v7310_v44 }
 0x2b8   : > { %6427 = vmatpush3.bf16.msra.mxu0 %v7310_v44 }
 0x2b9   : > { %6428 = vmatprep.subr.bf16.mxu0 %v7311_v47 }
 0x2bc   : > { %6429 = vmatpush3.bf16.msra.mxu0 %v7311_v47 }
 0x2bd   : > { %6430 = vmatprep.subr.bf16.mxu0 %v7312_v26 }
 0x2c0   : > { %6431 = vmatpush3.bf16.msra.mxu0 %v7312_v26 }
 0x2c1   : > { %6432 = vmatprep.subr.bf16.mxu0 %v7313_v46 }
 0x2c4   : > { %6433 = vmatpush3.bf16.msra.mxu0 %v7313_v46 }
 0x2c5   : > { %6434 = vmatprep.subr.bf16.mxu0 %v7314_v8 }
 0x2c8   : > { %6435 = vmatpush3.bf16.msra.mxu0 %v7314_v8 }
 0x2c9   : > { %6444 = vmatprep.subr.bf16.mxu0 %v7315_v9 }
 0x2cb   : > { %6437 = vmatmul.mubr.bf16.vlgmr.msra.gmra.mrb[36].mxu0 %v2472_v5  ;;  %v7323_v5 = vld [vmem:[%s9186_s5 + $0x180] sm:$0xff]  }
 0x2cc   : > { %6440 = vmatprep.mubr.bf16.mxu0 %v2473_v25  ;;  %6445 = vmatpush3.bf16.msra.mxu0 %v7315_v9  ;;  %v2622_v25 = vpack.c.bf16 %v8374_v56, %v8372_v1  ;;  %v7329_v1 = vld [vmem:[%s9186_s5 + $0x1b0] sm:$0xff]   ;;  %v7331_v56 = vld [vmem:[%s9186_s5 + $0x1c0] sm:$0xff]  }
 0x2cd   : > { %6446 = vmatprep.subr.bf16.mxu0 %v7316_v13 }
 0x2d0   : > { %6447 = vmatpush3.bf16.msra.mxu0 %v7316_v13 }
 0x2d1   : > { %6448 = vmatprep.subr.bf16.mxu0 %v7317_v51 }
 0x2d3   : > { %6441 = vmatmul.mubr.bf16.gmra.mrb[40].mxu0 %v2474_v28  ;;  %v7324_v28 = vld [vmem:[%s9186_s5 + $0x188] sm:$0xff]  }
 0x2d4   : > { %6449 = vmatpush3.bf16.msra.mxu0 %v7317_v51  ;;  %6460 = vmatprep.mubr.bf16.mxu0 %v2621_v10 }
 0x2d5   : > { %6450 = vmatprep.subr.bf16.mxu0 %v7318_v60 }
 0x2d8   : > { %6451 = vmatpush3.bf16.msra.mxu0 %v7318_v60 }
 0x2d9   : > { %6452 = vmatprep.subr.bf16.mxu0 %v7319_v11 }
 0x2dc   : > { %6453 = vmatpush3.bf16.msra.mxu0 %v7319_v11 }
 0x2dd   : > { %6454 = vmatprep.subr.bf16.mxu0 %v7320_v54 }
 0x2e0   : > { %6455 = vmatpush3.bf16.msra.mxu0 %v7320_v54 }
 0x2e1   : > { %6456 = vmatprep.subr.bf16.mxu0 %v7321_v23 }
 0x2e4   : > { %6457 = vmatpush3.bf16.msra.mxu0 %v7321_v23 }
 0x2e5   : > { %6458 = vmatprep.subr.bf16.mxu0 %v7322_v14 }
 0x2e8   : > { %6459 = vmatpush3.bf16.msra.mxu0 %v7322_v14 }
 0x2e9   : > { %6468 = vmatprep.subr.bf16.mxu0 %v7323_v5 }
 0x2eb   : > { %6461 = vmatmul.mubr.bf16.vlgmr.msra.gmra.mrb[36].mxu0 %v2622_v25 }
 0x2ec   : > { %6464 = vmatprep.mubr.bf16.mxu0 %v2623_v38  ;;  %6469 = vmatpush3.bf16.msra.mxu0 %v7323_v5 }
 0x2ed   : > { %6470 = vmatprep.subr.bf16.mxu0 %v7324_v28 }
 0x2f0   : > { %6471 = vmatpush3.bf16.msra.mxu0 %v7324_v28 }
 0x2f1   : > { %6472 = vmatprep.subr.bf16.mxu0 %v7325_v32 }
 0x2f3   : > { %6465 = vmatmul.mubr.bf16.gmra.mrb[40].mxu0 %v2624_v0 }
 0x2f4   : > { %6473 = vmatpush3.bf16.msra.mxu0 %v7325_v32  ;;  %6484 = vmatprep.mubr.bf16.mxu0 %v8326_v57  ;;  %v7330_v57 = vld [vmem:[%s9186_s5 + $0x1b8] sm:$0xff]  }
 0x2f5   : > { %6474 = vmatprep.subr.bf16.mxu0 %v7326_v17 }
 0x2f8   : > { %6475 = vmatpush3.bf16.msra.mxu0 %v7326_v17 }
 0x2f9   : > { %6476 = vmatprep.subr.bf16.mxu0 %v7327_v37 }
 0x2fc   : > { %6477 = vmatpush3.bf16.msra.mxu0 %v7327_v37 }
 0x2fd   : > { %6478 = vmatprep.subr.bf16.mxu0 %v7328_v19 }
 0x300   : > { %6479 = vmatpush3.bf16.msra.mxu0 %v7328_v19 }
 0x301   : > { %6480 = vmatprep.subr.bf16.mxu0 %v7329_v1 }
 0x304   : > { %6481 = vmatpush3.bf16.msra.mxu0 %v7329_v1 }
 0x305   : > { %6482 = vmatprep.subr.bf16.mxu0 %v7330_v57 }
 0x308   : > { %6483 = vmatpush3.bf16.msra.mxu0 %v7330_v57 }
 0x309   : > { %6492 = vmatprep.subr.bf16.mxu0 %v7331_v56 }
 0x30b   : > { %6485 = vmatmul.mubr.bf16.vlgmr.msra.gmra.mrb[36].mxu0 %v8333_v62  ;;  %v7335_v62 = vld [vmem:[%s9186_s5 + $0x1e0] sm:$0xff]  }
 0x30c   : > { %6488 = vmatprep.mubr.bf16.mxu0 %v8348_v59  ;;  %6493 = vmatpush3.bf16.msra.mxu0 %v7331_v56  ;;  %v7336_v59 = vld [vmem:[%s9186_s5 + $0x1e8] sm:$0xff]  }
 0x30d   : > { %6494 = vmatprep.subr.bf16.mxu0 %v7332_v2 }
 0x310   : > { %6495 = vmatpush3.bf16.msra.mxu0 %v7332_v2 }
 0x311   : > { %6496 = vmatprep.subr.bf16.mxu0 %v7333_v3 }
 0x313   : > { %6489 = vmatmul.mubr.bf16.gmra.mrb[40].mxu0 %v2775_v35 }
 0x314   : > { %6497 = vmatpush3.bf16.msra.mxu0 %v7333_v3  ;;  %6508 = vmatprep.mubr.bf16.mxu0 %v8261_v16  ;;  %v7338_v16 = vld [vmem:[%s9186_s5 + $0x1f8] sm:$0xff]  }
 0x315   : > { %6498 = vmatprep.subr.bf16.mxu0 %v7334_v22 }
 0x318   : > { %6499 = vmatpush3.bf16.msra.mxu0 %v7334_v22 }
 0x319   : > { %6500 = vmatprep.subr.bf16.mxu0 %v7335_v62 }
 0x31c   : > { %6501 = vmatpush3.bf16.msra.mxu0 %v7335_v62 }
 0x31d   : > { %6502 = vmatprep.subr.bf16.mxu0 %v7336_v59 }
 0x320   : > { %6503 = vmatpush3.bf16.msra.mxu0 %v7336_v59 }
 0x321   : > { %6504 = vmatprep.subr.bf16.mxu0 %v7337_v30 }
 0x324   : > { %6505 = vmatpush3.bf16.msra.mxu0 %v7337_v30 }
 0x325   : > { %6506 = vmatprep.subr.bf16.mxu0 %v7338_v16 }
 0x328   : > { %6507 = vmatpush3.bf16.msra.mxu0 %v7338_v16 }
 0x329   : > { %6516 = vmatprep.subr.bf16.mxu0 %v7339_v31 }
 0x32b   : > { %6509 = vmatmul.mubr.bf16.vlgmr.msra.gmra.mrb[36].mxu0 %v8271_v21  ;;  %v7343_v21 = vld [vmem:[%s9186_s5 + $0x220] sm:$0xff]  }
 0x32c   : > { %6512 = vmatprep.mubr.bf16.mxu0 %v8280_v7  ;;  %6517 = vmatpush3.bf16.msra.mxu0 %v7339_v31  ;;  %v7345_v7 = vld [vmem:[%s9186_s5 + $0x230] sm:$0xff]  }
 0x32d   : > { %6518 = vmatprep.subr.bf16.mxu0 %v7340_v20 }
 0x330   : > { %6519 = vmatpush3.bf16.msra.mxu0 %v7340_v20 }
 0x331   : > { %6520 = vmatprep.subr.bf16.mxu0 %v7341_v27 }
 0x333   : > { %6513 = vmatmul.mubr.bf16.gmra.mrb[40].mxu0 %v2925_v12 }
 0x334   : > { %6521 = vmatpush3.bf16.msra.mxu0 %v7341_v27  ;;  %6532 = vmatprep.mubr.bf16.mxu0 %v8380_v18  ;;  %v7346_v18 = vld [vmem:[%s9186_s5 + $0x238] sm:$0xff]  }
 0x335   : > { %6522 = vmatprep.subr.bf16.mxu0 %v7342_v39 }
 0x338   : > { %6523 = vmatpush3.bf16.msra.mxu0 %v7342_v39 }
 0x339   : > { %6524 = vmatprep.subr.bf16.mxu0 %v7343_v21 }
 0x33c   : > { %6525 = vmatpush3.bf16.msra.mxu0 %v7343_v21 }
 0x33d   : > { %6526 = vmatprep.subr.bf16.mxu0 %v7344_v15 }
 0x340   : > { %6527 = vmatpush3.bf16.msra.mxu0 %v7344_v15 }
 0x341   : > { %6528 = vmatprep.subr.bf16.mxu0 %v7345_v7 }
 0x344   : > { %6529 = vmatpush3.bf16.msra.mxu0 %v7345_v7 }
 0x345   : > { %6530 = vmatprep.subr.bf16.mxu0 %v7346_v18 }
 0x348   : > { %6531 = vmatpush3.bf16.msra.mxu0 %v7346_v18 }
 0x349   : > { %6992 = vmatprep.subr.bf16.mxu0 %v7491_v34 }
 0x34b   : > { %6533 = vmatmul.mubr.bf16.vlgmr.msra.gmra.mrb[36].mxu0 %v8387_v4  ;;  %v5567_v4 = vld [vmem:[%s9187_s6] ss:$0 sm:$0xff] }
 0x34c   : > { %6536 = vmatprep.mubr.bf16.mxu0 %v8400_v29  ;;  %6994 = vmatpush3.bf16.msra.mxu0 %v7993_v33 }
 0x34d   : > { %6995 = vmatprep.subr.bf16.mxu0 %v7491_v34 }
 0x350   : > { %6997 = vmatpush3.bf16.msra.mxu0 %v8007_v36 }
 0x351   : > { %6998 = vmatprep.subr.bf16.mxu0 %v7491_v34 }
 0x353   : > { %6537 = vmatmul.mubr.bf16.gmra.mrb[40].mxu0 %v3075_v43 }
 0x354   : > { %7000 = vmatpush3.bf16.msra.mxu0 %v8019_v42  ;;  %6858 = vmatprep.mubr.msk.f32.mxu0 %vm7492_vm1, %v8534_v6 }
 0x355   : > { %7001 = vmatprep.subr.bf16.mxu0 %v7491_v34 }
 0x358   : > { %7003 = vmatpush3.bf16.msra.mxu0 %v8031_v45 }
 0x359   : > { %7004 = vmatprep.subr.bf16.mxu0 %v7491_v34 }
 0x35c   : > { %7006 = vmatpush3.bf16.msra.mxu0 %v8043_v48 }
 0x35d   : > { %7007 = vmatprep.subr.bf16.mxu0 %v7491_v34 }
 0x360   : > { %7009 = vmatpush3.bf16.msra.mxu0 %v8055_v24 }
 0x361   : > { %7010 = vmatprep.subr.bf16.mxu0 %v7491_v34 }
 0x364   : > { %7012 = vmatpush3.bf16.msra.mxu0 %v8067_v55 }
 0x365   : > { %7013 = vmatprep.subr.bf16.mxu0 %v7491_v34 }
 0x368   : > { %7015 = vmatpush3.bf16.msra.mxu0 %v8101_v50 }
 0x369   : > { %7016 = vmatprep.subr.bf16.mxu0 %v7491_v34 }
 0x41e   : > { %v6534_v29 = vpop.f32.mrb[36].mxu0 }
 0x41f   : > { %v3175_v52 = vpop.f32.mrb[37].mxu0  ;;  %v3223_v44 = vadd.f32 %v6534_v29, %v5567_v4 }
 0x420   : > { %v3221_v53 = vadd.f32 %v5567_v4, %v3175_v52  ;;  %v6535_v58 = vpop.f32.mrb[38].mxu0 }
 0x421   : > { %v3178_v49 = vpop.f32.mrb[39].mxu0  ;;  %v3224_v46 = vadd.f32 %v6535_v58, %v5567_v4  ;;  %v8611_v9 = vmax.f32 %v3223_v44, 0.0  ;;  %v7347_v44 = vld [vmem:[%s9190_s9 + $0x40] sm:$0xff]  }
 0x422   : > { %v3222_v47 = vadd.f32 %v5567_v4, %v3178_v49  ;;  %v8607_v26 = vmax.f32 %v3221_v53, 0.0 }
 0x423   : > { %v8615_v10 = vmax.f32 %v3224_v46, 0.0  ;;  %v3254_v56 = vmul.f32 %v8611_v9, %v8611_v9  ;;  %v7349_v46 = vld [vmem:[%s9190_s9 + $0x50] sm:$0xff]  }
 0x424   : > { %v8609_v8 = vmax.f32 %v3222_v47, 0.0  ;;  %v3252_v61 = vmul.f32 %v8607_v26, %v8607_v26  ;;  %v7348_v47 = vld [vmem:[%s9190_s9 + $0x48] sm:$0xff]  }
 0x425   : > { %v3255_v62 = vmul.f32 %v8615_v10, %v8615_v10 }
 0x426   : > { %v3239_v13 = vadd.f32 %v8609_v8, %v8607_v26  ;;  %v6538_v51 = vpop.f32.mrb[40].mxu0  ;;  %v3253_v14 = vmul.f32 %v8609_v8, %v8609_v8 }
 0x427   : > { %v3191_v60 = vpop.f32.mrb[41].mxu0  ;;  %v3227_v25 = vadd.f32 %v6538_v51, %v5567_v4  ;;  %v7351_v51 = vld [vmem:[%s9190_s9 + $0x60] sm:$0xff]  }
 0x428   : > { %v3240_v11 = vadd.f32 %v3239_v13, %v8611_v9  ;;  %v3225_v54 = vadd.f32 %v5567_v4, %v3191_v60  ;;  %v6539_v23 = vpop.f32.mrb[42].mxu0  ;;  %v3260_v19 = vadd.f32 %v3253_v14, %v3252_v61  ;;  %v7350_v13 = vld [vmem:[%s9190_s9 + $0x58] sm:$0xff]   ;;  %v7352_v60 = vld [vmem:[%s9190_s9 + $0x68] sm:$0xff]  }
 0x429   : > { %v3194_v5 = vpop.f32.mrb[43].mxu0  ;;  %v3228_v17 = vadd.f32 %v6539_v23, %v5567_v4  ;;  %v8628_v1 = vmax.f32 %v3227_v25, 0.0  ;;  %v8691_v23 = vld [vmem:[%s9190_s9] sm:$0xff]  }
 0x42a   : > { %v8620_v28 = vmax.f32 %v3225_v54, 0.0  ;;  %v3241_v38 = vadd.f32 %v3240_v11, %v8615_v10  ;;  %v3226_v32 = vadd.f32 %v5567_v4, %v3194_v5  ;;  %v3261_v35 = vadd.f32 %v3260_v19, %v3254_v56  ;;  %v7353_v11 = vld [vmem:[%s9190_s9 + $0x70] sm:$0xff]   ;;  %v7354_v54 = vld [vmem:[%s9190_s9 + $0x78] sm:$0xff]  }
 0x42b   : > { %v8633_v2 = vmax.f32 %v3228_v17, 0.0  ;;  %v3258_v7 = vmul.f32 %v8628_v1, %v8628_v1 }
 0x42c   : > { %v3242_v0 = vadd.f32 %v3241_v38, %v8620_v28  ;;  %v8626_v37 = vmax.f32 %v3226_v32, 0.0  ;;  %v3256_v30 = vmul.f32 %v8620_v28, %v8620_v28  ;;  %v3262_v16 = vadd.f32 %v3261_v35, %v3255_v62 }
 0x42d   : > { %v3259_v40 = vmul.f32 %v8633_v2, %v8633_v2 }
 0x42e   : > { %v3243_v57 = vadd.f32 %v3242_v0, %v8626_v37  ;;  %v3263_v27 = vadd.f32 %v3262_v16, %v3256_v30  ;;  %v3257_v63 = vmul.f32 %v8626_v37, %v8626_v37 }
 0x430   : > { %v3244_v3 = vadd.f32 %v3243_v57, %v8628_v1  ;;  %v3264_v21 = vadd.f32 %v3263_v27, %v3257_v63 }
 0x432   : > { %v3245_v22 = vadd.f32 %v3244_v3, %v8633_v2  ;;  %v3265_v18 = vadd.f32 %v3264_v21, %v3258_v7 }
 0x434   : > { %v3246_v59 = vrot.slane %v3245_v22, 4  ;;  %v3266_v43 = vadd.f32 %v3265_v18, %v3259_v40 }
 0x436   : > { %v3247_v31 = vadd.f32 %v3246_v59, %v3245_v22  ;;  %v3267_v4 = vrot.slane %v3266_v43, 4 }
 0x438   : > { %v3248_v20 = vrot.slane %v3247_v31, 2  ;;  %v3268_v29 = vadd.f32 %v3267_v4, %v3266_v43  ;;  %v3506_v43 = vld [vmem:[#allocation2 + $0x1] sm:$0xff] }
 0x43a   : > { %v3249_v12 = vadd.f32 %v3248_v20, %v3247_v31  ;;  %v3269_v52 = vrot.slane %v3268_v29, 2 }
 0x43c   : > { %v3250_v39 = vrot.slane %v3249_v12, 1  ;;  %v3270_v53 = vadd.f32 %v3269_v52, %v3268_v29 }
 0x43e   : > { %v3251_v15 = vadd.f32 %v3250_v39, %v3249_v12  ;;  %v3271_v58 = vrot.slane %v3270_v53, 1 }
 0x440   : > { %6573 = vmatmul.mubr.f32.vlgmr.msra.gmra.mrb[34].mxu1 %v3251_v15  ;;  %v3272_v49 = vadd.f32 %v3271_v58, %v3270_v53 }
 0x441   : > { %6970 = vmatpush3.bf16.msra.mxu1 %v7993_v33  ;;  %6607 = vmatprep.mubr.msk.f32.mxu1 %vm7492_vm1, %v8534_v6 }
 0x442   : > { %6971 = vmatprep.subr.bf16.mxu1 %v7491_v34 }
 0x445   : > { %6973 = vmatpush3.bf16.msra.mxu1 %v8007_v36 }
 0x446   : > { %6974 = vmatprep.subr.bf16.mxu1 %v7491_v34 }
 0x449   : > { %6976 = vmatpush3.bf16.msra.mxu1 %v8019_v42 }
 0x44a   : > { %6977 = vmatprep.subr.bf16.mxu1 %v7491_v34 }
 0x44d   : > { %6979 = vmatpush3.bf16.msra.mxu1 %v8031_v45 }
 0x44e   : > { %6980 = vmatprep.subr.bf16.mxu1 %v7491_v34 }
 0x451   : > { %6982 = vmatpush3.bf16.msra.mxu1 %v8043_v48 }
 0x452   : > { %6983 = vmatprep.subr.bf16.mxu1 %v7491_v34 }
 0x455   : > { %6985 = vmatpush3.bf16.msra.mxu1 %v8055_v24 }
 0x456   : > { %6986 = vmatprep.subr.bf16.mxu1 %v7491_v34 }
 0x459   : > { %6988 = vmatpush3.bf16.msra.mxu1 %v8067_v55 }
 0x45a   : > { %6989 = vmatprep.subr.bf16.mxu1 %v7491_v34 }
 0x45d   : > { %6991 = vmatpush3.bf16.msra.mxu1 %v8101_v50 }
 0x45e   : > { %6610 = vmatprep.subr.bf16.mxu1 %v7347_v44 }
 0x460   : > { %6608 = vmatmul.mubr.f32.vlgmr.msra.gmra.mrb[36].mxu1 %v3272_v49 }
 0x461   : > { %6611 = vmatpush3.bf16.msra.mxu1 %v7347_v44 }
 0x462   : > { %6612 = vmatprep.subr.bf16.mxu1 %v7348_v47 }
 0x465   : > { %6613 = vmatpush3.bf16.msra.mxu1 %v7348_v47 }
 0x466   : > { %6614 = vmatprep.subr.bf16.mxu1 %v7349_v46 }
 0x469   : > { %6615 = vmatpush3.bf16.msra.mxu1 %v7349_v46 }
 0x46a   : > { %6616 = vmatprep.subr.bf16.mxu1 %v7350_v13 }
 0x46d   : > { %6617 = vmatpush3.bf16.msra.mxu1 %v7350_v13 }
 0x46e   : > { %6618 = vmatprep.subr.bf16.mxu1 %v7351_v51 }
 0x471   : > { %6619 = vmatpush3.bf16.msra.mxu1 %v7351_v51 }
 0x472   : > { %6620 = vmatprep.subr.bf16.mxu1 %v7352_v60 }
 0x475   : > { %6621 = vmatpush3.bf16.msra.mxu1 %v7352_v60 }
 0x476   : > { %6622 = vmatprep.subr.bf16.mxu1 %v7353_v11 }
 0x479   : > { %6623 = vmatpush3.bf16.msra.mxu1 %v7353_v11 }
 0x47a   : > { %6624 = vmatprep.subr.bf16.mxu1 %v7354_v54 }
 0x47d   : > { %6625 = vmatpush3.bf16.msra.mxu1 %v7354_v54  ;;  %v7356_v54 = vld [vmem:[%s9190_s9 + $0x8] sm:$0xff]  }
 0x47e   : > { %6634 = vmatprep.subr.bf16.mxu1 %v8691_v23 }
 0x513   : > { %v3339_v14 = vpop.f32.mrb[34].mxu1 }
 0x514   : > { %v6574_v5 = vpop.f32.mrb[35].mxu1  ;;  %v3413_v25 = vmul.f32 %v3339_v14, %v3339_v14  ;;  %v3421_v19 = vrot.slane %v3339_v14, %v8221_v41 }
 0x516   : > { %v3422_v56 = vsub.f32 %v8607_v26, %v3421_v19  ;;  %v3423_v3 = vsub.f32 %v8609_v8, %v3421_v19  ;;  %v3424_v35 = vsub.f32 %v8611_v9, %v3421_v19  ;;  %v3425_v22 = vsub.f32 %v8615_v10, %v3421_v19  ;;  %v5568_v26 = vld [vmem:[%s9188_s7] ss:$0 sm:$0xff] }
 0x517   : > { %v3426_v59 = vsub.f32 %v8620_v28, %v3421_v19  ;;  %v3427_v30 = vsub.f32 %v8626_v37, %v3421_v19  ;;  %v3428_v16 = vsub.f32 %v8628_v1, %v3421_v19  ;;  %v3429_v31 = vsub.f32 %v8633_v2, %v3421_v19  ;;  %v5569_v10 = vld [vmem:[%s9189_s8] ss:$0 sm:$0xff] }
 0x533   : > { %v3409_v38 = vpop.f32.mrb[36].mxu1 }
 0x534   : > { %v3414_v32 = vsub.f32 %v3409_v38, %v3413_v25  ;;  %v6609_v61 = vpop.f32.mrb[37].mxu1  ;;  %v7357_v38 = vld [vmem:[%s9190_s9 + $0x10] sm:$0xff]  }
 0x535   : > { %v7358_v61 = vld [vmem:[%s9190_s9 + $0x18] sm:$0xff]  }
 0x536   : > { %v3415_v0 = vmax.f32 %v3414_v32, 0.0 }
 0x538   : > { %v3416_v17 = vadd.f32 1e-05, %v3415_v0 }
 0x53a   : > { %7421 = vrsqrt.f32 %v3416_v17 }
 0x544   : > { %v7422_v57 = vpop.eup %7421 }
 0x545   : > { %v3433_v62 = vrot.slane %v7422_v57, %v8221_v41 }
 0x547   : > { %v3434_v20 = vmul.f32 %v3433_v62, %v3422_v56  ;;  %v3435_v8 = vmul.f32 %v3433_v62, %v3423_v3  ;;  %v3436_v27 = vmul.f32 %v3433_v62, %v3424_v35  ;;  %v3437_v9 = vmul.f32 %v3433_v62, %v3425_v22 }
 0x548   : > { %v3438_v63 = vmul.f32 %v3433_v62, %v3426_v59  ;;  %v3439_v28 = vmul.f32 %v3433_v62, %v3427_v30  ;;  %v3440_v12 = vmul.f32 %v3433_v62, %v3428_v16  ;;  %v3441_v37 = vmul.f32 %v3433_v62, %v3429_v31  ;;  %v7359_v59 = vld [vmem:[%s9190_s9 + $0x20] sm:$0xff]   ;;  %v7360_v30 = vld [vmem:[%s9190_s9 + $0x28] sm:$0xff]   ;;  %v7361_v16 = vld [vmem:[%s9190_s9 + $0x30] sm:$0xff]  }
 0x549   : > { %v3448_v39 = vmul.f32 %v5568_v26, %v3434_v20  ;;  %v3449_v1 = vmul.f32 %v5568_v26, %v3435_v8  ;;  %v3450_v21 = vmul.f32 %v5568_v26, %v3436_v27  ;;  %v3451_v2 = vmul.f32 %v5568_v26, %v3437_v9  ;;  %v7362_v31 = vld [vmem:[%s9190_s9 + $0x38] sm:$0xff]  }
 0x54a   : > { %v3452_v15 = vmul.f32 %v5568_v26, %v3438_v63  ;;  %v3453_v7 = vmul.f32 %v5568_v26, %v3439_v28  ;;  %v3454_v18 = vmul.f32 %v5568_v26, %v3440_v12  ;;  %v3455_v40 = vmul.f32 %v5568_v26, %v3441_v37  ;;  %v7363_v26 = vld [vmem:[%s9190_s9 + $0x80] sm:$0xff]   ;;  %v7364_v63 = vld [vmem:[%s9190_s9 + $0x88] sm:$0xff]   ;;  %v7365_v12 = vld [vmem:[%s9190_s9 + $0x90] sm:$0xff]  }
 0x54b   : > { %v8710_v4 = vadd.f32 %v5569_v10, %v3448_v39  ;;  %v8712_v29 = vadd.f32 %v5569_v10, %v3449_v1  ;;  %v8714_v52 = vadd.f32 %v5569_v10, %v3450_v21  ;;  %v8716_v53 = vadd.f32 %v5569_v10, %v3451_v2  ;;  %v3761_v1 = vld [vmem:[#allocation2 + $0x2] sm:$0xff]  ;;  %v7366_v2 = vld [vmem:[%s9190_s9 + $0x98] sm:$0xff]  }
 0x54c   : > { %v8718_v58 = vadd.f32 %v5569_v10, %v3452_v15  ;;  %v8720_v49 = vadd.f32 %v5569_v10, %v3453_v7  ;;  %v8722_v44 = vadd.f32 %v5569_v10, %v3454_v18  ;;  %v8724_v47 = vadd.f32 %v5569_v10, %v3455_v40  ;;  %v7367_v7 = vld [vmem:[%s9190_s9 + $0xa0] sm:$0xff]   ;;  %v7368_v18 = vld [vmem:[%s9190_s9 + $0xa8] sm:$0xff]   ;;  %v7369_v40 = vld [vmem:[%s9190_s9 + $0xb0] sm:$0xff]  }
 0x54d   : > { %3470 = vst [vmem:[#allocation2 + $0x11] sm:$0xff] %v8710_v4  ;;  %3471 = vst [vmem:[#allocation2 + $0x21] sm:$0xff] %v8712_v29  ;;  %v3514_v46 = vpack.c.bf16 %v8710_v4, %v3506_v43  ;;  %v8733_v13 = vpack.c.bf16 %v8714_v52, %v8712_v29  ;;  %v4069_v51 = vpack.c.bf16 %v8712_v29, %v8710_v4  ;;  %v7370_v43 = vld [vmem:[%s9190_s9 + $0xb8] sm:$0xff]   ;;  %v7387_v29 = vld [vmem:[%s9190_s9 + $0x140] sm:$0xff]  }
 0x54e   : > { %3472 = vst [vmem:[#allocation2 + $0x31] sm:$0xff] %v8714_v52  ;;  %3473 = vst [vmem:[#allocation2 + $0x41] sm:$0xff] %v8716_v53  ;;  %v4070_v60 = vpack.c.bf16 %v8716_v53, %v8714_v52  ;;  %v8745_v11 = vpack.c.bf16 %v8718_v58, %v8716_v53  ;;  %v8752_v14 = vpack.c.bf16 %v8722_v44, %v8720_v49  ;;  %v7386_v4 = vld [vmem:[%s9190_s9 + $0x138] sm:$0xff]   ;;  %v7391_v52 = vld [vmem:[%s9190_s9 + $0x160] sm:$0xff]  }
 0x54f   : > { %3474 = vst [vmem:[#allocation2 + $0x51] sm:$0xff] %v8718_v58  ;;  %3475 = vst [vmem:[#allocation2 + $0x61] sm:$0xff] %v8720_v49  ;;  %v4071_v5 = vpack.c.bf16 %v8720_v49, %v8718_v58  ;;  %v4072_v25 = vpack.c.bf16 %v8724_v47, %v8722_v44  ;;  %6626 = vmatprep.mubr.bf16.mxu1 %v3514_v46  ;;  %v7371_v46 = vld [vmem:[%s9190_s9 + $0xc0] sm:$0xff]   ;;  %v7392_v53 = vld [vmem:[%s9190_s9 + $0x168] sm:$0xff]  }
 0x550   : > { %3476 = vst [vmem:[#allocation2 + $0x71] sm:$0xff] %v8722_v44  ;;  %3477 = vst [vmem:[#allocation2 + $0x81] sm:$0xff] %v8724_v47  ;;  %6627 = vmatmul.mubr.bf16.vlgmr.msra.gmra.mrb[40].mxu1 %v8733_v13  ;;  %v7393_v58 = vld [vmem:[%s9190_s9 + $0x170] sm:$0xff]   ;;  %v7394_v49 = vld [vmem:[%s9190_s9 + $0x178] sm:$0xff]  }
 0x551   : > { %6635 = vmatpush3.bf16.msra.mxu1 %v8691_v23  ;;  %6630 = vmatprep.mubr.bf16.mxu1 %v8745_v11  ;;  %v7395_v44 = vld [vmem:[%s9190_s9 + $0x180] sm:$0xff]  }
 0x552   : > { %6636 = vmatprep.subr.bf16.mxu1 %v7356_v54 }
 0x554   : > { %v8764_v32 = vld [vmem:[#allocation2 + $0x10] sm:$0xff]  ;;  %v8771_v17 = vld [vmem:[#allocation2 + $0x22] sm:$0xff] }
 0x555   : > { %6637 = vmatpush3.bf16.msra.mxu1 %v7356_v54  ;;  %v8769_v0 = vld [vmem:[#allocation2 + $0x12] sm:$0xff]  ;;  %v3486_v23 = vpack.c.bf16 %v8764_v32, %v8534_v6  ;;  %v8777_v57 = vld [vmem:[#allocation2 + $0x42] sm:$0xff] }
 0x556   : > { %6638 = vmatprep.subr.bf16.mxu1 %v7357_v38  ;;  %v8775_v19 = vld [vmem:[#allocation2 + $0x32] sm:$0xff]  ;;  %v4219_v3 = vpack.c.bf16 %v8771_v17, %v8769_v0  ;;  %v8784_v35 = vld [vmem:[#allocation2 + $0x62] sm:$0xff]  ;;  %v3769_v15 = vpack.c.bf16 %v8769_v0, %v3761_v1 }
 0x557   : > { %v8779_v56 = vld [vmem:[#allocation2 + $0x52] sm:$0xff]  ;;  %v4220_v22 = vpack.c.bf16 %v8777_v57, %v8775_v19  ;;  %v3480_v20 = vld [vmem:[#allocation2 + $0x20] sm:$0xff]  ;;  %v8856_v54 = vpack.c.bf16 %v8775_v19, %v8771_v17 }
 0x558   : > { %6631 = vmatmul.mubr.bf16.gmra.mrb[44].mxu1 %v8752_v14  ;;  %v4221_v62 = vpack.c.bf16 %v8784_v35, %v8779_v56  ;;  %v8805_v8 = vld [vmem:[#allocation2 + $0x30] sm:$0xff]  ;;  %v8807_v27 = vld [vmem:[#allocation2 + $0x40] sm:$0xff]  ;;  %v7398_v17 = vld [vmem:[%s9190_s9 + $0x198] sm:$0xff]  }
 0x559   : > { %6639 = vmatpush3.bf16.msra.mxu1 %v7357_v38  ;;  %6650 = vmatprep.mubr.bf16.mxu1 %v3486_v23  ;;  %v8809_v9 = vld [vmem:[#allocation2 + $0x50] sm:$0xff]  ;;  %v8812_v10 = vpack.c.bf16 %v8805_v8, %v3480_v20  ;;  %v8826_v37 = vld [vmem:[#allocation2 + $0x60] sm:$0xff]  ;;  %v7372_v38 = vld [vmem:[%s9190_s9 + $0xc8] sm:$0xff]   ;;  %v3920_v1 = vpack.c.bf16 %v8807_v27, %v8805_v8 }
 0x55a   : > { %6640 = vmatprep.subr.bf16.mxu1 %v7358_v61  ;;  %v8819_v28 = vpack.c.bf16 %v8809_v9, %v8807_v27  ;;  %v8828_v39 = vld [vmem:[#allocation2 + $0x70] sm:$0xff]  ;;  %v7382_v27 = vld [vmem:[%s9190_s9 + $0x118] sm:$0xff]   ;;  %v7399_v19 = vld [vmem:[%s9190_s9 + $0x1a0] sm:$0xff]  }
 0x55b   : > { %v8832_v21 = vpack.c.bf16 %v8828_v39, %v8826_v37  ;;  %v7373_v23 = vld [vmem:[%s9190_s9 + $0xd0] sm:$0xff]  }
 0x55d   : > { %6641 = vmatpush3.bf16.msra.mxu1 %v7358_v61  ;;  %v8863_v61 = vpack.c.bf16 %v8779_v56, %v8777_v57  ;;  %v7400_v57 = vld [vmem:[%s9190_s9 + $0x1a8] sm:$0xff]   ;;  %v7401_v56 = vld [vmem:[%s9190_s9 + $0x1b0] sm:$0xff]  }
 0x55e   : > { %6642 = vmatprep.subr.bf16.mxu1 %v7359_v59 }
 0x561   : > { %6643 = vmatpush3.bf16.msra.mxu1 %v7359_v59  ;;  %v8870_v59 = vld [vmem:[#allocation2 + $0x72] sm:$0xff] }
 0x562   : > { %6644 = vmatprep.subr.bf16.mxu1 %v7360_v30 }
 0x565   : > { %6645 = vmatpush3.bf16.msra.mxu1 %v7360_v30  ;;  %v8874_v30 = vpack.c.bf16 %v8870_v59, %v8784_v35  ;;  %v7403_v35 = vld [vmem:[%s9190_s9 + $0x1c0] sm:$0xff]  }
 0x566   : > { %6646 = vmatprep.subr.bf16.mxu1 %v7361_v16 }
 0x569   : > { %6647 = vmatpush3.bf16.msra.mxu1 %v7361_v16  ;;  %v7374_v16 = vld [vmem:[%s9190_s9 + $0xd8] sm:$0xff]  }
 0x56a   : > { %6648 = vmatprep.subr.bf16.mxu1 %v7362_v31 }
 0x56d   : > { %6649 = vmatpush3.bf16.msra.mxu1 %v7362_v31  ;;  %v3919_v31 = vpack.c.bf16 %v3480_v20, %v8764_v32  ;;  %v7377_v32 = vld [vmem:[%s9190_s9 + $0xf0] sm:$0xff]   ;;  %v7378_v20 = vld [vmem:[%s9190_s9 + $0xf8] sm:$0xff]  }
 0x56e   : > { %6658 = vmatprep.subr.bf16.mxu1 %v7363_v26 }
 0x570   : > { %6651 = vmatmul.mubr.bf16.vlgmr.msra.gmra.mrb[40].mxu1 %v8812_v10 }
 0x571   : > { %6654 = vmatprep.mubr.bf16.mxu1 %v8819_v28  ;;  %6659 = vmatpush3.bf16.msra.mxu1 %v7363_v26  ;;  %v7375_v26 = vld [vmem:[%s9190_s9 + $0xe0] sm:$0xff]  }
 0x572   : > { %6660 = vmatprep.subr.bf16.mxu1 %v7364_v63 }
 0x575   : > { %6661 = vmatpush3.bf16.msra.mxu1 %v7364_v63  ;;  %v7376_v63 = vld [vmem:[%s9190_s9 + $0xe8] sm:$0xff]  }
 0x576   : > { %6662 = vmatprep.subr.bf16.mxu1 %v7365_v12 }
 0x578   : > { %6655 = vmatmul.mubr.bf16.gmra.mrb[44].mxu1 %v8832_v21 }
 0x579   : > { %6663 = vmatpush3.bf16.msra.mxu1 %v7365_v12  ;;  %6674 = vmatprep.mubr.bf16.mxu1 %v3769_v15  ;;  %v7379_v12 = vld [vmem:[%s9190_s9 + $0x100] sm:$0xff]   ;;  %v3921_v15 = vpack.c.bf16 %v8826_v37, %v8809_v9  ;;  %v7384_v37 = vld [vmem:[%s9190_s9 + $0x128] sm:$0xff]  }
 0x57a   : > { %6664 = vmatprep.subr.bf16.mxu1 %v7366_v2  ;;  %v7383_v9 = vld [vmem:[%s9190_s9 + $0x120] sm:$0xff]  }
 0x57d   : > { %6665 = vmatpush3.bf16.msra.mxu1 %v7366_v2  ;;  %v7380_v2 = vld [vmem:[%s9190_s9 + $0x108] sm:$0xff]  }
 0x57e   : > { %6666 = vmatprep.subr.bf16.mxu1 %v7367_v7 }
 0x581   : > { %6667 = vmatpush3.bf16.msra.mxu1 %v7367_v7  ;;  %v7381_v7 = vld [vmem:[%s9190_s9 + $0x110] sm:$0xff]  }
 0x582   : > { %6668 = vmatprep.subr.bf16.mxu1 %v7368_v18 }
 0x585   : > { %6669 = vmatpush3.bf16.msra.mxu1 %v7368_v18  ;;  %v8906_v18 = vld [vmem:[#allocation2 + $0x80] sm:$0xff] }
 0x586   : > { %6670 = vmatprep.subr.bf16.mxu1 %v7369_v40  ;;  %v3922_v8 = vpack.c.bf16 %v8906_v18, %v8828_v39  ;;  %v7385_v39 = vld [vmem:[%s9190_s9 + $0x130] sm:$0xff]  }
 0x589   : > { %6671 = vmatpush3.bf16.msra.mxu1 %v7369_v40  ;;  %v7389_v40 = vld [vmem:[%s9190_s9 + $0x150] sm:$0xff]  }
 0x58a   : > { %6672 = vmatprep.subr.bf16.mxu1 %v7370_v43 }
 0x58d   : > { %6673 = vmatpush3.bf16.msra.mxu1 %v7370_v43  ;;  %v7390_v43 = vld [vmem:[%s9190_s9 + $0x158] sm:$0xff]  }
 0x58e   : > { %6682 = vmatprep.subr.bf16.mxu1 %v7371_v46 }
 0x590   : > { %6675 = vmatmul.mubr.bf16.vlgmr.msra.gmra.mrb[40].mxu1 %v8856_v54 }
 0x591   : > { %6678 = vmatprep.mubr.bf16.mxu1 %v8863_v61  ;;  %6683 = vmatpush3.bf16.msra.mxu1 %v7371_v46  ;;  %v7406_v46 = vld [vmem:[%s9190_s9 + $0x1d8] sm:$0xff]  }
 0x592   : > { %6684 = vmatprep.subr.bf16.mxu1 %v7372_v38 }
 0x595   : > { %6685 = vmatpush3.bf16.msra.mxu1 %v7372_v38  ;;  %v7411_v38 = vld [vmem:[%s9190_s9 + $0x200] sm:$0xff]  }
 0x596   : > { %6686 = vmatprep.subr.bf16.mxu1 %v7373_v23 }
 0x598   : > { %6679 = vmatmul.mubr.bf16.gmra.mrb[44].mxu1 %v8874_v30 }
 0x599   : > { %6687 = vmatpush3.bf16.msra.mxu1 %v7373_v23  ;;  %6698 = vmatprep.mubr.bf16.mxu1 %v3919_v31  ;;  %v7412_v23 = vld [vmem:[%s9190_s9 + $0x208] sm:$0xff]  }
 0x59a   : > { %6688 = vmatprep.subr.bf16.mxu1 %v7374_v16 }
 0x59d   : > { %6689 = vmatpush3.bf16.msra.mxu1 %v7374_v16  ;;  %v4518_v16 = vld [vmem:[#allocation2 + $0x91] sm:$0xff] }
 0x59e   : > { %6690 = vmatprep.subr.bf16.mxu1 %v7375_v26  ;;  %v4522_v31 = vpack.c.bf16 %v4518_v16, %v8724_v47  ;;  %v7416_v47 = vld [vmem:[%s9190_s9 + $0x228] sm:$0xff]  }
 0x5a1   : > { %6691 = vmatpush3.bf16.msra.mxu1 %v7375_v26  ;;  %v7414_v26 = vld [vmem:[%s9190_s9 + $0x218] sm:$0xff]  }
 0x5a2   : > { %6692 = vmatprep.subr.bf16.mxu1 %v7376_v63 }
 0x5a5   : > { %6693 = vmatpush3.bf16.msra.mxu1 %v7376_v63  ;;  %v4668_v63 = vld [vmem:[#allocation2 + $0x92] sm:$0xff] }
 0x5a6   : > { %6694 = vmatprep.subr.bf16.mxu1 %v7377_v32 }
 0x5a9   : > { %6695 = vmatpush3.bf16.msra.mxu1 %v7377_v32 }
 0x5aa   : > { %6696 = vmatprep.subr.bf16.mxu1 %v7378_v20 }
 0x5ad   : > { %6697 = vmatpush3.bf16.msra.mxu1 %v7378_v20  ;;  %v5770_v20 = vld [vmem:[%s9191_s10] ss:$0 sm:$0xff] }
 0x5ae   : > { %6706 = vmatprep.subr.bf16.mxu1 %v7379_v12 }
 0x5b0   : > { %6699 = vmatmul.mubr.bf16.vlgmr.msra.gmra.mrb[40].mxu1 %v3920_v1 }
 0x5b1   : > { %6702 = vmatprep.mubr.bf16.mxu1 %v3921_v15  ;;  %6707 = vmatpush3.bf16.msra.mxu1 %v7379_v12 }
 0x5b2   : > { %6708 = vmatprep.subr.bf16.mxu1 %v7380_v2 }
 0x5b5   : > { %6709 = vmatpush3.bf16.msra.mxu1 %v7380_v2 }
 0x5b6   : > { %6710 = vmatprep.subr.bf16.mxu1 %v7381_v7 }
 0x5b8   : > { %6703 = vmatmul.mubr.bf16.gmra.mrb[44].mxu1 %v3922_v8 }
 0x5b9   : > { %6711 = vmatpush3.bf16.msra.mxu1 %v7381_v7  ;;  %6722 = vmatprep.mubr.bf16.mxu1 %v4069_v51  ;;  %v7388_v51 = vld [vmem:[%s9190_s9 + $0x148] sm:$0xff]  }
 0x5ba   : > { %6712 = vmatprep.subr.bf16.mxu1 %v7382_v27 }
 0x5bd   : > { %6713 = vmatpush3.bf16.msra.mxu1 %v7382_v27 }
 0x5be   : > { %6714 = vmatprep.subr.bf16.mxu1 %v7383_v9 }
 0x5c1   : > { %6715 = vmatpush3.bf16.msra.mxu1 %v7383_v9 }
 0x5c2   : > { %6716 = vmatprep.subr.bf16.mxu1 %v7384_v37 }
 0x5c5   : > { %6717 = vmatpush3.bf16.msra.mxu1 %v7384_v37 }
 0x5c6   : > { %6718 = vmatprep.subr.bf16.mxu1 %v7385_v39 }
 0x5c9   : > { %6719 = vmatpush3.bf16.msra.mxu1 %v7385_v39 }
 0x5ca   : > { %6720 = vmatprep.subr.bf16.mxu1 %v7386_v4 }
 0x5cd   : > { %6721 = vmatpush3.bf16.msra.mxu1 %v7386_v4 }
 0x5ce   : > { %6730 = vmatprep.subr.bf16.mxu1 %v7387_v29 }
 0x5d0   : > { %6723 = vmatmul.mubr.bf16.vlgmr.msra.gmra.mrb[40].mxu1 %v4070_v60  ;;  %v7396_v60 = vld [vmem:[%s9190_s9 + $0x188] sm:$0xff]  }
 0x5d1   : > { %6726 = vmatprep.mubr.bf16.mxu1 %v4071_v5  ;;  %6731 = vmatpush3.bf16.msra.mxu1 %v7387_v29  ;;  %v7397_v5 = vld [vmem:[%s9190_s9 + $0x190] sm:$0xff]  }
 0x5d2   : > { %6732 = vmatprep.subr.bf16.mxu1 %v7388_v51 }
 0x5d5   : > { %6733 = vmatpush3.bf16.msra.mxu1 %v7388_v51 }
 0x5d6   : > { %6734 = vmatprep.subr.bf16.mxu1 %v7389_v40 }
 0x5d8   : > { %6727 = vmatmul.mubr.bf16.gmra.mrb[44].mxu1 %v4072_v25  ;;  %v8979_v25 = vld [vmem:[#allocation2 + $0x82] sm:$0xff] }
 0x5d9   : > { %6735 = vmatpush3.bf16.msra.mxu1 %v7389_v40  ;;  %6746 = vmatprep.mubr.bf16.mxu1 %v4219_v3  ;;  %v4222_v0 = vpack.c.bf16 %v8979_v25, %v8870_v59  ;;  %v7402_v3 = vld [vmem:[%s9190_s9 + $0x1b8] sm:$0xff]   ;;  %v7413_v59 = vld [vmem:[%s9190_s9 + $0x210] sm:$0xff]   ;;  %v4672_v32 = vpack.c.bf16 %v4668_v63, %v8979_v25 }
 0x5da   : > { %6736 = vmatprep.subr.bf16.mxu1 %v7390_v43 }
 0x5dd   : > { %6737 = vmatpush3.bf16.msra.mxu1 %v7390_v43 }
 0x5de   : > { %6738 = vmatprep.subr.bf16.mxu1 %v7391_v52 }
 0x5e1   : > { %6739 = vmatpush3.bf16.msra.mxu1 %v7391_v52 }
 0x5e2   : > { %6740 = vmatprep.subr.bf16.mxu1 %v7392_v53 }
 0x5e5   : > { %6741 = vmatpush3.bf16.msra.mxu1 %v7392_v53 }
 0x5e6   : > { %6742 = vmatprep.subr.bf16.mxu1 %v7393_v58 }
 0x5e9   : > { %6743 = vmatpush3.bf16.msra.mxu1 %v7393_v58 }
 0x5ea   : > { %6744 = vmatprep.subr.bf16.mxu1 %v7394_v49 }
 0x5ed   : > { %6745 = vmatpush3.bf16.msra.mxu1 %v7394_v49 }
 0x5ee   : > { %6754 = vmatprep.subr.bf16.mxu1 %v7395_v44 }
 0x5f0   : > { %6747 = vmatmul.mubr.bf16.vlgmr.msra.gmra.mrb[40].mxu1 %v4220_v22  ;;  %v7404_v22 = vld [vmem:[%s9190_s9 + $0x1c8] sm:$0xff]  }
 0x5f1   : > { %6750 = vmatprep.mubr.bf16.mxu1 %v4221_v62  ;;  %6755 = vmatpush3.bf16.msra.mxu1 %v7395_v44  ;;  %v7405_v62 = vld [vmem:[%s9190_s9 + $0x1d0] sm:$0xff]  }
 0x5f2   : > { %6756 = vmatprep.subr.bf16.mxu1 %v7396_v60 }
 0x5f5   : > { %6757 = vmatpush3.bf16.msra.mxu1 %v7396_v60 }
 0x5f6   : > { %6758 = vmatprep.subr.bf16.mxu1 %v7397_v5 }
 0x5f8   : > { %6751 = vmatmul.mubr.bf16.gmra.mrb[44].mxu1 %v4222_v0 }
 0x5f9   : > { %6759 = vmatpush3.bf16.msra.mxu1 %v7397_v5  ;;  %6770 = vmatprep.mubr.bf16.mxu1 %v8812_v10  ;;  %v4372_v10 = vpack.c.bf16 %v8534_v6, %v8906_v18  ;;  %v7408_v6 = vld [vmem:[%s9190_s9 + $0x1e8] sm:$0xff]  }
 0x5fa   : > { %6760 = vmatprep.subr.bf16.mxu1 %v7398_v17 }
 0x5fd   : > { %6761 = vmatpush3.bf16.msra.mxu1 %v7398_v17 }
 0x5fe   : > { %6762 = vmatprep.subr.bf16.mxu1 %v7399_v19 }
 0x601   : > { %6763 = vmatpush3.bf16.msra.mxu1 %v7399_v19 }
 0x602   : > { %6764 = vmatprep.subr.bf16.mxu1 %v7400_v57 }
 0x605   : > { %6765 = vmatpush3.bf16.msra.mxu1 %v7400_v57 }
 0x606   : > { %6766 = vmatprep.subr.bf16.mxu1 %v7401_v56 }
 0x609   : > { %6767 = vmatpush3.bf16.msra.mxu1 %v7401_v56 }
 0x60a   : > { %6768 = vmatprep.subr.bf16.mxu1 %v7402_v3 }
 0x60d   : > { %6769 = vmatpush3.bf16.msra.mxu1 %v7402_v3 }
 0x60e   : > { %6778 = vmatprep.subr.bf16.mxu1 %v7403_v35 }
 0x610   : > { %6771 = vmatmul.mubr.bf16.vlgmr.msra.gmra.mrb[40].mxu1 %v8819_v28  ;;  %v7407_v28 = vld [vmem:[%s9190_s9 + $0x1e0] sm:$0xff]  }
 0x611   : > { %6774 = vmatprep.mubr.bf16.mxu1 %v8832_v21  ;;  %6779 = vmatpush3.bf16.msra.mxu1 %v7403_v35  ;;  %v7409_v21 = vld [vmem:[%s9190_s9 + $0x1f0] sm:$0xff]  }
 0x612   : > { %6780 = vmatprep.subr.bf16.mxu1 %v7404_v22 }
 0x615   : > { %6781 = vmatpush3.bf16.msra.mxu1 %v7404_v22 }
 0x616   : > { %6782 = vmatprep.subr.bf16.mxu1 %v7405_v62 }
 0x618   : > { %6775 = vmatmul.mubr.bf16.gmra.mrb[44].mxu1 %v4372_v10 }
 0x619   : > { %6783 = vmatpush3.bf16.msra.mxu1 %v7405_v62  ;;  %6794 = vmatprep.mubr.bf16.mxu1 %v8733_v13  ;;  %v7410_v13 = vld [vmem:[%s9190_s9 + $0x1f8] sm:$0xff]  }
 0x61a   : > { %6784 = vmatprep.subr.bf16.mxu1 %v7406_v46 }
 0x61d   : > { %6785 = vmatpush3.bf16.msra.mxu1 %v7406_v46 }
 0x61e   : > { %6786 = vmatprep.subr.bf16.mxu1 %v7407_v28 }
 0x621   : > { %6787 = vmatpush3.bf16.msra.mxu1 %v7407_v28 }
 0x622   : > { %6788 = vmatprep.subr.bf16.mxu1 %v7408_v6 }
 0x625   : > { %6789 = vmatpush3.bf16.msra.mxu1 %v7408_v6 }
 0x626   : > { %6790 = vmatprep.subr.bf16.mxu1 %v7409_v21 }
 0x629   : > { %6791 = vmatpush3.bf16.msra.mxu1 %v7409_v21 }
 0x62a   : > { %6792 = vmatprep.subr.bf16.mxu1 %v7410_v13 }
 0x62d   : > { %6793 = vmatpush3.bf16.msra.mxu1 %v7410_v13 }
 0x62e   : > { %6802 = vmatprep.subr.bf16.mxu1 %v7411_v38 }
 0x630   : > { %6795 = vmatmul.mubr.bf16.vlgmr.msra.gmra.mrb[40].mxu1 %v8745_v11  ;;  %v7415_v11 = vld [vmem:[%s9190_s9 + $0x220] sm:$0xff]  }
 0x631   : > { %6798 = vmatprep.mubr.bf16.mxu1 %v8752_v14  ;;  %6803 = vmatpush3.bf16.msra.mxu1 %v7411_v38  ;;  %v7417_v14 = vld [vmem:[%s9190_s9 + $0x230] sm:$0xff]  }
 0x632   : > { %6804 = vmatprep.subr.bf16.mxu1 %v7412_v23 }
 0x635   : > { %6805 = vmatpush3.bf16.msra.mxu1 %v7412_v23 }
 0x636   : > { %6806 = vmatprep.subr.bf16.mxu1 %v7413_v59 }
 0x638   : > { %6799 = vmatmul.mubr.bf16.gmra.mrb[44].mxu1 %v4522_v31 }
 0x639   : > { %6807 = vmatpush3.bf16.msra.mxu1 %v7413_v59  ;;  %6818 = vmatprep.mubr.bf16.mxu1 %v8856_v54  ;;  %v7418_v54 = vld [vmem:[%s9190_s9 + $0x238] sm:$0xff]  }
 0x63a   : > { %6808 = vmatprep.subr.bf16.mxu1 %v7414_v26 }
 0x63d   : > { %6809 = vmatpush3.bf16.msra.mxu1 %v7414_v26 }
 0x63e   : > { %6810 = vmatprep.subr.bf16.mxu1 %v7415_v11 }
 0x641   : > { %6811 = vmatpush3.bf16.msra.mxu1 %v7415_v11 }
 0x642   : > { %6812 = vmatprep.subr.bf16.mxu1 %v7416_v47 }
 0x645   : > { %6813 = vmatpush3.bf16.msra.mxu1 %v7416_v47 }
 0x646   : > { %6814 = vmatprep.subr.bf16.mxu1 %v7417_v14 }
 0x649   : > { %6815 = vmatpush3.bf16.msra.mxu1 %v7417_v14  ;;  %v7426_v14 = vld [vmem:[#allocation2] sm:$0xff] }
 0x64a   : > { %6816 = vmatprep.subr.bf16.mxu1 %v7418_v54 }
 0x64d   : > { %6817 = vmatpush3.bf16.msra.mxu1 %v7418_v54 }
 0x650   : > { %6819 = vmatmul.mubr.bf16.vlgmr.msra.gmra.mrb[40].mxu1 %v8863_v61 }
 0x651   : > { %6822 = vmatprep.mubr.bf16.mxu1 %v8874_v30 }
 0x658   : > { %6823 = vmatmul.mubr.bf16.gmra.mrb[44].mxu1 %v4672_v32 }
 0x723   : > { %v6820_v12 = vpop.f32.mrb[40].mxu1 }
 0x724   : > { %v4772_v1 = vpop.f32.mrb[41].mxu1  ;;  %v4820_v18 = vadd.f32 %v6820_v12, %v5770_v20 }
 0x725   : > { %v4818_v2 = vadd.f32 %v5770_v20, %v4772_v1  ;;  %v6821_v15 = vpop.f32.mrb[42].mxu1 }
 0x726   : > { %v4775_v7 = vpop.f32.mrb[43].mxu1  ;;  %v4821_v61 = vadd.f32 %v6821_v15, %v5770_v20  ;;  %v9066_v30 = vmax.f32 %v4820_v18, 0.0 }
 0x727   : > { %v4819_v8 = vadd.f32 %v5770_v20, %v4775_v7  ;;  %v9062_v27 = vmax.f32 %v4818_v2, 0.0 }
 0x728   : > { %v9070_v29 = vmax.f32 %v4821_v61, 0.0  ;;  %v4851_v3 = vmul.f32 %v9066_v30, %v9066_v30 }
 0x729   : > { %v9064_v9 = vmax.f32 %v4819_v8, 0.0  ;;  %v4849_v5 = vmul.f32 %v9062_v27, %v9062_v27 }
 0x72a   : > { %v4852_v46 = vmul.f32 %v9070_v29, %v9070_v29 }
 0x72b   : > { %v4836_v37 = vadd.f32 %v9064_v9, %v9062_v27  ;;  %v6824_v39 = vpop.f32.mrb[44].mxu1  ;;  %v4850_v52 = vmul.f32 %v9064_v9, %v9064_v9 }
 0x72c   : > { %v4788_v4 = vpop.f32.mrb[45].mxu1  ;;  %v4824_v58 = vadd.f32 %v6824_v39, %v5770_v20 }
 0x72d   : > { %v4837_v51 = vadd.f32 %v4836_v37, %v9066_v30  ;;  %v4822_v40 = vadd.f32 %v5770_v20, %v4788_v4  ;;  %v6825_v43 = vpop.f32.mrb[46].mxu1  ;;  %v4857_v19 = vadd.f32 %v4850_v52, %v4849_v5 }
 0x72e   : > { %v4791_v53 = vpop.f32.mrb[47].mxu1  ;;  %v4825_v0 = vadd.f32 %v6825_v43, %v5770_v20  ;;  %v9083_v57 = vmax.f32 %v4824_v58, 0.0 }
 0x72f   : > { %v9075_v49 = vmax.f32 %v4822_v40, 0.0  ;;  %v4838_v44 = vadd.f32 %v4837_v51, %v9070_v29  ;;  %v4823_v60 = vadd.f32 %v5770_v20, %v4791_v53  ;;  %v4858_v62 = vadd.f32 %v4857_v19, %v4851_v3  ;;  %v5771_v51 = vld [vmem:[%s9192_s11] ss:$0 sm:$0xff] }
 0x730   : > { %v9088_v35 = vmax.f32 %v4825_v0, 0.0  ;;  %v4855_v47 = vmul.f32 %v9083_v57, %v9083_v57 }
 0x731   : > { %v4839_v25 = vadd.f32 %v4838_v44, %v9075_v49  ;;  %v9081_v17 = vmax.f32 %v4823_v60, 0.0  ;;  %v4853_v6 = vmul.f32 %v9075_v49, %v9075_v49  ;;  %v4859_v21 = vadd.f32 %v4858_v62, %v4852_v46 }
 0x732   : > { %v4856_v63 = vmul.f32 %v9088_v35, %v9088_v35 }
 0x733   : > { %v4840_v56 = vadd.f32 %v4839_v25, %v9081_v17  ;;  %v4860_v23 = vadd.f32 %v4859_v21, %v4853_v6  ;;  %v4854_v16 = vmul.f32 %v9081_v17, %v9081_v17 }
 0x735   : > { %v4841_v22 = vadd.f32 %v4840_v56, %v9083_v57  ;;  %v4861_v26 = vadd.f32 %v4860_v23, %v4854_v16 }
 0x737   : > { %v4842_v10 = vadd.f32 %v4841_v22, %v9088_v35  ;;  %v4862_v54 = vadd.f32 %v4861_v26, %v4855_v47 }
 0x739   : > { %v4843_v28 = vrot.slane %v4842_v10, 4  ;;  %v4863_v32 = vadd.f32 %v4862_v54, %v4856_v63 }
 0x73b   : > { %v4844_v13 = vadd.f32 %v4843_v28, %v4842_v10  ;;  %v4864_v20 = vrot.slane %v4863_v32, 4 }
 0x73d   : > { %v4845_v38 = vrot.slane %v4844_v13, 2 }
 0x73f   : > { %v4846_v59 = vadd.f32 %v4845_v38, %v4844_v13 }
 0x741   : > { %v4847_v31 = vrot.slane %v4846_v59, 1 }
 0x743   : > { %v4848_v11 = vadd.f32 %v4847_v31, %v4846_v59 }
 0x745   : > { %6859 = vmatmul.mubr.f32.vlgmr.msra.gmra.mrb[34].mxu0 %v4848_v11 }
 0x746   : > { %7018 = vmatpush3.bf16.msra.mxu0 %v7993_v33  ;;  %6893 = vmatprep.mubr.msk.f32.mxu0 %vm7492_vm1, %v7426_v14  ;;  %v4865_v33 = vadd.f32 %v4864_v20, %v4863_v32 }
 0x747   : > { %7019 = vmatprep.subr.bf16.mxu0 %v7491_v34 }
 0x748   : > { %v4866_v12 = vrot.slane %v4865_v33, 2 }
 0x74a   : > { %7021 = vmatpush3.bf16.msra.mxu0 %v8007_v36  ;;  %v4867_v36 = vadd.f32 %v4866_v12, %v4865_v33 }
 0x74b   : > { %7022 = vmatprep.subr.bf16.mxu0 %v7491_v34 }
 0x74e   : > { %7024 = vmatpush3.bf16.msra.mxu0 %v8019_v42  ;;  %v4868_v42 = vrot.slane %v4867_v36, 1 }
 0x74f   : > { %7025 = vmatprep.subr.bf16.mxu0 %v7491_v34 }
 0x752   : > { %7027 = vmatpush3.bf16.msra.mxu0 %v8031_v45  ;;  %v4869_v45 = vadd.f32 %v4868_v42, %v4867_v36 }
 0x753   : > { %7028 = vmatprep.subr.bf16.mxu0 %v7491_v34 }
 0x756   : > { %7030 = vmatpush3.bf16.msra.mxu0 %v8043_v48 }
 0x757   : > { %7031 = vmatprep.subr.bf16.mxu0 %v7491_v34 }
 0x75a   : > { %7033 = vmatpush3.bf16.msra.mxu0 %v8055_v24 }
 0x75b   : > { %7034 = vmatprep.subr.bf16.mxu0 %v7491_v34 }
 0x75e   : > { %7036 = vmatpush3.bf16.msra.mxu0 %v8067_v55 }
 0x75f   : > { %7037 = vmatprep.subr.bf16.mxu0 %v7491_v34 }
 0x762   : > { %7039 = vmatpush3.bf16.msra.mxu0 %v8101_v50 }
 0x765   : > { %6894 = vmatmul.mubr.f32.vlgmr.msra.gmra.mrb[44].mxu0 %v4869_v45 }
 0x818   : > { %v4936_v1 = vpop.f32.mrb[34].mxu0 }
 0x819   : > { %v6860_v2 = vpop.f32.mrb[35].mxu0  ;;  %v5010_v48 = vmul.f32 %v4936_v1, %v4936_v1  ;;  %v5018_v61 = vrot.slane %v4936_v1, %v8221_v41 }
 0x81b   : > { %v5019_v55 = vsub.f32 %v9062_v27, %v5018_v61  ;;  %v5020_v50 = vsub.f32 %v9064_v9, %v5018_v61  ;;  %v5021_v39 = vsub.f32 %v9066_v30, %v5018_v61  ;;  %v5022_v4 = vsub.f32 %v9070_v29, %v5018_v61  ;;  %v5772_v30 = vld [vmem:[%s9193_s12] ss:$0 sm:$0xff] }
 0x81c   : > { %v5023_v40 = vsub.f32 %v9075_v49, %v5018_v61  ;;  %v5024_v43 = vsub.f32 %v9081_v17, %v5018_v61  ;;  %v5025_v52 = vsub.f32 %v9083_v57, %v5018_v61  ;;  %v5026_v27 = vsub.f32 %v9088_v35, %v5018_v61 }
 0x838   : > { %v5006_v15 = vpop.f32.mrb[44].mxu0 }
 0x839   : > { %v5011_v7 = vsub.f32 %v5006_v15, %v5010_v48  ;;  %v6895_v18 = vpop.f32.mrb[45].mxu0 }
 0x83b   : > { %v5012_v8 = vmax.f32 %v5011_v7, 0.0 }
 0x83d   : > { %v5013_v24 = vadd.f32 1e-05, %v5012_v8 }
 0x83f   : > { %7423 = vrsqrt.f32 %v5013_v24 }
 0x849   : > { %v7424_v37 = vpop.eup %7423 }
 0x84a   : > { %v5030_v34 = vrot.slane %v7424_v37, %v8221_v41 }
 0x84c   : > { %v5031_v53 = vmul.f32 %v5030_v34, %v5019_v55  ;;  %v5032_v41 = vmul.f32 %v5030_v34, %v5020_v50  ;;  %v5033_v58 = vmul.f32 %v5030_v34, %v5021_v39  ;;  %v5034_v9 = vmul.f32 %v5030_v34, %v5022_v4 }
 0x84d   : > { %v5035_v29 = vmul.f32 %v5030_v34, %v5023_v40  ;;  %v5036_v44 = vmul.f32 %v5030_v34, %v5024_v43  ;;  %v5037_v60 = vmul.f32 %v5030_v34, %v5025_v52  ;;  %v5038_v5 = vmul.f32 %v5030_v34, %v5026_v27 }
 0x84e   : > { %v5045_v25 = vmul.f32 %v5771_v51, %v5031_v53  ;;  %v5046_v49 = vmul.f32 %v5771_v51, %v5032_v41  ;;  %v5047_v0 = vmul.f32 %v5771_v51, %v5033_v58  ;;  %v5048_v17 = vmul.f32 %v5771_v51, %v5034_v9 }
 0x84f   : > { %v5049_v56 = vmul.f32 %v5771_v51, %v5035_v29  ;;  %v5050_v22 = vmul.f32 %v5771_v51, %v5036_v44  ;;  %v5051_v46 = vmul.f32 %v5771_v51, %v5037_v60  ;;  %v5052_v21 = vmul.f32 %v5771_v51, %v5038_v5 }
 0x850   : > { %v5059_v19 = vadd.f32 %v5772_v30, %v5045_v25  ;;  %v5060_v57 = vadd.f32 %v5772_v30, %v5046_v49  ;;  %v5061_v3 = vadd.f32 %v5772_v30, %v5047_v0  ;;  %v5062_v62 = vadd.f32 %v5772_v30, %v5048_v17 }
 0x851   : > { %v5063_v28 = vadd.f32 %v5772_v30, %v5049_v56  ;;  %v5064_v13 = vadd.f32 %v5772_v30, %v5050_v22  ;;  %v5065_v23 = vadd.f32 %v5772_v30, %v5051_v46  ;;  %v5066_v16 = vadd.f32 %v5772_v30, %v5052_v21 }
 0x852   : > { %v5067_v35 = vadd.f32 %v5060_v57, %v5059_v19 }
 0x854   : > { %v5068_v10 = vadd.f32 %v5067_v35, %v5061_v3 }
 0x856   : > { %v5069_v6 = vadd.f32 %v5068_v10, %v5062_v62 }
 0x858   : > { %v5070_v38 = vadd.f32 %v5069_v6, %v5063_v28 }
 0x85a   : > { %v5071_v59 = vadd.f32 %v5070_v38, %v5064_v13 }
 0x85c   : > { %v5072_v31 = vadd.f32 %v5071_v59, %v5065_v23 }
 0x85e   : > { %v5073_v26 = vadd.f32 %v5072_v31, %v5066_v16 }
 0x860   : > { %v5074_v11 = vrot.slane %v5073_v26, 4 }
 0x862   : > { %v5075_v47 = vadd.f32 %v5074_v11, %v5073_v26 }
 0x864   : > { %v5076_v14 = vrot.slane %v5075_v47, 2 }
 0x866   : > { %v5077_v54 = vadd.f32 %v5076_v14, %v5075_v47 }
 0x868   : > { %v5078_v63 = vrot.slane %v5077_v54, 1 }
 0x86a   : > { %v5079_v32 = vadd.f32 %v5078_v63, %v5077_v54 }
 0x86c   : > { %v5081_v20 = vmul.f32 0.015625, %v5079_v32 }
 0x86e   : > { %5082 = vst [vmem:[%s459_s26] sm:$0x1] %v5081_v20 }
 0x86f   : > { %7440 = shalt.err (!%p7437_p3)
}
 0x870   : > { %s7441_s19 = scalar_lea.hbm %s9139_s20, 16  ;;  %s7445_s27 = scalar_lea.hbm %s9195_s14, 32 }
 0x871   : > { %p7442_p4 = scmp.ne.s32.totalorder %s9139_s20, %s7441_s19  ;;  %p7446_p9 = scmp.lt.u32.totalorder %s9139_s20, %s9195_s14 }
 0x872   : > { %p7447_p10 = scmp.lt.u32.totalorder %s7445_s27, %s7441_s19  ;;  %p7449_p12 = scmp.lt.u32.totalorder %s7441_s19, %s9139_s20 }
 0x873   : > { %p7443_p7 = pnand %p7442_p4, %p7608_p5 }
 0x874   : > { %p7448_p11 = por %p7447_p10, %p7446_p9 }
 0x875   : > { %p7444_p8 = pneg %p7443_p7 }
 0x876   : > { %p7450_p13 = por %p7449_p12, %p7448_p11 }
 0x878   : > { %p7451_p0 = pnand %p7450_p13, %p7444_p8 }
 0x87a   : > { %7454 = shalt.err (!%p7451_p0)
}
 0x87b   : > { %7169 = dma.vmem_to_hbm [thread:$0]  (%p7608_p5), %s9141_s18, 16, %s9139_s20, %s5084_s22  }
 0x87c PF: > { %p7175_p1 = scmp.ge.s32.totalorder %s7489_s16, 2  ;;  %s5108_s15 = sand.u32 1, %s7477_s29  }
 0x87d   : > { %s5109_s28 = scalar_lea.sflag [#allocation4], %s5108_s15 }
 0x87e   : > { %p7172_p2 = pnand %p7175_p1, %p7612_p6 }
 0x880   : > { %7472 = dma.done.wait (!%p7172_p2), %s5109_s28, 16  }
 0x881   : > { %7474 = vsyncadd (!%p7172_p2), %s5109_s28, 4294967280  ;;  %s9207_s16 = sld [smem:[#allocation7_spill]]  ;;  %s9208_s19 = sld [smem:[#allocation6_spill]] }
 0x882   : > { %s9209_s15 = sld [smem:[#allocation8_spill]]  ;;  %s9210_s29 = smov %s7481_s30 }
 0x887   : > { %p24_p3 = scmp.ge.s32.totalorder %s9207_s16, 4   ;;  %s9211_s30 = smov %s9208_s19 }
 0x889   :  { %26 = sbr.rel (!%p24_p3) target bundleno = 3 (0x3), region = 133 }
 0x890   :  { %5113 = vsyncpa [#allocation4], 1 }
 0x891   :  { %5115 = vsyncpa [#allocation4 + $0x1], 1 }

</bundles_post_ra>
